<compile_context>
chip_gen: v6e
topology: v6e:2x2x1
jax: 0.10.0
libtpu: 0.0.40
codegen_flags: <defaults>
</compile_context>

<pallas_src>
import functools

import jax
import jax.numpy as jnp
import numpy as np
from jax import lax
from jax.experimental import pallas as pl
from jax.experimental.pallas import tpu as pltpu

EPS = 1e-5  # PyTorch GroupNorm default eps


# ---------------------------------------------------------------------------
# capability probe: single-buffered BlockSpecs (pipeline_mode=pl.Buffered(1))
# for grid-invariant inputs.  Falls back to default double-buffering if the
# installed JAX/Mosaic rejects it, so the kernel always compiles and runs.
# ---------------------------------------------------------------------------
def _probe_kernel(x_ref, o_ref):
    o_ref[...] = x_ref[...] + 1.0


@functools.lru_cache(maxsize=None)
def _buffered_one_ok():
    try:
        fn = pl.pallas_call(
            _probe_kernel,
            out_shape=jax.ShapeDtypeStruct((16, 128), jnp.float32),
            grid=(2,),
            in_specs=[pl.BlockSpec((8, 128), lambda i: (0, 0),
                                   pipeline_mode=pl.Buffered(1))],
            out_specs=pl.BlockSpec((8, 128), lambda i: (i, 0)),
        )
        jax.jit(fn).lower(jax.ShapeDtypeStruct((8, 128), jnp.float32)).compile()
        return True
    except Exception:   # any rejection -> plain (double-buffered) BlockSpec
        return False


def _const_spec(shape):
    """BlockSpec for a grid-invariant input (constant index map, fetched once)."""
    idx = lambda n: (0,) * len(shape)
    if _buffered_one_ok():
        return pl.BlockSpec(shape, idx, pipeline_mode=pl.Buffered(1))
    return pl.BlockSpec(shape, idx)


# ---------------------------------------------------------------------------
# fused RK4-over-ODEfunc kernel (one image block per grid step)
# ---------------------------------------------------------------------------
def _odeblock_rk4_kernel(x_ref, w1_ref, w2_ref, gred_ref, gn_ref, o_ref, *,
                         H, inv_n, num_steps):
    """Full fixed-step RK4 solve of the ODEfunc on a block of Nb images.

    Layout: each image is a lane-dense (H, W*C) slab; the Nb images of the block
    are stacked along the sublane axis as (Nb*H, W*C).
    """
    Nb, _, WC = x_ref.shape
    R = Nb * H
    dt = 1.0 / num_steps

    y0 = x_ref[...].reshape(R, WC)        # f32 state
    w1 = w1_ref[...]                      # (WC, 3*WC) conv1 banded weight, kh-stacked
    w2 = w2_ref[...]                      # (WC, 3*WC) conv2
    gred = gred_ref[...]                  # (WC, WC)   0/1 per-group lane reduce/bcast
    gn = gn_ref[...]                      # (6, WC)    g1,b1,g2,b2,g3,b3 (W-tiled)

    # Vertical-tap masks, hoisted: computed once, reused by every conv of every
    # RK4 eval (JAX does not CSE broadcasted iota).
    h_idx = lax.broadcasted_iota(jnp.int32, (Nb, H, WC), 1).reshape(R, WC)
    top_ok = h_idx >= 1          # row h-1 exists inside this image (zero pad in H)
    bot_ok = h_idx <= H - 2      # row h+1 exists inside this image

    def conv3x3(x, w):
        # Horizontal taps + channel mixing folded into ONE matmul against the
        # kh-stacked banded weight; operands cast to the weight dtype (bf16 on
        # the perf path) with an f32 accumulator.
        p = jnp.dot(x.astype(w.dtype), w, preferred_element_type=jnp.float32)
        p0, p1, p2 = p[:, :WC], p[:, WC:2 * WC], p[:, 2 * WC:]
        top = jnp.where(top_ok, pltpu.roll(p0, shift=1, axis=0), 0.0)      # row h-1
        bot = jnp.where(bot_ok, pltpu.roll(p2, shift=R - 1, axis=0), 0.0)  # row h+1
        return top + p1 + bot

    def group_norm(x, gamma, beta, relu):
        # One-pass stats (var = E[x^2] - E[x]^2), kept in f32 for numerics.
        # The per-group lane reduce of [sum(x); sum(x^2)] for all Nb images is a
        # single (2*Nb, WC) x (WC, WC) matmul (one MXU weight push per GN).
        x3 = x.reshape(Nb, H, WC)
        s1 = jnp.sum(x3, axis=1)                       # (Nb, WC)
        s2 = jnp.sum(x3 * x3, axis=1)                  # (Nb, WC)
        red = jnp.dot(jnp.concatenate([s1, s2], axis=0), gred,
                      preferred_element_type=jnp.float32) * inv_n
        mean, msq = red[:Nb], red[Nb:]
        var = jnp.maximum(msq - mean * mean, 0.0)
        scale = lax.rsqrt(var + EPS) * gamma           # (Nb, WC)
        shift = beta - mean * scale                    # mean folded into shift
        out = x3 * scale[:, None, :] + shift[:, None, :]
        if relu:
            out = jnp.maximum(out, 0.0)
        return out.reshape(R, WC)

    def odefunc(y):   # GN+ReLU -> conv1 -> GN+ReLU -> conv2 -> GN
        out = group_norm(y, gn[0:1], gn[1:2], relu=True)
        out = conv3x3(out, w1)
        out = group_norm(out, gn[2:3], gn[3:4], relu=True)
        out = conv3x3(out, w2)
        return group_norm(out, gn[4:5], gn[5:6], relu=False)

    def rk4_step(_, y):
        k1 = odefunc(y)
        k2 = odefunc(y + (0.5 * dt) * k1)
        k3 = odefunc(y + (0.5 * dt) * k2)
        k4 = odefunc(y + dt * k3)
        return y + (dt / 6.0) * (k1 + 2.0 * k2 + 2.0 * k3 + k4)

    y = lax.fori_loop(0, num_steps, rk4_step, y0)
    o_ref[...] = y.reshape(Nb, H, WC)


# ---------------------------------------------------------------------------
# wrapper-side layout plumbing (built once, outside the per-call trace)
# ---------------------------------------------------------------------------
def _conv_to_banded_stacked(w_oihw, W, dtype):
    """Torch OIHW (Cout, Cin, 3, 3) conv weight -> (W*Cin, 3*W*Cout) matrix.

    Column block kh in {0,1,2} is the banded block matrix for vertical tap kh:
    it folds the three horizontal taps + channel mixing into one matmul and
    handles zero padding in W.  Stacking the kh blocks along the output lanes
    gives one MXU weight per conv (single weight-push chain, fills the 256-wide
    MXU on v6e/v7x).
    """
    w = np.asarray(w_oihw, np.float32)
    Cout, Cin, KH, KW = w.shape
    wt = np.transpose(w, (2, 3, 1, 0))                    # (KH, KW, Cin, Cout)
    mats = []
    for kh in range(KH):
        m = np.zeros((W * Cin, W * Cout), np.float32)
        for kw in range(KW):
            dw = kw - (KW // 2)
            sel = np.zeros((W, W), np.float32)
            for wq in range(W):
                wj = wq + dw
                if 0 <= wj < W:
                    sel[wj, wq] = 1.0                     # zero padding in W
            m += np.kron(sel, wt[kh, kw])
        mats.append(m)
    return jnp.asarray(np.concatenate(mats, axis=1), dtype)


def prepare_odeblock_params(params, W, conv_dtype=jnp.bfloat16):
    """Build all kernel constants ONCE (numpy, host-side, outside any jit trace).

    Conv matmul weights are stored in `conv_dtype` (bf16 default: native MXU
    dtype on v5e/v6e/v7x and half the weight DMA bytes); the group-reduce matrix
    and gamma/beta stay f32 so GroupNorm statistics stay exact.
    """
    _buffered_one_ok()   # warm the Buffered(1) capability probe outside jit
    C = int(np.asarray(params["g1"]).shape[0])
    G = min(32, C)
    assert C % G == 0, "GroupNorm(min(32, C)) requires C % min(32, C) == 0"
    cs = C // G
    WC = W * C

    w1s = _conv_to_banded_stacked(params["w1"], W, conv_dtype)   # (WC, 3*WC)
    w2s = _conv_to_banded_stacked(params["w2"], W, conv_dtype)

    lane_grp = (np.arange(WC) % C) // cs
    gred = jnp.asarray((lane_grp[:, None] == lane_grp[None, :]).astype(np.float32))

    gn = jnp.asarray(np.stack(
        [np.tile(np.asarray(params[k], np.float32), W)
         for k in ("g1", "b1", "g2", "b2", "g3", "b3")], axis=0))   # (6, WC)

    return {"w1s": w1s, "w2s": w2s, "gred": gred, "gn": gn}


@functools.partial(jax.jit, static_argnames=("num_steps", "images_per_block"))
def odeblock_forward(x_nchw, prep, num_steps=2, images_per_block=1):
    """ODEBlock.forward: integrate the ODEfunc from t=0 to t=1 and return y(1).

    One fused pallas_call runs the whole fixed-step RK4 integration (all
    num_steps*4 ODEfunc evaluations) with the banded conv weights resident in
    VMEM; activations stay lane-dense for the entire solve.

    TODO(synk): torchdiffeq's adaptive dopri5 step-size control (args.tol) is
    host-side control flow; fixed-step RK4 over [0, 1] is used here instead.
    TODO(synk): the nfe counter is Python-side mutable state, not kernel math.
    """
    N, C, H, W = x_nchw.shape
    G = min(32, C)
    assert C % G == 0, "GroupNorm(min(32, C)) requires C % min(32, C) == 0"
    cs = C // G
    WC = W * C
    Nb = images_per_block
    assert N % Nb == 0, "images_per_block must divide the batch"

    # NCHW -> lane-dense (N, H, W*C), once for the whole integration
    x = jnp.transpose(x_nchw, (0, 2, 3, 1)).reshape(N, H, WC).astype(jnp.float32)

    kernel = functools.partial(_odeblock_rk4_kernel, H=H,
                               inv_n=1.0 / float(H * W * cs), num_steps=num_steps)

    # VMEM scaling guard: the banded weights grow as (W*C)^2; raise the scoped
    # limit only when the resident constants + activations stop fitting the
    # default (e.g. large C on v7x's 64 MiB physical VMEM).
    wbytes = jnp.dtype(prep["w1s"].dtype).itemsize
    const_bytes = 2 * WC * 3 * WC * wbytes + WC * WC * 4 + 6 * WC * 4
    act_bytes = 16 * Nb * H * WC * 4                 # y, k1..k4, conv temps, headroom
    need = 2 * (2 * Nb * H * WC * 4) + 2 * const_bytes + act_bytes
    vmem_limit = (int(min(need * 1.25, 100 * 1024 * 1024))
                  if need > 28 * 1024 * 1024 else None)

    out = pl.pallas_call(
        kernel,
        out_shape=jax.ShapeDtypeStruct((N, H, WC), jnp.float32),
        grid_spec=pltpu.PrefetchScalarGridSpec(
            num_scalar_prefetch=0,
            grid=(N // Nb,),
            in_specs=[
                pl.BlockSpec((Nb, H, WC), lambda n: (n, 0, 0)),   # x block (lane-dense)
                _const_spec((WC, 3 * WC)),                        # conv1 banded weight
                _const_spec((WC, 3 * WC)),                        # conv2 banded weight
                _const_spec((WC, WC)),                            # group-reduce matrix
                _const_spec((6, WC)),                             # packed gamma/beta
            ],
            out_specs=pl.BlockSpec((Nb, H, WC), lambda n: (n, 0, 0)),
        ),
        compiler_params=pltpu.CompilerParams(
            dimension_semantics=("parallel",),   # v7x: one image block per TensorCore
            vmem_limit_bytes=vmem_limit),
    )(x, prep["w1s"], prep["w2s"], prep["gred"], prep["gn"])

    return jnp.transpose(out.reshape(N, H, W, C), (0, 3, 1, 2))   # back to NCHW


# ---------------------------------------------------------------------------
# pure-JAX references (PyTorch semantics, NCHW)
# ---------------------------------------------------------------------------
def ref_odefunc(x, params):
    def gn(x, gamma, beta):
        N, C, H, W = x.shape
        G = min(32, C)
        xg = x.reshape(N, G, -1)
        mean = xg.mean(-1, keepdims=True)
        var = xg.var(-1, keepdims=True)
        xn = ((xg - mean) / jnp.sqrt(var + EPS)).reshape(N, C, H, W)
        return xn * gamma[None, :, None, None] + beta[None, :, None, None]

    def conv(x, w):
        return lax.conv_general_dilated(
            x, w, window_strides=(1, 1), padding=((1, 1), (1, 1)),
            dimension_numbers=("NCHW", "OIHW", "NCHW"))

    out = gn(x, params["g1"], params["b1"])
    out = jnp.maximum(out, 0.0)
    out = conv(out, params["w1"])
    out = gn(out, params["g2"], params["b2"])
    out = jnp.maximum(out, 0.0)
    out = conv(out, params["w2"])
    out = gn(out, params["g3"], params["b3"])
    return out


def ref_odeblock(x, params, num_steps=2):
    dt = 1.0 / num_steps
    f = lambda y: ref_odefunc(y, params)
    y = x.astype(jnp.float32)
    for _ in range(num_steps):
        k1 = f(y)
        k2 = f(y + 0.5 * dt * k1)
        k3 = f(y + 0.5 * dt * k2)
        k4 = f(y + dt * k3)
        y = y + (dt / 6.0) * (k1 + 2.0 * k2 + 2.0 * k3 + k4)
    return y


if __name__ == "__main__":
    N, C, H, W = 2, 8, 16, 16   # dim=8 -> GroupNorm(8, 8); W*C = 128 lanes (dense)
    key = jax.random.PRNGKey(0)
    kx, k1, k2, kg = jax.random.split(key, 4)

    x = jax.random.normal(kx, (N, C, H, W), jnp.float32)
    params = {
        "w1": 0.1 * jax.random.normal(k1, (C, C, 3, 3), jnp.float32),  # conv1 OIHW, no bias
        "w2": 0.1 * jax.random.normal(k2, (C, C, 3, 3), jnp.float32),  # conv2 OIHW, no bias
    }
    gkeys = jax.random.split(kg, 6)
    for i, name in enumerate(("g1", "b1", "g2", "b2", "g3", "b3")):
        base = 1.0 if name.startswith("g") else 0.0
        params[name] = base + 0.1 * jax.random.normal(gkeys[i], (C,), jnp.float32)

    ref = np.asarray(ref_odeblock(x, params, num_steps=2))

    # 1) structural check: f32 matmul path, one image per grid step (v7x layout)
    prep_f32 = prepare_odeblock_params(params, W, conv_dtype=jnp.float32)
    out_f32 = odeblock_forward(x, prep_f32, num_steps=2, images_per_block=1)
    jax.block_until_ready(out_f32)
    np.testing.assert_allclose(np.asarray(out_f32), ref, rtol=1e-3, atol=1e-3)

    # 2) perf path: bf16 conv matmuls + whole batch in one block (v5e/v6e layout,
    #    M = N*H MXU rows per push); looser gate because of bf16 operands.
    prep_bf16 = prepare_odeblock_params(params, W, conv_dtype=jnp.bfloat16)
    out_bf16 = odeblock_forward(x, prep_bf16, num_steps=2, images_per_block=N)
    jax.block_until_ready(out_bf16)
    np.testing.assert_allclose(np.asarray(out_bf16), ref, rtol=5e-2, atol=5e-2)

    print("KERNEL_OK")
</pallas_src>

<mosaic_0001>
module attributes {stable_mosaic.version = 11 : i64} {
  func.func @_odeblock_rk4_kernel(%arg0: i32, %arg1: memref<1x16x128xf32, #tpu.memory_space<vmem>>, %arg2: memref<128x384xf32, #tpu.memory_space<vmem>>, %arg3: memref<128x384xf32, #tpu.memory_space<vmem>>, %arg4: memref<128x128xf32, #tpu.memory_space<vmem>>, %arg5: memref<6x128xf32, #tpu.memory_space<vmem>>, %arg6: memref<1x16x128xf32, #tpu.memory_space<vmem>>) attributes {dimension_semantics = [#tpu.dimension_semantics<parallel>], iteration_bounds = array<i64: 2>, scalar_prefetch = 0 : i64, scratch_operands = 0 : i64, tpu.core_type = #tpu.core_type<tc>, window_params = [{transform_indices = @transform_0, window_bounds = array<i64: 1, 16, 128>}, {pipeline_mode = #tpu.pipeline_mode<synchronous>, transform_indices = @transform_1, window_bounds = array<i64: 128, 384>}, {pipeline_mode = #tpu.pipeline_mode<synchronous>, transform_indices = @transform_2, window_bounds = array<i64: 128, 384>}, {pipeline_mode = #tpu.pipeline_mode<synchronous>, transform_indices = @transform_3, window_bounds = array<i64: 128, 128>}, {pipeline_mode = #tpu.pipeline_mode<synchronous>, transform_indices = @transform_4, window_bounds = array<i64: 6, 128>}, {transform_indices = @transform_5, window_bounds = array<i64: 1, 16, 128>}]} {
    %c0 = arith.constant 0 : index
    %c0_0 = arith.constant 0 : index
    %c0_1 = arith.constant 0 : index
    %0 = vector.load %arg1[%c0, %c0_0, %c0_1] : memref<1x16x128xf32, #tpu.memory_space<vmem>>, vector<1x16x128xf32>
    %1 = vector.shape_cast %0 : vector<1x16x128xf32> to vector<16x128xf32>
    %c0_2 = arith.constant 0 : index
    %c0_3 = arith.constant 0 : index
    %2 = vector.load %arg2[%c0_2, %c0_3] : memref<128x384xf32, #tpu.memory_space<vmem>>, vector<128x384xf32>
    %c0_4 = arith.constant 0 : index
    %c0_5 = arith.constant 0 : index
    %3 = vector.load %arg3[%c0_4, %c0_5] : memref<128x384xf32, #tpu.memory_space<vmem>>, vector<128x384xf32>
    %c0_6 = arith.constant 0 : index
    %c0_7 = arith.constant 0 : index
    %4 = vector.load %arg4[%c0_6, %c0_7] : memref<128x128xf32, #tpu.memory_space<vmem>>, vector<128x128xf32>
    %c0_8 = arith.constant 0 : index
    %c0_9 = arith.constant 0 : index
    %5 = vector.load %arg5[%c0_8, %c0_9] : memref<6x128xf32, #tpu.memory_space<vmem>>, vector<6x128xf32>
    %6 = tpu.iota {dimensions = array<i32: 1>} : vector<1x16x128xi32>
    %7 = vector.shape_cast %6 : vector<1x16x128xi32> to vector<16x128xi32>
    %c1_i32 = arith.constant 1 : i32
    %8 = vector.broadcast %c1_i32 : i32 to vector<16x128xi32>
    %9 = arith.cmpi sge, %7, %8 : vector<16x128xi32>
    %c14_i32 = arith.constant 14 : i32
    %10 = vector.broadcast %c14_i32 : i32 to vector<16x128xi32>
    %11 = arith.cmpi sle, %7, %10 : vector<16x128xi32>
    %c0_i32 = arith.constant 0 : i32
    %c2_i32 = arith.constant 2 : i32
    %12 = arith.addi %c0_i32, %c2_i32 : i32
    %c1_i32_10 = arith.constant 1 : i32
    %13 = scf.for %arg7 = %c0_i32 to %12 step %c1_i32_10 iter_args(%arg8 = %1) -> (vector<16x128xf32>)  : i32 {
      %16 = vector.extract_strided_slice %5 {offsets = [0, 0], sizes = [1, 128], strides = [1, 1]} : vector<6x128xf32> to vector<1x128xf32>
      %17 = vector.extract_strided_slice %5 {offsets = [1, 0], sizes = [1, 128], strides = [1, 1]} : vector<6x128xf32> to vector<1x128xf32>
      %18 = vector.shape_cast %arg8 : vector<16x128xf32> to vector<1x16x128xf32>
      %cst = arith.constant dense<0.000000e+00> : vector<1x128xf32>
      %19 = vector.multi_reduction <add>, %18, %cst [1] : vector<1x16x128xf32> to vector<1x128xf32>
      %20 = arith.mulf %18, %18 : vector<1x16x128xf32>
      %cst_14 = arith.constant dense<0.000000e+00> : vector<1x128xf32>
      %21 = vector.multi_reduction <add>, %20, %cst_14 [1] : vector<1x16x128xf32> to vector<1x128xf32>
      %22 = tpu.concatenate %19, %21 in 0 : vector<1x128xf32>, vector<1x128xf32> -> vector<2x128xf32>
      %cst_15 = arith.constant dense<0.000000e+00> : vector<2x128xf32>
      %23 = tpu.matmul %22, %4, %cst_15 {dimension_numbers = #tpu.dot_dimension_numbers<[1], [0], [0], [1], [0, 0, 1, 1], [], []>} : vector<2x128xf32>, vector<128x128xf32>, vector<2x128xf32> -> vector<2x128xf32>
      %cst_16 = arith.constant 3.906250e-03 : f32
      %24 = vector.broadcast %cst_16 : f32 to vector<2x128xf32>
      %25 = arith.mulf %23, %24 : vector<2x128xf32>
      %26 = vector.extract_strided_slice %25 {offsets = [0, 0], sizes = [1, 128], strides = [1, 1]} : vector<2x128xf32> to vector<1x128xf32>
      %27 = vector.extract_strided_slice %25 {offsets = [1, 0], sizes = [1, 128], strides = [1, 1]} : vector<2x128xf32> to vector<1x128xf32>
      %28 = arith.mulf %26, %26 : vector<1x128xf32>
      %29 = arith.subf %27, %28 : vector<1x128xf32>
      %cst_17 = arith.constant 0.000000e+00 : f32
      %30 = vector.broadcast %cst_17 : f32 to vector<1x128xf32>
      %31 = arith.maximumf %29, %30 : vector<1x128xf32>
      %cst_18 = arith.constant 9.99999974E-6 : f32
      %32 = vector.broadcast %cst_18 : f32 to vector<1x128xf32>
      %33 = arith.addf %31, %32 : vector<1x128xf32>
      %34 = math.rsqrt %33 : vector<1x128xf32>
      %35 = arith.mulf %34, %16 : vector<1x128xf32>
      %36 = arith.mulf %26, %35 : vector<1x128xf32>
      %37 = arith.subf %17, %36 : vector<1x128xf32>
      %38 = vector.shape_cast %35 : vector<1x128xf32> to vector<1x1x128xf32>
      %39 = vector.broadcast %38 : vector<1x1x128xf32> to vector<1x16x128xf32>
      %40 = arith.mulf %18, %39 : vector<1x16x128xf32>
      %41 = vector.shape_cast %37 : vector<1x128xf32> to vector<1x1x128xf32>
      %42 = vector.broadcast %41 : vector<1x1x128xf32> to vector<1x16x128xf32>
      %43 = arith.addf %40, %42 : vector<1x16x128xf32>
      %cst_19 = arith.constant 0.000000e+00 : f32
      %44 = vector.broadcast %cst_19 : f32 to vector<1x16x128xf32>
      %45 = arith.maximumf %43, %44 : vector<1x16x128xf32>
      %46 = vector.shape_cast %45 : vector<1x16x128xf32> to vector<16x128xf32>
      %cst_20 = arith.constant dense<0.000000e+00> : vector<16x384xf32>
      %47 = tpu.matmul %46, %2, %cst_20 {dimension_numbers = #tpu.dot_dimension_numbers<[1], [0], [0], [1], [0, 0, 1, 1], [], []>} : vector<16x128xf32>, vector<128x384xf32>, vector<16x384xf32> -> vector<16x384xf32>
      %48 = vector.extract_strided_slice %47 {offsets = [0, 0], sizes = [16, 128], strides = [1, 1]} : vector<16x384xf32> to vector<16x128xf32>
      %49 = vector.extract_strided_slice %47 {offsets = [0, 128], sizes = [16, 128], strides = [1, 1]} : vector<16x384xf32> to vector<16x128xf32>
      %50 = vector.extract_strided_slice %47 {offsets = [0, 256], sizes = [16, 128], strides = [1, 1]} : vector<16x384xf32> to vector<16x128xf32>
      %c1_i32_21 = arith.constant 1 : i32
      %51 = tpu.dynamic_rotate %48 by %c1_i32_21 dim 0 : vector<16x128xf32>, i32 -> vector<16x128xf32>
      %cst_22 = arith.constant 0.000000e+00 : f32
      %52 = vector.broadcast %cst_22 : f32 to vector<16x128xf32>
      %53 = arith.select %9, %51, %52 : vector<16x128xi1>, vector<16x128xf32>
      %c15_i32 = arith.constant 15 : i32
      %54 = tpu.dynamic_rotate %50 by %c15_i32 dim 0 : vector<16x128xf32>, i32 -> vector<16x128xf32>
      %cst_23 = arith.constant 0.000000e+00 : f32
      %55 = vector.broadcast %cst_23 : f32 to vector<16x128xf32>
      %56 = arith.select %11, %54, %55 : vector<16x128xi1>, vector<16x128xf32>
      %57 = arith.addf %53, %49 : vector<16x128xf32>
      %58 = arith.addf %57, %56 : vector<16x128xf32>
      %59 = vector.extract_strided_slice %5 {offsets = [2, 0], sizes = [1, 128], strides = [1, 1]} : vector<6x128xf32> to vector<1x128xf32>
      %60 = vector.extract_strided_slice %5 {offsets = [3, 0], sizes = [1, 128], strides = [1, 1]} : vector<6x128xf32> to vector<1x128xf32>
      %61 = vector.shape_cast %58 : vector<16x128xf32> to vector<1x16x128xf32>
      %cst_24 = arith.constant dense<0.000000e+00> : vector<1x128xf32>
      %62 = vector.multi_reduction <add>, %61, %cst_24 [1] : vector<1x16x128xf32> to vector<1x128xf32>
      %63 = arith.mulf %61, %61 : vector<1x16x128xf32>
      %cst_25 = arith.constant dense<0.000000e+00> : vector<1x128xf32>
      %64 = vector.multi_reduction <add>, %63, %cst_25 [1] : vector<1x16x128xf32> to vector<1x128xf32>
      %65 = tpu.concatenate %62, %64 in 0 : vector<1x128xf32>, vector<1x128xf32> -> vector<2x128xf32>
      %cst_26 = arith.constant dense<0.000000e+00> : vector<2x128xf32>
      %66 = tpu.matmul %65, %4, %cst_26 {dimension_numbers = #tpu.dot_dimension_numbers<[1], [0], [0], [1], [0, 0, 1, 1], [], []>} : vector<2x128xf32>, vector<128x128xf32>, vector<2x128xf32> -> vector<2x128xf32>
      %cst_27 = arith.constant 3.906250e-03 : f32
      %67 = vector.broadcast %cst_27 : f32 to vector<2x128xf32>
      %68 = arith.mulf %66, %67 : vector<2x128xf32>
      %69 = vector.extract_strided_slice %68 {offsets = [0, 0], sizes = [1, 128], strides = [1, 1]} : vector<2x128xf32> to vector<1x128xf32>
      %70 = vector.extract_strided_slice %68 {offsets = [1, 0], sizes = [1, 128], strides = [1, 1]} : vector<2x128xf32> to vector<1x128xf32>
      %71 = arith.mulf %69, %69 : vector<1x128xf32>
      %72 = arith.subf %70, %71 : vector<1x128xf32>
      %cst_28 = arith.constant 0.000000e+00 : f32
      %73 = vector.broadcast %cst_28 : f32 to vector<1x128xf32>
      %74 = arith.maximumf %72, %73 : vector<1x128xf32>
      %cst_29 = arith.constant 9.99999974E-6 : f32
      %75 = vector.broadcast %cst_29 : f32 to vector<1x128xf32>
      %76 = arith.addf %74, %75 : vector<1x128xf32>
      %77 = math.rsqrt %76 : vector<1x128xf32>
      %78 = arith.mulf %77, %59 : vector<1x128xf32>
      %79 = arith.mulf %69, %78 : vector<1x128xf32>
      %80 = arith.subf %60, %79 : vector<1x128xf32>
      %81 = vector.shape_cast %78 : vector<1x128xf32> to vector<1x1x128xf32>
      %82 = vector.broadcast %81 : vector<1x1x128xf32> to vector<1x16x128xf32>
      %83 = arith.mulf %61, %82 : vector<1x16x128xf32>
      %84 = vector.shape_cast %80 : vector<1x128xf32> to vector<1x1x128xf32>
      %85 = vector.broadcast %84 : vector<1x1x128xf32> to vector<1x16x128xf32>
      %86 = arith.addf %83, %85 : vector<1x16x128xf32>
      %cst_30 = arith.constant 0.000000e+00 : f32
      %87 = vector.broadcast %cst_30 : f32 to vector<1x16x128xf32>
      %88 = arith.maximumf %86, %87 : vector<1x16x128xf32>
      %89 = vector.shape_cast %88 : vector<1x16x128xf32> to vector<16x128xf32>
      %cst_31 = arith.constant dense<0.000000e+00> : vector<16x384xf32>
      %90 = tpu.matmul %89, %3, %cst_31 {dimension_numbers = #tpu.dot_dimension_numbers<[1], [0], [0], [1], [0, 0, 1, 1], [], []>} : vector<16x128xf32>, vector<128x384xf32>, vector<16x384xf32> -> vector<16x384xf32>
      %91 = vector.extract_strided_slice %90 {offsets = [0, 0], sizes = [16, 128], strides = [1, 1]} : vector<16x384xf32> to vector<16x128xf32>
      %92 = vector.extract_strided_slice %90 {offsets = [0, 128], sizes = [16, 128], strides = [1, 1]} : vector<16x384xf32> to vector<16x128xf32>
      %93 = vector.extract_strided_slice %90 {offsets = [0, 256], sizes = [16, 128], strides = [1, 1]} : vector<16x384xf32> to vector<16x128xf32>
      %c1_i32_32 = arith.constant 1 : i32
      %94 = tpu.dynamic_rotate %91 by %c1_i32_32 dim 0 : vector<16x128xf32>, i32 -> vector<16x128xf32>
      %cst_33 = arith.constant 0.000000e+00 : f32
      %95 = vector.broadcast %cst_33 : f32 to vector<16x128xf32>
      %96 = arith.select %9, %94, %95 : vector<16x128xi1>, vector<16x128xf32>
      %c15_i32_34 = arith.constant 15 : i32
      %97 = tpu.dynamic_rotate %93 by %c15_i32_34 dim 0 : vector<16x128xf32>, i32 -> vector<16x128xf32>
      %cst_35 = arith.constant 0.000000e+00 : f32
      %98 = vector.broadcast %cst_35 : f32 to vector<16x128xf32>
      %99 = arith.select %11, %97, %98 : vector<16x128xi1>, vector<16x128xf32>
      %100 = arith.addf %96, %92 : vector<16x128xf32>
      %101 = arith.addf %100, %99 : vector<16x128xf32>
      %102 = vector.extract_strided_slice %5 {offsets = [4, 0], sizes = [1, 128], strides = [1, 1]} : vector<6x128xf32> to vector<1x128xf32>
      %103 = vector.extract_strided_slice %5 {offsets = [5, 0], sizes = [1, 128], strides = [1, 1]} : vector<6x128xf32> to vector<1x128xf32>
      %104 = vector.shape_cast %101 : vector<16x128xf32> to vector<1x16x128xf32>
      %cst_36 = arith.constant dense<0.000000e+00> : vector<1x128xf32>
      %105 = vector.multi_reduction <add>, %104, %cst_36 [1] : vector<1x16x128xf32> to vector<1x128xf32>
      %106 = arith.mulf %104, %104 : vector<1x16x128xf32>
      %cst_37 = arith.constant dense<0.000000e+00> : vector<1x128xf32>
      %107 = vector.multi_reduction <add>, %106, %cst_37 [1] : vector<1x16x128xf32> to vector<1x128xf32>
      %108 = tpu.concatenate %105, %107 in 0 : vector<1x128xf32>, vector<1x128xf32> -> vector<2x128xf32>
      %cst_38 = arith.constant dense<0.000000e+00> : vector<2x128xf32>
      %109 = tpu.matmul %108, %4, %cst_38 {dimension_numbers = #tpu.dot_dimension_numbers<[1], [0], [0], [1], [0, 0, 1, 1], [], []>} : vector<2x128xf32>, vector<128x128xf32>, vector<2x128xf32> -> vector<2x128xf32>
      %cst_39 = arith.constant 3.906250e-03 : f32
      %110 = vector.broadcast %cst_39 : f32 to vector<2x128xf32>
      %111 = arith.mulf %109, %110 : vector<2x128xf32>
      %112 = vector.extract_strided_slice %111 {offsets = [0, 0], sizes = [1, 128], strides = [1, 1]} : vector<2x128xf32> to vector<1x128xf32>
      %113 = vector.extract_strided_slice %111 {offsets = [1, 0], sizes = [1, 128], strides = [1, 1]} : vector<2x128xf32> to vector<1x128xf32>
      %114 = arith.mulf %112, %112 : vector<1x128xf32>
      %115 = arith.subf %113, %114 : vector<1x128xf32>
      %cst_40 = arith.constant 0.000000e+00 : f32
      %116 = vector.broadcast %cst_40 : f32 to vector<1x128xf32>
      %117 = arith.maximumf %115, %116 : vector<1x128xf32>
      %cst_41 = arith.constant 9.99999974E-6 : f32
      %118 = vector.broadcast %cst_41 : f32 to vector<1x128xf32>
      %119 = arith.addf %117, %118 : vector<1x128xf32>
      %120 = math.rsqrt %119 : vector<1x128xf32>
      %121 = arith.mulf %120, %102 : vector<1x128xf32>
      %122 = arith.mulf %112, %121 : vector<1x128xf32>
      %123 = arith.subf %103, %122 : vector<1x128xf32>
      %124 = vector.shape_cast %121 : vector<1x128xf32> to vector<1x1x128xf32>
      %125 = vector.broadcast %124 : vector<1x1x128xf32> to vector<1x16x128xf32>
      %126 = arith.mulf %104, %125 : vector<1x16x128xf32>
      %127 = vector.shape_cast %123 : vector<1x128xf32> to vector<1x1x128xf32>
      %128 = vector.broadcast %127 : vector<1x1x128xf32> to vector<1x16x128xf32>
      %129 = arith.addf %126, %128 : vector<1x16x128xf32>
      %130 = vector.shape_cast %129 : vector<1x16x128xf32> to vector<16x128xf32>
      %cst_42 = arith.constant 2.500000e-01 : f32
      %131 = vector.broadcast %cst_42 : f32 to vector<16x128xf32>
      %132 = arith.mulf %131, %130 : vector<16x128xf32>
      %133 = arith.addf %arg8, %132 : vector<16x128xf32>
      %134 = vector.extract_strided_slice %5 {offsets = [0, 0], sizes = [1, 128], strides = [1, 1]} : vector<6x128xf32> to vector<1x128xf32>
      %135 = vector.extract_strided_slice %5 {offsets = [1, 0], sizes = [1, 128], strides = [1, 1]} : vector<6x128xf32> to vector<1x128xf32>
      %136 = vector.shape_cast %133 : vector<16x128xf32> to vector<1x16x128xf32>
      %cst_43 = arith.constant dense<0.000000e+00> : vector<1x128xf32>
      %137 = vector.multi_reduction <add>, %136, %cst_43 [1] : vector<1x16x128xf32> to vector<1x128xf32>
      %138 = arith.mulf %136, %136 : vector<1x16x128xf32>
      %cst_44 = arith.constant dense<0.000000e+00> : vector<1x128xf32>
      %139 = vector.multi_reduction <add>, %138, %cst_44 [1] : vector<1x16x128xf32> to vector<1x128xf32>
      %140 = tpu.concatenate %137, %139 in 0 : vector<1x128xf32>, vector<1x128xf32> -> vector<2x128xf32>
      %cst_45 = arith.constant dense<0.000000e+00> : vector<2x128xf32>
      %141 = tpu.matmul %140, %4, %cst_45 {dimension_numbers = #tpu.dot_dimension_numbers<[1], [0], [0], [1], [0, 0, 1, 1], [], []>} : vector<2x128xf32>, vector<128x128xf32>, vector<2x128xf32> -> vector<2x128xf32>
      %cst_46 = arith.constant 3.906250e-03 : f32
      %142 = vector.broadcast %cst_46 : f32 to vector<2x128xf32>
      %143 = arith.mulf %141, %142 : vector<2x128xf32>
      %144 = vector.extract_strided_slice %143 {offsets = [0, 0], sizes = [1, 128], strides = [1, 1]} : vector<2x128xf32> to vector<1x128xf32>
      %145 = vector.extract_strided_slice %143 {offsets = [1, 0], sizes = [1, 128], strides = [1, 1]} : vector<2x128xf32> to vector<1x128xf32>
      %146 = arith.mulf %144, %144 : vector<1x128xf32>
      %147 = arith.subf %145, %146 : vector<1x128xf32>
      %cst_47 = arith.constant 0.000000e+00 : f32
      %148 = vector.broadcast %cst_47 : f32 to vector<1x128xf32>
      %149 = arith.maximumf %147, %148 : vector<1x128xf32>
      %cst_48 = arith.constant 9.99999974E-6 : f32
      %150 = vector.broadcast %cst_48 : f32 to vector<1x128xf32>
      %151 = arith.addf %149, %150 : vector<1x128xf32>
      %152 = math.rsqrt %151 : vector<1x128xf32>
      %153 = arith.mulf %152, %134 : vector<1x128xf32>
      %154 = arith.mulf %144, %153 : vector<1x128xf32>
      %155 = arith.subf %135, %154 : vector<1x128xf32>
      %156 = vector.shape_cast %153 : vector<1x128xf32> to vector<1x1x128xf32>
      %157 = vector.broadcast %156 : vector<1x1x128xf32> to vector<1x16x128xf32>
      %158 = arith.mulf %136, %157 : vector<1x16x128xf32>
      %159 = vector.shape_cast %155 : vector<1x128xf32> to vector<1x1x128xf32>
      %160 = vector.broadcast %159 : vector<1x1x128xf32> to vector<1x16x128xf32>
      %161 = arith.addf %158, %160 : vector<1x16x128xf32>
      %cst_49 = arith.constant 0.000000e+00 : f32
      %162 = vector.broadcast %cst_49 : f32 to vector<1x16x128xf32>
      %163 = arith.maximumf %161, %162 : vector<1x16x128xf32>
      %164 = vector.shape_cast %163 : vector<1x16x128xf32> to vector<16x128xf32>
      %cst_50 = arith.constant dense<0.000000e+00> : vector<16x384xf32>
      %165 = tpu.matmul %164, %2, %cst_50 {dimension_numbers = #tpu.dot_dimension_numbers<[1], [0], [0], [1], [0, 0, 1, 1], [], []>} : vector<16x128xf32>, vector<128x384xf32>, vector<16x384xf32> -> vector<16x384xf32>
      %166 = vector.extract_strided_slice %165 {offsets = [0, 0], sizes = [16, 128], strides = [1, 1]} : vector<16x384xf32> to vector<16x128xf32>
      %167 = vector.extract_strided_slice %165 {offsets = [0, 128], sizes = [16, 128], strides = [1, 1]} : vector<16x384xf32> to vector<16x128xf32>
      %168 = vector.extract_strided_slice %165 {offsets = [0, 256], sizes = [16, 128], strides = [1, 1]} : vector<16x384xf32> to vector<16x128xf32>
      %c1_i32_51 = arith.constant 1 : i32
      %169 = tpu.dynamic_rotate %166 by %c1_i32_51 dim 0 : vector<16x128xf32>, i32 -> vector<16x128xf32>
      %cst_52 = arith.constant 0.000000e+00 : f32
      %170 = vector.broadcast %cst_52 : f32 to vector<16x128xf32>
      %171 = arith.select %9, %169, %170 : vector<16x128xi1>, vector<16x128xf32>
      %c15_i32_53 = arith.constant 15 : i32
      %172 = tpu.dynamic_rotate %168 by %c15_i32_53 dim 0 : vector<16x128xf32>, i32 -> vector<16x128xf32>
      %cst_54 = arith.constant 0.000000e+00 : f32
      %173 = vector.broadcast %cst_54 : f32 to vector<16x128xf32>
      %174 = arith.select %11, %172, %173 : vector<16x128xi1>, vector<16x128xf32>
      %175 = arith.addf %171, %167 : vector<16x128xf32>
      %176 = arith.addf %175, %174 : vector<16x128xf32>
      %177 = vector.extract_strided_slice %5 {offsets = [2, 0], sizes = [1, 128], strides = [1, 1]} : vector<6x128xf32> to vector<1x128xf32>
      %178 = vector.extract_strided_slice %5 {offsets = [3, 0], sizes = [1, 128], strides = [1, 1]} : vector<6x128xf32> to vector<1x128xf32>
      %179 = vector.shape_cast %176 : vector<16x128xf32> to vector<1x16x128xf32>
      %cst_55 = arith.constant dense<0.000000e+00> : vector<1x128xf32>
      %180 = vector.multi_reduction <add>, %179, %cst_55 [1] : vector<1x16x128xf32> to vector<1x128xf32>
      %181 = arith.mulf %179, %179 : vector<1x16x128xf32>
      %cst_56 = arith.constant dense<0.000000e+00> : vector<1x128xf32>
      %182 = vector.multi_reduction <add>, %181, %cst_56 [1] : vector<1x16x128xf32> to vector<1x128xf32>
      %183 = tpu.concatenate %180, %182 in 0 : vector<1x128xf32>, vector<1x128xf32> -> vector<2x128xf32>
      %cst_57 = arith.constant dense<0.000000e+00> : vector<2x128xf32>
      %184 = tpu.matmul %183, %4, %cst_57 {dimension_numbers = #tpu.dot_dimension_numbers<[1], [0], [0], [1], [0, 0, 1, 1], [], []>} : vector<2x128xf32>, vector<128x128xf32>, vector<2x128xf32> -> vector<2x128xf32>
      %cst_58 = arith.constant 3.906250e-03 : f32
      %185 = vector.broadcast %cst_58 : f32 to vector<2x128xf32>
      %186 = arith.mulf %184, %185 : vector<2x128xf32>
      %187 = vector.extract_strided_slice %186 {offsets = [0, 0], sizes = [1, 128], strides = [1, 1]} : vector<2x128xf32> to vector<1x128xf32>
      %188 = vector.extract_strided_slice %186 {offsets = [1, 0], sizes = [1, 128], strides = [1, 1]} : vector<2x128xf32> to vector<1x128xf32>
      %189 = arith.mulf %187, %187 : vector<1x128xf32>
      %190 = arith.subf %188, %189 : vector<1x128xf32>
      %cst_59 = arith.constant 0.000000e+00 : f32
      %191 = vector.broadcast %cst_59 : f32 to vector<1x128xf32>
      %192 = arith.maximumf %190, %191 : vector<1x128xf32>
      %cst_60 = arith.constant 9.99999974E-6 : f32
      %193 = vector.broadcast %cst_60 : f32 to vector<1x128xf32>
      %194 = arith.addf %192, %193 : vector<1x128xf32>
      %195 = math.rsqrt %194 : vector<1x128xf32>
      %196 = arith.mulf %195, %177 : vector<1x128xf32>
      %197 = arith.mulf %187, %196 : vector<1x128xf32>
      %198 = arith.subf %178, %197 : vector<1x128xf32>
      %199 = vector.shape_cast %196 : vector<1x128xf32> to vector<1x1x128xf32>
      %200 = vector.broadcast %199 : vector<1x1x128xf32> to vector<1x16x128xf32>
      %201 = arith.mulf %179, %200 : vector<1x16x128xf32>
      %202 = vector.shape_cast %198 : vector<1x128xf32> to vector<1x1x128xf32>
      %203 = vector.broadcast %202 : vector<1x1x128xf32> to vector<1x16x128xf32>
      %204 = arith.addf %201, %203 : vector<1x16x128xf32>
      %cst_61 = arith.constant 0.000000e+00 : f32
      %205 = vector.broadcast %cst_61 : f32 to vector<1x16x128xf32>
      %206 = arith.maximumf %204, %205 : vector<1x16x128xf32>
      %207 = vector.shape_cast %206 : vector<1x16x128xf32> to vector<16x128xf32>
      %cst_62 = arith.constant dense<0.000000e+00> : vector<16x384xf32>
      %208 = tpu.matmul %207, %3, %cst_62 {dimension_numbers = #tpu.dot_dimension_numbers<[1], [0], [0], [1], [0, 0, 1, 1], [], []>} : vector<16x128xf32>, vector<128x384xf32>, vector<16x384xf32> -> vector<16x384xf32>
      %209 = vector.extract_strided_slice %208 {offsets = [0, 0], sizes = [16, 128], strides = [1, 1]} : vector<16x384xf32> to vector<16x128xf32>
      %210 = vector.extract_strided_slice %208 {offsets = [0, 128], sizes = [16, 128], strides = [1, 1]} : vector<16x384xf32> to vector<16x128xf32>
      %211 = vector.extract_strided_slice %208 {offsets = [0, 256], sizes = [16, 128], strides = [1, 1]} : vector<16x384xf32> to vector<16x128xf32>
      %c1_i32_63 = arith.constant 1 : i32
      %212 = tpu.dynamic_rotate %209 by %c1_i32_63 dim 0 : vector<16x128xf32>, i32 -> vector<16x128xf32>
      %cst_64 = arith.constant 0.000000e+00 : f32
      %213 = vector.broadcast %cst_64 : f32 to vector<16x128xf32>
      %214 = arith.select %9, %212, %213 : vector<16x128xi1>, vector<16x128xf32>
      %c15_i32_65 = arith.constant 15 : i32
      %215 = tpu.dynamic_rotate %211 by %c15_i32_65 dim 0 : vector<16x128xf32>, i32 -> vector<16x128xf32>
      %cst_66 = arith.constant 0.000000e+00 : f32
      %216 = vector.broadcast %cst_66 : f32 to vector<16x128xf32>
      %217 = arith.select %11, %215, %216 : vector<16x128xi1>, vector<16x128xf32>
      %218 = arith.addf %214, %210 : vector<16x128xf32>
      %219 = arith.addf %218, %217 : vector<16x128xf32>
      %220 = vector.extract_strided_slice %5 {offsets = [4, 0], sizes = [1, 128], strides = [1, 1]} : vector<6x128xf32> to vector<1x128xf32>
      %221 = vector.extract_strided_slice %5 {offsets = [5, 0], sizes = [1, 128], strides = [1, 1]} : vector<6x128xf32> to vector<1x128xf32>
      %222 = vector.shape_cast %219 : vector<16x128xf32> to vector<1x16x128xf32>
      %cst_67 = arith.constant dense<0.000000e+00> : vector<1x128xf32>
      %223 = vector.multi_reduction <add>, %222, %cst_67 [1] : vector<1x16x128xf32> to vector<1x128xf32>
      %224 = arith.mulf %222, %222 : vector<1x16x128xf32>
      %cst_68 = arith.constant dense<0.000000e+00> : vector<1x128xf32>
      %225 = vector.multi_reduction <add>, %224, %cst_68 [1] : vector<1x16x128xf32> to vector<1x128xf32>
      %226 = tpu.concatenate %223, %225 in 0 : vector<1x128xf32>, vector<1x128xf32> -> vector<2x128xf32>
      %cst_69 = arith.constant dense<0.000000e+00> : vector<2x128xf32>
      %227 = tpu.matmul %226, %4, %cst_69 {dimension_numbers = #tpu.dot_dimension_numbers<[1], [0], [0], [1], [0, 0, 1, 1], [], []>} : vector<2x128xf32>, vector<128x128xf32>, vector<2x128xf32> -> vector<2x128xf32>
      %cst_70 = arith.constant 3.906250e-03 : f32
      %228 = vector.broadcast %cst_70 : f32 to vector<2x128xf32>
      %229 = arith.mulf %227, %228 : vector<2x128xf32>
      %230 = vector.extract_strided_slice %229 {offsets = [0, 0], sizes = [1, 128], strides = [1, 1]} : vector<2x128xf32> to vector<1x128xf32>
      %231 = vector.extract_strided_slice %229 {offsets = [1, 0], sizes = [1, 128], strides = [1, 1]} : vector<2x128xf32> to vector<1x128xf32>
      %232 = arith.mulf %230, %230 : vector<1x128xf32>
      %233 = arith.subf %231, %232 : vector<1x128xf32>
      %cst_71 = arith.constant 0.000000e+00 : f32
      %234 = vector.broadcast %cst_71 : f32 to vector<1x128xf32>
      %235 = arith.maximumf %233, %234 : vector<1x128xf32>
      %cst_72 = arith.constant 9.99999974E-6 : f32
      %236 = vector.broadcast %cst_72 : f32 to vector<1x128xf32>
      %237 = arith.addf %235, %236 : vector<1x128xf32>
      %238 = math.rsqrt %237 : vector<1x128xf32>
      %239 = arith.mulf %238, %220 : vector<1x128xf32>
      %240 = arith.mulf %230, %239 : vector<1x128xf32>
      %241 = arith.subf %221, %240 : vector<1x128xf32>
      %242 = vector.shape_cast %239 : vector<1x128xf32> to vector<1x1x128xf32>
      %243 = vector.broadcast %242 : vector<1x1x128xf32> to vector<1x16x128xf32>
      %244 = arith.mulf %222, %243 : vector<1x16x128xf32>
      %245 = vector.shape_cast %241 : vector<1x128xf32> to vector<1x1x128xf32>
      %246 = vector.broadcast %245 : vector<1x1x128xf32> to vector<1x16x128xf32>
      %247 = arith.addf %244, %246 : vector<1x16x128xf32>
      %248 = vector.shape_cast %247 : vector<1x16x128xf32> to vector<16x128xf32>
      %cst_73 = arith.constant 2.500000e-01 : f32
      %249 = vector.broadcast %cst_73 : f32 to vector<16x128xf32>
      %250 = arith.mulf %249, %248 : vector<16x128xf32>
      %251 = arith.addf %arg8, %250 : vector<16x128xf32>
      %252 = vector.extract_strided_slice %5 {offsets = [0, 0], sizes = [1, 128], strides = [1, 1]} : vector<6x128xf32> to vector<1x128xf32>
      %253 = vector.extract_strided_slice %5 {offsets = [1, 0], sizes = [1, 128], strides = [1, 1]} : vector<6x128xf32> to vector<1x128xf32>
      %254 = vector.shape_cast %251 : vector<16x128xf32> to vector<1x16x128xf32>
      %cst_74 = arith.constant dense<0.000000e+00> : vector<1x128xf32>
      %255 = vector.multi_reduction <add>, %254, %cst_74 [1] : vector<1x16x128xf32> to vector<1x128xf32>
      %256 = arith.mulf %254, %254 : vector<1x16x128xf32>
      %cst_75 = arith.constant dense<0.000000e+00> : vector<1x128xf32>
      %257 = vector.multi_reduction <add>, %256, %cst_75 [1] : vector<1x16x128xf32> to vector<1x128xf32>
      %258 = tpu.concatenate %255, %257 in 0 : vector<1x128xf32>, vector<1x128xf32> -> vector<2x128xf32>
      %cst_76 = arith.constant dense<0.000000e+00> : vector<2x128xf32>
      %259 = tpu.matmul %258, %4, %cst_76 {dimension_numbers = #tpu.dot_dimension_numbers<[1], [0], [0], [1], [0, 0, 1, 1], [], []>} : vector<2x128xf32>, vector<128x128xf32>, vector<2x128xf32> -> vector<2x128xf32>
      %cst_77 = arith.constant 3.906250e-03 : f32
      %260 = vector.broadcast %cst_77 : f32 to vector<2x128xf32>
      %261 = arith.mulf %259, %260 : vector<2x128xf32>
      %262 = vector.extract_strided_slice %261 {offsets = [0, 0], sizes = [1, 128], strides = [1, 1]} : vector<2x128xf32> to vector<1x128xf32>
      %263 = vector.extract_strided_slice %261 {offsets = [1, 0], sizes = [1, 128], strides = [1, 1]} : vector<2x128xf32> to vector<1x128xf32>
      %264 = arith.mulf %262, %262 : vector<1x128xf32>
      %265 = arith.subf %263, %264 : vector<1x128xf32>
      %cst_78 = arith.constant 0.000000e+00 : f32
      %266 = vector.broadcast %cst_78 : f32 to vector<1x128xf32>
      %267 = arith.maximumf %265, %266 : vector<1x128xf32>
      %cst_79 = arith.constant 9.99999974E-6 : f32
      %268 = vector.broadcast %cst_79 : f32 to vector<1x128xf32>
      %269 = arith.addf %267, %268 : vector<1x128xf32>
      %270 = math.rsqrt %269 : vector<1x128xf32>
      %271 = arith.mulf %270, %252 : vector<1x128xf32>
      %272 = arith.mulf %262, %271 : vector<1x128xf32>
      %273 = arith.subf %253, %272 : vector<1x128xf32>
      %274 = vector.shape_cast %271 : vector<1x128xf32> to vector<1x1x128xf32>
      %275 = vector.broadcast %274 : vector<1x1x128xf32> to vector<1x16x128xf32>
      %276 = arith.mulf %254, %275 : vector<1x16x128xf32>
      %277 = vector.shape_cast %273 : vector<1x128xf32> to vector<1x1x128xf32>
      %278 = vector.broadcast %277 : vector<1x1x128xf32> to vector<1x16x128xf32>
      %279 = arith.addf %276, %278 : vector<1x16x128xf32>
      %cst_80 = arith.constant 0.000000e+00 : f32
      %280 = vector.broadcast %cst_80 : f32 to vector<1x16x128xf32>
      %281 = arith.maximumf %279, %280 : vector<1x16x128xf32>
      %282 = vector.shape_cast %281 : vector<1x16x128xf32> to vector<16x128xf32>
      %cst_81 = arith.constant dense<0.000000e+00> : vector<16x384xf32>
      %283 = tpu.matmul %282, %2, %cst_81 {dimension_numbers = #tpu.dot_dimension_numbers<[1], [0], [0], [1], [0, 0, 1, 1], [], []>} : vector<16x128xf32>, vector<128x384xf32>, vector<16x384xf32> -> vector<16x384xf32>
      %284 = vector.extract_strided_slice %283 {offsets = [0, 0], sizes = [16, 128], strides = [1, 1]} : vector<16x384xf32> to vector<16x128xf32>
      %285 = vector.extract_strided_slice %283 {offsets = [0, 128], sizes = [16, 128], strides = [1, 1]} : vector<16x384xf32> to vector<16x128xf32>
      %286 = vector.extract_strided_slice %283 {offsets = [0, 256], sizes = [16, 128], strides = [1, 1]} : vector<16x384xf32> to vector<16x128xf32>
      %c1_i32_82 = arith.constant 1 : i32
      %287 = tpu.dynamic_rotate %284 by %c1_i32_82 dim 0 : vector<16x128xf32>, i32 -> vector<16x128xf32>
      %cst_83 = arith.constant 0.000000e+00 : f32
      %288 = vector.broadcast %cst_83 : f32 to vector<16x128xf32>
      %289 = arith.select %9, %287, %288 : vector<16x128xi1>, vector<16x128xf32>
      %c15_i32_84 = arith.constant 15 : i32
      %290 = tpu.dynamic_rotate %286 by %c15_i32_84 dim 0 : vector<16x128xf32>, i32 -> vector<16x128xf32>
      %cst_85 = arith.constant 0.000000e+00 : f32
      %291 = vector.broadcast %cst_85 : f32 to vector<16x128xf32>
      %292 = arith.select %11, %290, %291 : vector<16x128xi1>, vector<16x128xf32>
      %293 = arith.addf %289, %285 : vector<16x128xf32>
      %294 = arith.addf %293, %292 : vector<16x128xf32>
      %295 = vector.extract_strided_slice %5 {offsets = [2, 0], sizes = [1, 128], strides = [1, 1]} : vector<6x128xf32> to vector<1x128xf32>
      %296 = vector.extract_strided_slice %5 {offsets = [3, 0], sizes = [1, 128], strides = [1, 1]} : vector<6x128xf32> to vector<1x128xf32>
      %297 = vector.shape_cast %294 : vector<16x128xf32> to vector<1x16x128xf32>
      %cst_86 = arith.constant dense<0.000000e+00> : vector<1x128xf32>
      %298 = vector.multi_reduction <add>, %297, %cst_86 [1] : vector<1x16x128xf32> to vector<1x128xf32>
      %299 = arith.mulf %297, %297 : vector<1x16x128xf32>
      %cst_87 = arith.constant dense<0.000000e+00> : vector<1x128xf32>
      %300 = vector.multi_reduction <add>, %299, %cst_87 [1] : vector<1x16x128xf32> to vector<1x128xf32>
      %301 = tpu.concatenate %298, %300 in 0 : vector<1x128xf32>, vector<1x128xf32> -> vector<2x128xf32>
      %cst_88 = arith.constant dense<0.000000e+00> : vector<2x128xf32>
      %302 = tpu.matmul %301, %4, %cst_88 {dimension_numbers = #tpu.dot_dimension_numbers<[1], [0], [0], [1], [0, 0, 1, 1], [], []>} : vector<2x128xf32>, vector<128x128xf32>, vector<2x128xf32> -> vector<2x128xf32>
      %cst_89 = arith.constant 3.906250e-03 : f32
      %303 = vector.broadcast %cst_89 : f32 to vector<2x128xf32>
      %304 = arith.mulf %302, %303 : vector<2x128xf32>
      %305 = vector.extract_strided_slice %304 {offsets = [0, 0], sizes = [1, 128], strides = [1, 1]} : vector<2x128xf32> to vector<1x128xf32>
      %306 = vector.extract_strided_slice %304 {offsets = [1, 0], sizes = [1, 128], strides = [1, 1]} : vector<2x128xf32> to vector<1x128xf32>
      %307 = arith.mulf %305, %305 : vector<1x128xf32>
      %308 = arith.subf %306, %307 : vector<1x128xf32>
      %cst_90 = arith.constant 0.000000e+00 : f32
      %309 = vector.broadcast %cst_90 : f32 to vector<1x128xf32>
      %310 = arith.maximumf %308, %309 : vector<1x128xf32>
      %cst_91 = arith.constant 9.99999974E-6 : f32
      %311 = vector.broadcast %cst_91 : f32 to vector<1x128xf32>
      %312 = arith.addf %310, %311 : vector<1x128xf32>
      %313 = math.rsqrt %312 : vector<1x128xf32>
      %314 = arith.mulf %313, %295 : vector<1x128xf32>
      %315 = arith.mulf %305, %314 : vector<1x128xf32>
      %316 = arith.subf %296, %315 : vector<1x128xf32>
      %317 = vector.shape_cast %314 : vector<1x128xf32> to vector<1x1x128xf32>
      %318 = vector.broadcast %317 : vector<1x1x128xf32> to vector<1x16x128xf32>
      %319 = arith.mulf %297, %318 : vector<1x16x128xf32>
      %320 = vector.shape_cast %316 : vector<1x128xf32> to vector<1x1x128xf32>
      %321 = vector.broadcast %320 : vector<1x1x128xf32> to vector<1x16x128xf32>
      %322 = arith.addf %319, %321 : vector<1x16x128xf32>
      %cst_92 = arith.constant 0.000000e+00 : f32
      %323 = vector.broadcast %cst_92 : f32 to vector<1x16x128xf32>
      %324 = arith.maximumf %322, %323 : vector<1x16x128xf32>
      %325 = vector.shape_cast %324 : vector<1x16x128xf32> to vector<16x128xf32>
      %cst_93 = arith.constant dense<0.000000e+00> : vector<16x384xf32>
      %326 = tpu.matmul %325, %3, %cst_93 {dimension_numbers = #tpu.dot_dimension_numbers<[1], [0], [0], [1], [0, 0, 1, 1], [], []>} : vector<16x128xf32>, vector<128x384xf32>, vector<16x384xf32> -> vector<16x384xf32>
      %327 = vector.extract_strided_slice %326 {offsets = [0, 0], sizes = [16, 128], strides = [1, 1]} : vector<16x384xf32> to vector<16x128xf32>
      %328 = vector.extract_strided_slice %326 {offsets = [0, 128], sizes = [16, 128], strides = [1, 1]} : vector<16x384xf32> to vector<16x128xf32>
      %329 = vector.extract_strided_slice %326 {offsets = [0, 256], sizes = [16, 128], strides = [1, 1]} : vector<16x384xf32> to vector<16x128xf32>
      %c1_i32_94 = arith.constant 1 : i32
      %330 = tpu.dynamic_rotate %327 by %c1_i32_94 dim 0 : vector<16x128xf32>, i32 -> vector<16x128xf32>
      %cst_95 = arith.constant 0.000000e+00 : f32
      %331 = vector.broadcast %cst_95 : f32 to vector<16x128xf32>
      %332 = arith.select %9, %330, %331 : vector<16x128xi1>, vector<16x128xf32>
      %c15_i32_96 = arith.constant 15 : i32
      %333 = tpu.dynamic_rotate %329 by %c15_i32_96 dim 0 : vector<16x128xf32>, i32 -> vector<16x128xf32>
      %cst_97 = arith.constant 0.000000e+00 : f32
      %334 = vector.broadcast %cst_97 : f32 to vector<16x128xf32>
      %335 = arith.select %11, %333, %334 : vector<16x128xi1>, vector<16x128xf32>
      %336 = arith.addf %332, %328 : vector<16x128xf32>
      %337 = arith.addf %336, %335 : vector<16x128xf32>
      %338 = vector.extract_strided_slice %5 {offsets = [4, 0], sizes = [1, 128], strides = [1, 1]} : vector<6x128xf32> to vector<1x128xf32>
      %339 = vector.extract_strided_slice %5 {offsets = [5, 0], sizes = [1, 128], strides = [1, 1]} : vector<6x128xf32> to vector<1x128xf32>
      %340 = vector.shape_cast %337 : vector<16x128xf32> to vector<1x16x128xf32>
      %cst_98 = arith.constant dense<0.000000e+00> : vector<1x128xf32>
      %341 = vector.multi_reduction <add>, %340, %cst_98 [1] : vector<1x16x128xf32> to vector<1x128xf32>
      %342 = arith.mulf %340, %340 : vector<1x16x128xf32>
      %cst_99 = arith.constant dense<0.000000e+00> : vector<1x128xf32>
      %343 = vector.multi_reduction <add>, %342, %cst_99 [1] : vector<1x16x128xf32> to vector<1x128xf32>
      %344 = tpu.concatenate %341, %343 in 0 : vector<1x128xf32>, vector<1x128xf32> -> vector<2x128xf32>
      %cst_100 = arith.constant dense<0.000000e+00> : vector<2x128xf32>
      %345 = tpu.matmul %344, %4, %cst_100 {dimension_numbers = #tpu.dot_dimension_numbers<[1], [0], [0], [1], [0, 0, 1, 1], [], []>} : vector<2x128xf32>, vector<128x128xf32>, vector<2x128xf32> -> vector<2x128xf32>
      %cst_101 = arith.constant 3.906250e-03 : f32
      %346 = vector.broadcast %cst_101 : f32 to vector<2x128xf32>
      %347 = arith.mulf %345, %346 : vector<2x128xf32>
      %348 = vector.extract_strided_slice %347 {offsets = [0, 0], sizes = [1, 128], strides = [1, 1]} : vector<2x128xf32> to vector<1x128xf32>
      %349 = vector.extract_strided_slice %347 {offsets = [1, 0], sizes = [1, 128], strides = [1, 1]} : vector<2x128xf32> to vector<1x128xf32>
      %350 = arith.mulf %348, %348 : vector<1x128xf32>
      %351 = arith.subf %349, %350 : vector<1x128xf32>
      %cst_102 = arith.constant 0.000000e+00 : f32
      %352 = vector.broadcast %cst_102 : f32 to vector<1x128xf32>
      %353 = arith.maximumf %351, %352 : vector<1x128xf32>
      %cst_103 = arith.constant 9.99999974E-6 : f32
      %354 = vector.broadcast %cst_103 : f32 to vector<1x128xf32>
      %355 = arith.addf %353, %354 : vector<1x128xf32>
      %356 = math.rsqrt %355 : vector<1x128xf32>
      %357 = arith.mulf %356, %338 : vector<1x128xf32>
      %358 = arith.mulf %348, %357 : vector<1x128xf32>
      %359 = arith.subf %339, %358 : vector<1x128xf32>
      %360 = vector.shape_cast %357 : vector<1x128xf32> to vector<1x1x128xf32>
      %361 = vector.broadcast %360 : vector<1x1x128xf32> to vector<1x16x128xf32>
      %362 = arith.mulf %340, %361 : vector<1x16x128xf32>
      %363 = vector.shape_cast %359 : vector<1x128xf32> to vector<1x1x128xf32>
      %364 = vector.broadcast %363 : vector<1x1x128xf32> to vector<1x16x128xf32>
      %365 = arith.addf %362, %364 : vector<1x16x128xf32>
      %366 = vector.shape_cast %365 : vector<1x16x128xf32> to vector<16x128xf32>
      %cst_104 = arith.constant 5.000000e-01 : f32
      %367 = vector.broadcast %cst_104 : f32 to vector<16x128xf32>
      %368 = arith.mulf %367, %366 : vector<16x128xf32>
      %369 = arith.addf %arg8, %368 : vector<16x128xf32>
      %370 = vector.extract_strided_slice %5 {offsets = [0, 0], sizes = [1, 128], strides = [1, 1]} : vector<6x128xf32> to vector<1x128xf32>
      %371 = vector.extract_strided_slice %5 {offsets = [1, 0], sizes = [1, 128], strides = [1, 1]} : vector<6x128xf32> to vector<1x128xf32>
      %372 = vector.shape_cast %369 : vector<16x128xf32> to vector<1x16x128xf32>
      %cst_105 = arith.constant dense<0.000000e+00> : vector<1x128xf32>
      %373 = vector.multi_reduction <add>, %372, %cst_105 [1] : vector<1x16x128xf32> to vector<1x128xf32>
      %374 = arith.mulf %372, %372 : vector<1x16x128xf32>
      %cst_106 = arith.constant dense<0.000000e+00> : vector<1x128xf32>
      %375 = vector.multi_reduction <add>, %374, %cst_106 [1] : vector<1x16x128xf32> to vector<1x128xf32>
      %376 = tpu.concatenate %373, %375 in 0 : vector<1x128xf32>, vector<1x128xf32> -> vector<2x128xf32>
      %cst_107 = arith.constant dense<0.000000e+00> : vector<2x128xf32>
      %377 = tpu.matmul %376, %4, %cst_107 {dimension_numbers = #tpu.dot_dimension_numbers<[1], [0], [0], [1], [0, 0, 1, 1], [], []>} : vector<2x128xf32>, vector<128x128xf32>, vector<2x128xf32> -> vector<2x128xf32>
      %cst_108 = arith.constant 3.906250e-03 : f32
      %378 = vector.broadcast %cst_108 : f32 to vector<2x128xf32>
      %379 = arith.mulf %377, %378 : vector<2x128xf32>
      %380 = vector.extract_strided_slice %379 {offsets = [0, 0], sizes = [1, 128], strides = [1, 1]} : vector<2x128xf32> to vector<1x128xf32>
      %381 = vector.extract_strided_slice %379 {offsets = [1, 0], sizes = [1, 128], strides = [1, 1]} : vector<2x128xf32> to vector<1x128xf32>
      %382 = arith.mulf %380, %380 : vector<1x128xf32>
      %383 = arith.subf %381, %382 : vector<1x128xf32>
      %cst_109 = arith.constant 0.000000e+00 : f32
      %384 = vector.broadcast %cst_109 : f32 to vector<1x128xf32>
      %385 = arith.maximumf %383, %384 : vector<1x128xf32>
      %cst_110 = arith.constant 9.99999974E-6 : f32
      %386 = vector.broadcast %cst_110 : f32 to vector<1x128xf32>
      %387 = arith.addf %385, %386 : vector<1x128xf32>
      %388 = math.rsqrt %387 : vector<1x128xf32>
      %389 = arith.mulf %388, %370 : vector<1x128xf32>
      %390 = arith.mulf %380, %389 : vector<1x128xf32>
      %391 = arith.subf %371, %390 : vector<1x128xf32>
      %392 = vector.shape_cast %389 : vector<1x128xf32> to vector<1x1x128xf32>
      %393 = vector.broadcast %392 : vector<1x1x128xf32> to vector<1x16x128xf32>
      %394 = arith.mulf %372, %393 : vector<1x16x128xf32>
      %395 = vector.shape_cast %391 : vector<1x128xf32> to vector<1x1x128xf32>
      %396 = vector.broadcast %395 : vector<1x1x128xf32> to vector<1x16x128xf32>
      %397 = arith.addf %394, %396 : vector<1x16x128xf32>
      %cst_111 = arith.constant 0.000000e+00 : f32
      %398 = vector.broadcast %cst_111 : f32 to vector<1x16x128xf32>
      %399 = arith.maximumf %397, %398 : vector<1x16x128xf32>
      %400 = vector.shape_cast %399 : vector<1x16x128xf32> to vector<16x128xf32>
      %cst_112 = arith.constant dense<0.000000e+00> : vector<16x384xf32>
      %401 = tpu.matmul %400, %2, %cst_112 {dimension_numbers = #tpu.dot_dimension_numbers<[1], [0], [0], [1], [0, 0, 1, 1], [], []>} : vector<16x128xf32>, vector<128x384xf32>, vector<16x384xf32> -> vector<16x384xf32>
      %402 = vector.extract_strided_slice %401 {offsets = [0, 0], sizes = [16, 128], strides = [1, 1]} : vector<16x384xf32> to vector<16x128xf32>
      %403 = vector.extract_strided_slice %401 {offsets = [0, 128], sizes = [16, 128], strides = [1, 1]} : vector<16x384xf32> to vector<16x128xf32>
      %404 = vector.extract_strided_slice %401 {offsets = [0, 256], sizes = [16, 128], strides = [1, 1]} : vector<16x384xf32> to vector<16x128xf32>
      %c1_i32_113 = arith.constant 1 : i32
      %405 = tpu.dynamic_rotate %402 by %c1_i32_113 dim 0 : vector<16x128xf32>, i32 -> vector<16x128xf32>
      %cst_114 = arith.constant 0.000000e+00 : f32
      %406 = vector.broadcast %cst_114 : f32 to vector<16x128xf32>
      %407 = arith.select %9, %405, %406 : vector<16x128xi1>, vector<16x128xf32>
      %c15_i32_115 = arith.constant 15 : i32
      %408 = tpu.dynamic_rotate %404 by %c15_i32_115 dim 0 : vector<16x128xf32>, i32 -> vector<16x128xf32>
      %cst_116 = arith.constant 0.000000e+00 : f32
      %409 = vector.broadcast %cst_116 : f32 to vector<16x128xf32>
      %410 = arith.select %11, %408, %409 : vector<16x128xi1>, vector<16x128xf32>
      %411 = arith.addf %407, %403 : vector<16x128xf32>
      %412 = arith.addf %411, %410 : vector<16x128xf32>
      %413 = vector.extract_strided_slice %5 {offsets = [2, 0], sizes = [1, 128], strides = [1, 1]} : vector<6x128xf32> to vector<1x128xf32>
      %414 = vector.extract_strided_slice %5 {offsets = [3, 0], sizes = [1, 128], strides = [1, 1]} : vector<6x128xf32> to vector<1x128xf32>
      %415 = vector.shape_cast %412 : vector<16x128xf32> to vector<1x16x128xf32>
      %cst_117 = arith.constant dense<0.000000e+00> : vector<1x128xf32>
      %416 = vector.multi_reduction <add>, %415, %cst_117 [1] : vector<1x16x128xf32> to vector<1x128xf32>
      %417 = arith.mulf %415, %415 : vector<1x16x128xf32>
      %cst_118 = arith.constant dense<0.000000e+00> : vector<1x128xf32>
      %418 = vector.multi_reduction <add>, %417, %cst_118 [1] : vector<1x16x128xf32> to vector<1x128xf32>
      %419 = tpu.concatenate %416, %418 in 0 : vector<1x128xf32>, vector<1x128xf32> -> vector<2x128xf32>
      %cst_119 = arith.constant dense<0.000000e+00> : vector<2x128xf32>
      %420 = tpu.matmul %419, %4, %cst_119 {dimension_numbers = #tpu.dot_dimension_numbers<[1], [0], [0], [1], [0, 0, 1, 1], [], []>} : vector<2x128xf32>, vector<128x128xf32>, vector<2x128xf32> -> vector<2x128xf32>
      %cst_120 = arith.constant 3.906250e-03 : f32
      %421 = vector.broadcast %cst_120 : f32 to vector<2x128xf32>
      %422 = arith.mulf %420, %421 : vector<2x128xf32>
      %423 = vector.extract_strided_slice %422 {offsets = [0, 0], sizes = [1, 128], strides = [1, 1]} : vector<2x128xf32> to vector<1x128xf32>
      %424 = vector.extract_strided_slice %422 {offsets = [1, 0], sizes = [1, 128], strides = [1, 1]} : vector<2x128xf32> to vector<1x128xf32>
      %425 = arith.mulf %423, %423 : vector<1x128xf32>
      %426 = arith.subf %424, %425 : vector<1x128xf32>
      %cst_121 = arith.constant 0.000000e+00 : f32
      %427 = vector.broadcast %cst_121 : f32 to vector<1x128xf32>
      %428 = arith.maximumf %426, %427 : vector<1x128xf32>
      %cst_122 = arith.constant 9.99999974E-6 : f32
      %429 = vector.broadcast %cst_122 : f32 to vector<1x128xf32>
      %430 = arith.addf %428, %429 : vector<1x128xf32>
      %431 = math.rsqrt %430 : vector<1x128xf32>
      %432 = arith.mulf %431, %413 : vector<1x128xf32>
      %433 = arith.mulf %423, %432 : vector<1x128xf32>
      %434 = arith.subf %414, %433 : vector<1x128xf32>
      %435 = vector.shape_cast %432 : vector<1x128xf32> to vector<1x1x128xf32>
      %436 = vector.broadcast %435 : vector<1x1x128xf32> to vector<1x16x128xf32>
      %437 = arith.mulf %415, %436 : vector<1x16x128xf32>
      %438 = vector.shape_cast %434 : vector<1x128xf32> to vector<1x1x128xf32>
      %439 = vector.broadcast %438 : vector<1x1x128xf32> to vector<1x16x128xf32>
      %440 = arith.addf %437, %439 : vector<1x16x128xf32>
      %cst_123 = arith.constant 0.000000e+00 : f32
      %441 = vector.broadcast %cst_123 : f32 to vector<1x16x128xf32>
      %442 = arith.maximumf %440, %441 : vector<1x16x128xf32>
      %443 = vector.shape_cast %442 : vector<1x16x128xf32> to vector<16x128xf32>
      %cst_124 = arith.constant dense<0.000000e+00> : vector<16x384xf32>
      %444 = tpu.matmul %443, %3, %cst_124 {dimension_numbers = #tpu.dot_dimension_numbers<[1], [0], [0], [1], [0, 0, 1, 1], [], []>} : vector<16x128xf32>, vector<128x384xf32>, vector<16x384xf32> -> vector<16x384xf32>
      %445 = vector.extract_strided_slice %444 {offsets = [0, 0], sizes = [16, 128], strides = [1, 1]} : vector<16x384xf32> to vector<16x128xf32>
      %446 = vector.extract_strided_slice %444 {offsets = [0, 128], sizes = [16, 128], strides = [1, 1]} : vector<16x384xf32> to vector<16x128xf32>
      %447 = vector.extract_strided_slice %444 {offsets = [0, 256], sizes = [16, 128], strides = [1, 1]} : vector<16x384xf32> to vector<16x128xf32>
      %c1_i32_125 = arith.constant 1 : i32
      %448 = tpu.dynamic_rotate %445 by %c1_i32_125 dim 0 : vector<16x128xf32>, i32 -> vector<16x128xf32>
      %cst_126 = arith.constant 0.000000e+00 : f32
      %449 = vector.broadcast %cst_126 : f32 to vector<16x128xf32>
      %450 = arith.select %9, %448, %449 : vector<16x128xi1>, vector<16x128xf32>
      %c15_i32_127 = arith.constant 15 : i32
      %451 = tpu.dynamic_rotate %447 by %c15_i32_127 dim 0 : vector<16x128xf32>, i32 -> vector<16x128xf32>
      %cst_128 = arith.constant 0.000000e+00 : f32
      %452 = vector.broadcast %cst_128 : f32 to vector<16x128xf32>
      %453 = arith.select %11, %451, %452 : vector<16x128xi1>, vector<16x128xf32>
      %454 = arith.addf %450, %446 : vector<16x128xf32>
      %455 = arith.addf %454, %453 : vector<16x128xf32>
      %456 = vector.extract_strided_slice %5 {offsets = [4, 0], sizes = [1, 128], strides = [1, 1]} : vector<6x128xf32> to vector<1x128xf32>
      %457 = vector.extract_strided_slice %5 {offsets = [5, 0], sizes = [1, 128], strides = [1, 1]} : vector<6x128xf32> to vector<1x128xf32>
      %458 = vector.shape_cast %455 : vector<16x128xf32> to vector<1x16x128xf32>
      %cst_129 = arith.constant dense<0.000000e+00> : vector<1x128xf32>
      %459 = vector.multi_reduction <add>, %458, %cst_129 [1] : vector<1x16x128xf32> to vector<1x128xf32>
      %460 = arith.mulf %458, %458 : vector<1x16x128xf32>
      %cst_130 = arith.constant dense<0.000000e+00> : vector<1x128xf32>
      %461 = vector.multi_reduction <add>, %460, %cst_130 [1] : vector<1x16x128xf32> to vector<1x128xf32>
      %462 = tpu.concatenate %459, %461 in 0 : vector<1x128xf32>, vector<1x128xf32> -> vector<2x128xf32>
      %cst_131 = arith.constant dense<0.000000e+00> : vector<2x128xf32>
      %463 = tpu.matmul %462, %4, %cst_131 {dimension_numbers = #tpu.dot_dimension_numbers<[1], [0], [0], [1], [0, 0, 1, 1], [], []>} : vector<2x128xf32>, vector<128x128xf32>, vector<2x128xf32> -> vector<2x128xf32>
      %cst_132 = arith.constant 3.906250e-03 : f32
      %464 = vector.broadcast %cst_132 : f32 to vector<2x128xf32>
      %465 = arith.mulf %463, %464 : vector<2x128xf32>
      %466 = vector.extract_strided_slice %465 {offsets = [0, 0], sizes = [1, 128], strides = [1, 1]} : vector<2x128xf32> to vector<1x128xf32>
      %467 = vector.extract_strided_slice %465 {offsets = [1, 0], sizes = [1, 128], strides = [1, 1]} : vector<2x128xf32> to vector<1x128xf32>
      %468 = arith.mulf %466, %466 : vector<1x128xf32>
      %469 = arith.subf %467, %468 : vector<1x128xf32>
      %cst_133 = arith.constant 0.000000e+00 : f32
      %470 = vector.broadcast %cst_133 : f32 to vector<1x128xf32>
      %471 = arith.maximumf %469, %470 : vector<1x128xf32>
      %cst_134 = arith.constant 9.99999974E-6 : f32
      %472 = vector.broadcast %cst_134 : f32 to vector<1x128xf32>
      %473 = arith.addf %471, %472 : vector<1x128xf32>
      %474 = math.rsqrt %473 : vector<1x128xf32>
      %475 = arith.mulf %474, %456 : vector<1x128xf32>
      %476 = arith.mulf %466, %475 : vector<1x128xf32>
      %477 = arith.subf %457, %476 : vector<1x128xf32>
      %478 = vector.shape_cast %475 : vector<1x128xf32> to vector<1x1x128xf32>
      %479 = vector.broadcast %478 : vector<1x1x128xf32> to vector<1x16x128xf32>
      %480 = arith.mulf %458, %479 : vector<1x16x128xf32>
      %481 = vector.shape_cast %477 : vector<1x128xf32> to vector<1x1x128xf32>
      %482 = vector.broadcast %481 : vector<1x1x128xf32> to vector<1x16x128xf32>
      %483 = arith.addf %480, %482 : vector<1x16x128xf32>
      %484 = vector.shape_cast %483 : vector<1x16x128xf32> to vector<16x128xf32>
      %cst_135 = arith.constant 2.000000e+00 : f32
      %485 = vector.broadcast %cst_135 : f32 to vector<16x128xf32>
      %486 = arith.mulf %485, %248 : vector<16x128xf32>
      %487 = arith.addf %130, %486 : vector<16x128xf32>
      %cst_136 = arith.constant 2.000000e+00 : f32
      %488 = vector.broadcast %cst_136 : f32 to vector<16x128xf32>
      %489 = arith.mulf %488, %366 : vector<16x128xf32>
      %490 = arith.addf %487, %489 : vector<16x128xf32>
      %491 = arith.addf %490, %484 : vector<16x128xf32>
      %cst_137 = arith.constant 0.0833333358 : f32
      %492 = vector.broadcast %cst_137 : f32 to vector<16x128xf32>
      %493 = arith.mulf %492, %491 : vector<16x128xf32>
      %494 = arith.addf %arg8, %493 : vector<16x128xf32>
      scf.yield %494 : vector<16x128xf32>
    }
    %14 = vector.shape_cast %13 : vector<16x128xf32> to vector<1x16x128xf32>
    %c0_11 = arith.constant 0 : index
    %c0_12 = arith.constant 0 : index
    %c0_13 = arith.constant 0 : index
    %15 = vector.load %arg6[%c0_11, %c0_12, %c0_13] : memref<1x16x128xf32, #tpu.memory_space<vmem>>, vector<1x16x128xf32>
    tpu.vector_store %arg6[%c0_11, %c0_12, %c0_13], %14 {strides = array<i32>} : memref<1x16x128xf32, #tpu.memory_space<vmem>>, vector<1x16x128xf32>,
    return
  }
  func.func @transform_0(%arg0: i32) -> (i32, i32, i32) {
    %c0_i32 = arith.constant 0 : i32
    %c0_i32_0 = arith.constant 0 : i32
    %c0_i32_1 = arith.constant 0 : i32
    return %arg0, %c0_i32, %c0_i32_0 : i32, i32, i32
  }
  func.func @transform_1(%arg0: i32) -> (i32, i32) {
    %c0_i32 = arith.constant 0 : i32
    %c0_i32_0 = arith.constant 0 : i32
    %c0_i32_1 = arith.constant 0 : i32
    return %c0_i32, %c0_i32_0 : i32, i32
  }
  func.func @transform_2(%arg0: i32) -> (i32, i32) {
    %c0_i32 = arith.constant 0 : i32
    %c0_i32_0 = arith.constant 0 : i32
    %c0_i32_1 = arith.constant 0 : i32
    return %c0_i32, %c0_i32_0 : i32, i32
  }
  func.func @transform_3(%arg0: i32) -> (i32, i32) {
    %c0_i32 = arith.constant 0 : i32
    %c0_i32_0 = arith.constant 0 : i32
    %c0_i32_1 = arith.constant 0 : i32
    return %c0_i32, %c0_i32_0 : i32, i32
  }
  func.func @transform_4(%arg0: i32) -> (i32, i32) {
    %c0_i32 = arith.constant 0 : i32
    %c0_i32_0 = arith.constant 0 : i32
    %c0_i32_1 = arith.constant 0 : i32
    return %c0_i32, %c0_i32_0 : i32, i32
  }
  func.func @transform_5(%arg0: i32) -> (i32, i32, i32) {
    %c0_i32 = arith.constant 0 : i32
    %c0_i32_0 = arith.constant 0 : i32
    %c0_i32_1 = arith.constant 0 : i32
    return %arg0, %c0_i32, %c0_i32_0 : i32, i32, i32
  }
}

</mosaic_0001>

<bundles_post_ra>
// kernel: odeblock_forward.1
= control target key start
LH: loop header
LB: loop body
LE: loop exit
PB: predicated region body
PF: predicated region fallthrough
CT: control target
= control target key end

     0   :  { %10 = vsyncpa [#allocation3], 0  ;;  %s4481_s18 = smov 0   ;;  %s6338_s0 = inlined_call_operand.vmem [shape: f32[2,16,128], index: 0, kind: input, shape index: {}]   ;;  %s6339_s1 = inlined_call_operand.vmem [shape: f32[128,384], index: 1, kind: input, shape index: {}]   ;;  %s6340_s2 = inlined_call_operand.vmem [shape: f32[128,384], index: 2, kind: input, shape index: {}]   ;;  %s6341_s3 = inlined_call_operand.hbm [shape: f32[128,128], index: 3, kind: input, shape index: {}]   ;;  %s6342_s4 = inlined_call_operand.vmem [shape: f32[6,128], index: 4, kind: input, shape index: {}]   ;;  %s6343_s5 = inlined_call_operand.vmem [shape: f32[2,16,128], index: 5, kind: output, shape index: {}]  }
   0x1 LB: > { %s3250_s19 = sadd.s32 4294967295, %s4432_s18   ;;  %p3252_p0 = scmp.ge.s32.totalorder %s4432_s18, 1  ;;  %s4432_s18 = sphi %s4481_s18, %s16_s18  }
   0x2   : > { %p157_p1 = scmp.lt.s32.totalorder %s4432_s18, 3  ;;  %s4446_s20 = smov [#allocation2]  }
   0x3   : > { %s175_s21 = sshll.u32 %s4446_s20, 4  ;;  %p4321_p3 = scmp.eq.s32.totalorder %s3250_s19, 0  ;;  %s176_s21 = int_to_ptr.vmem [resolvable:$true] %s175_s21 }
   0x4   : > { %p4489_p2 = pnand %p3252_p0, %p157_p1  ;;  %s4395_s23 = scalar_lea.vmem %s176_s21, 2048 }
   0x5   : > { %p4396_p7 = scmp.ne.s32.totalorder %s176_s21, %s4395_s23  ;;  %p4403_p10 = scmp.lt.s32.totalorder %s176_s21, %s176_s21 }
   0x6   : > { %p4317_p4 = pneg %p4489_p2  ;;  %p4404_p11 = scmp.lt.s32.totalorder %s4395_s23, %s4395_s23 }
   0x8   : > { %p4318_p5 = pnand %p4321_p3, %p4317_p4  ;;  %p4405_p12 = por %p4404_p11, %p4403_p10 }
   0xa   : > { %p4386_p6 = pneg %p4318_p5 }
   0xc   : > { %p4398_p8 = pnand %p4396_p7, %p4386_p6 }
   0xe   : > { %p4399_p9 = pneg %p4398_p8 }
  0x10   : > { %p4406_p13 = pnand %p4405_p12, %p4399_p9 }
  0x12   : > { %4409 = shalt.err (!%p4406_p13)
}
  0x13   : > { %s4447_s24 = smov 128   ;;  %s4448_s25 = smov 8  }
  0x14   : > { %4320 = dma.hbm_to_vmem [thread:$0]  (!%p4318_p5), %s6341_s3, 2048, %s176_s21, [#allocation3], %s4447_s24, %s4447_s24, %s4448_s25  }
  0x15   : > { %202 = sbr.rel (%p4489_p2) target bundleno = 4777 (0x12a9), region = 40 }
  0x1a   : > { %4427 = dma.done.wait (%p4321_p3), [#allocation3], 2048  }
  0x1b   : > { %4429 = vsyncadd (%p4321_p3), [#allocation3], 4294965248  ;;  %p230_p0 = scmp.lt.s32.totalorder %s3250_s19, 1  ;;  %v355_v0 = vlaneseq  ;;  %v4525_v5 = vld [vmem:[%s6339_s1] sm:$0xff]  ;;  %v4530_v6 = vld [vmem:[%s6339_s1 + $0x8] sm:$0xff]  ;;  %s5045_s21 = smov 0  }
  0x1c   : > { %6566 = vst [vmem:[#allocation7_spill] sm:$0xff] %v4525_v5  ;;  %6567 = vst [vmem:[#allocation8_spill] sm:$0xff] %v4530_v6  ;;  %v4535_v7 = vld [vmem:[%s6339_s1 + $0x10] sm:$0xff]  ;;  %v4540_v8 = vld [vmem:[%s6339_s1 + $0x18] sm:$0xff] }
  0x1d   : > { %s7002_s19 = smov (!%p230_p0, %s3250_s19), 1  ;;  %v4503_v1 = vshrl.u32 %v355_v0, 7  ;;  %6568 = vst [vmem:[#allocation9_spill] sm:$0xff] %v4535_v7  ;;  %6569 = vst [vmem:[#allocation10_spill] sm:$0xff] %v4540_v8  ;;  %v4545_v9 = vld [vmem:[%s6339_s1 + $0x20] sm:$0xff]  ;;  %v4550_v10 = vld [vmem:[%s6339_s1 + $0x28] sm:$0xff] }
  0x1e   : > { %s3263_s28 = sshll.u32 %s7002_s19, 4  ;;  %6570 = vst [vmem:[#allocation11_spill] sm:$0xff] %v4545_v9  ;;  %6571 = vst [vmem:[#allocation12_spill] sm:$0xff] %v4550_v10  ;;  %v4555_v11 = vld [vmem:[%s6339_s1 + $0x30] sm:$0xff]  ;;  %v4560_v12 = vld [vmem:[%s6339_s1 + $0x38] sm:$0xff] }
  0x1f   : > { %6564 = vst [vmem:[#allocation5_spill] sm:$0xff] %v4503_v1  ;;  %v4506_v2 = vadd.s32 8, %v4503_v1  ;;  %vm358_vm0 = vcmp.ge.s32.totalorder %v4503_v1, 1  ;;  %s234_s6 = scalar_lea.vmem %s6338_s0, %s3263_s28  ;;  %s4515_s9 = scalar_lea.vmem %s6343_s5, %s3263_s28  ;;  %6572 = vst [vmem:[#allocation13_spill] sm:$0xff] %v4555_v11  ;;  %v4565_v13 = vld [vmem:[%s6339_s1 + $0x40] sm:$0xff]  ;;  %v4570_v14 = vld [vmem:[%s6339_s1 + $0x48] sm:$0xff] }
  0x20   : > { %v4518_v3 = vld [vmem:[%s234_s6] sm:$0xff]   ;;  %v4520_v4 = vld [vmem:[%s234_s6 + $0x8] sm:$0xff]   ;;  %6573 = vst [vmem:[#allocation14_spill] sm:$0xff] %v4560_v12  ;;  %6574 = vst [vmem:[#allocation15_spill] sm:$0xff] %v4565_v13 }
  0x21   : > { %6565 = vst [vmem:[#allocation6_spill] sm:$0xff] %v4506_v2  ;;  %vm361_vm1 = vcmp.le.s32.totalorder %v4506_v2, 14  ;;  %6575 = vst [vmem:[#allocation16_spill] sm:$0xff] %v4570_v14  ;;  %v4575_v15 = vld [vmem:[%s6339_s1 + $0x50] sm:$0xff]  ;;  %v4580_v16 = vld [vmem:[%s6339_s1 + $0x58] sm:$0xff] }
  0x22   : > { %6576 = vst [vmem:[#allocation17_spill] sm:$0xff] %v4575_v15  ;;  %6577 = vst [vmem:[#allocation18_spill] sm:$0xff] %v4580_v16  ;;  %v4585_v17 = vld [vmem:[%s6339_s1 + $0x60] sm:$0xff]  ;;  %v4590_v18 = vld [vmem:[%s6339_s1 + $0x68] sm:$0xff] }
  0x23   : > { %6578 = vst [vmem:[#allocation19_spill] sm:$0xff] %v4585_v17  ;;  %6579 = vst [vmem:[#allocation20_spill] sm:$0xff] %v4590_v18  ;;  %v4595_v19 = vld [vmem:[%s6339_s1 + $0x70] sm:$0xff]  ;;  %v4600_v20 = vld [vmem:[%s6339_s1 + $0x78] sm:$0xff] }
  0x24   : > { %6580 = vst [vmem:[#allocation21_spill] sm:$0xff] %v4595_v19  ;;  %6581 = vst [vmem:[#allocation22_spill] sm:$0xff] %v4600_v20  ;;  %v4605_v21 = vld [vmem:[%s6339_s1 + $0x80] sm:$0xff]  ;;  %v4610_v22 = vld [vmem:[%s6339_s1 + $0x88] sm:$0xff] }
  0x25   : > { %6582 = vst [vmem:[#allocation23_spill] sm:$0xff] %v4605_v21  ;;  %6583 = vst [vmem:[#allocation24_spill] sm:$0xff] %v4610_v22  ;;  %v4615_v23 = vld [vmem:[%s6339_s1 + $0x90] sm:$0xff]  ;;  %v4620_v24 = vld [vmem:[%s6339_s1 + $0x98] sm:$0xff] }
  0x26   : > { %6584 = vst [vmem:[#allocation25_spill] sm:$0xff] %v4615_v23  ;;  %6585 = vst [vmem:[#allocation26_spill] sm:$0xff] %v4620_v24  ;;  %v4625_v25 = vld [vmem:[%s6339_s1 + $0xa0] sm:$0xff]  ;;  %v4630_v26 = vld [vmem:[%s6339_s1 + $0xa8] sm:$0xff] }
  0x27   : > { %6586 = vst [vmem:[#allocation27_spill] sm:$0xff] %v4625_v25  ;;  %6587 = vst [vmem:[#allocation28_spill] sm:$0xff] %v4630_v26  ;;  %v4635_v27 = vld [vmem:[%s6339_s1 + $0xb0] sm:$0xff]  ;;  %v4640_v28 = vld [vmem:[%s6339_s1 + $0xb8] sm:$0xff] }
  0x28   : > { %6588 = vst [vmem:[#allocation29_spill] sm:$0xff] %v4635_v27  ;;  %6589 = vst [vmem:[#allocation30_spill] sm:$0xff] %v4640_v28  ;;  %v4645_v29 = vld [vmem:[%s6339_s1 + $0xc0] sm:$0xff]  ;;  %v4650_v30 = vld [vmem:[%s6339_s1 + $0xc8] sm:$0xff] }
  0x29   : > { %v4655_v31 = vld [vmem:[%s6339_s1 + $0xd0] sm:$0xff]  ;;  %v4660_v32 = vld [vmem:[%s6339_s1 + $0xd8] sm:$0xff]  ;;  %v4665_v33 = vld [vmem:[%s6339_s1 + $0xe0] sm:$0xff] }
  0x2a   : > { %6590 = vst [vmem:[#allocation31_spill] sm:$0xff] %v4655_v31  ;;  %v4670_v34 = vld [vmem:[%s6339_s1 + $0xe8] sm:$0xff]  ;;  %v4675_v35 = vld [vmem:[%s6339_s1 + $0xf0] sm:$0xff]  ;;  %v4680_v36 = vld [vmem:[%s6339_s1 + $0xf8] sm:$0xff] }
  0x2b   : > { %6591 = vst [vmem:[#allocation32_spill] sm:$0xff] %v4670_v34  ;;  %v4685_v37 = vld [vmem:[%s6339_s1 + $0x100] sm:$0xff]  ;;  %v4690_v38 = vld [vmem:[%s6339_s1 + $0x108] sm:$0xff]  ;;  %v4695_v39 = vld [vmem:[%s6339_s1 + $0x110] sm:$0xff] }
  0x2c   : > { %6592 = vst [vmem:[#allocation33_spill] sm:$0xff] %v4685_v37  ;;  %6593 = vst [vmem:[#allocation34_spill] sm:$0xff] %v4695_v39  ;;  %v4700_v40 = vld [vmem:[%s6339_s1 + $0x118] sm:$0xff]  ;;  %v4705_v41 = vld [vmem:[%s6339_s1 + $0x120] sm:$0xff] }
  0x2d   : > { %6594 = vst [vmem:[#allocation35_spill] sm:$0xff] %v4700_v40  ;;  %6595 = vst [vmem:[#allocation36_spill] sm:$0xff] %v4705_v41  ;;  %v4710_v42 = vld [vmem:[%s6339_s1 + $0x128] sm:$0xff]  ;;  %v4715_v43 = vld [vmem:[%s6339_s1 + $0x130] sm:$0xff] }
  0x2e   : > { %6596 = vst [vmem:[#allocation37_spill] sm:$0xff] %v4715_v43  ;;  %v4720_v44 = vld [vmem:[%s6339_s1 + $0x138] sm:$0xff]  ;;  %v4725_v45 = vld [vmem:[%s6339_s1 + $0x140] sm:$0xff]  ;;  %v4730_v46 = vld [vmem:[%s6339_s1 + $0x148] sm:$0xff] }
  0x2f   : > { %6597 = vst [vmem:[#allocation38_spill] sm:$0xff] %v4730_v46  ;;  %v4735_v47 = vld [vmem:[%s6339_s1 + $0x150] sm:$0xff]  ;;  %v4740_v48 = vld [vmem:[%s6339_s1 + $0x158] sm:$0xff]  ;;  %v4745_v49 = vld [vmem:[%s6339_s1 + $0x160] sm:$0xff] }
  0x30   : > { %6598 = vst [vmem:[#allocation39_spill] sm:$0xff] %v4745_v49  ;;  %v4750_v50 = vld [vmem:[%s6339_s1 + $0x168] sm:$0xff]  ;;  %v4755_v51 = vld [vmem:[%s6339_s1 + $0x170] sm:$0xff]  ;;  %v4760_v52 = vld [vmem:[%s6339_s1 + $0x178] sm:$0xff] }
  0x31   : > { %6599 = vst [vmem:[#allocation40_spill] sm:$0xff] %v4755_v51  ;;  %v4765_v53 = vld [vmem:[%s6340_s2] sm:$0xff]  ;;  %v4770_v54 = vld [vmem:[%s6340_s2 + $0x8] sm:$0xff]  ;;  %v4775_v55 = vld [vmem:[%s6340_s2 + $0x10] sm:$0xff] }
  0x32   : > { %6600 = vst [vmem:[#allocation41_spill] sm:$0xff] %v4765_v53  ;;  %6601 = vst [vmem:[#allocation42_spill] sm:$0xff] %v4770_v54  ;;  %v4780_v56 = vld [vmem:[%s6340_s2 + $0x18] sm:$0xff]  ;;  %v4785_v57 = vld [vmem:[%s6340_s2 + $0x20] sm:$0xff] }
  0x33   : > { %6602 = vst [vmem:[#allocation43_spill] sm:$0xff] %v4775_v55  ;;  %6603 = vst [vmem:[#allocation44_spill] sm:$0xff] %v4780_v56  ;;  %v4790_v58 = vld [vmem:[%s6340_s2 + $0x28] sm:$0xff]  ;;  %v4795_v59 = vld [vmem:[%s6340_s2 + $0x30] sm:$0xff] }
  0x34   : > { %6604 = vst [vmem:[#allocation45_spill] sm:$0xff] %v4785_v57  ;;  %6605 = vst [vmem:[#allocation46_spill] sm:$0xff] %v4790_v58  ;;  %v4800_v60 = vld [vmem:[%s6340_s2 + $0x38] sm:$0xff]  ;;  %v4805_v61 = vld [vmem:[%s6340_s2 + $0x40] sm:$0xff] }
  0x35   : > { %6606 = vst [vmem:[#allocation47_spill] sm:$0xff] %v4795_v59  ;;  %6607 = vst [vmem:[#allocation48_spill] sm:$0xff] %v4800_v60  ;;  %v4810_v62 = vld [vmem:[%s6340_s2 + $0x48] sm:$0xff]  ;;  %v4815_v63 = vld [vmem:[%s6340_s2 + $0x50] sm:$0xff] }
  0x36   : > { %6608 = vst [vmem:[#allocation49_spill] sm:$0xff] %v4805_v61  ;;  %6609 = vst [vmem:[#allocation50_spill] sm:$0xff] %v4810_v62  ;;  %v4820_v0 = vld [vmem:[%s6340_s2 + $0x58] sm:$0xff]  ;;  %v4825_v55 = vld [vmem:[%s6340_s2 + $0x60] sm:$0xff] }
  0x37   : > { %6610 = vst [vmem:[#allocation51_spill] sm:$0xff] %v4815_v63  ;;  %6611 = vst [vmem:[#allocation52_spill] sm:$0xff] %v4820_v0  ;;  %v4830_v58 = vld [vmem:[%s6340_s2 + $0x68] sm:$0xff]  ;;  %v4835_v61 = vld [vmem:[%s6340_s2 + $0x70] sm:$0xff] }
  0x38   : > { %6612 = vst [vmem:[#allocation53_spill] sm:$0xff] %v4825_v55  ;;  %6613 = vst [vmem:[#allocation54_spill] sm:$0xff] %v4830_v58  ;;  %v4840_v2 = vld [vmem:[%s6340_s2 + $0x78] sm:$0xff]  ;;  %v4845_v0 = vld [vmem:[%s6340_s2 + $0x80] sm:$0xff] }
  0x39   : > { %6614 = vst [vmem:[#allocation55_spill] sm:$0xff] %v4835_v61  ;;  %6615 = vst [vmem:[#allocation56_spill] sm:$0xff] %v4840_v2  ;;  %v4850_v53 = vld [vmem:[%s6340_s2 + $0x88] sm:$0xff]  ;;  %v4855_v54 = vld [vmem:[%s6340_s2 + $0x90] sm:$0xff] }
  0x3a   : > { %6616 = vst [vmem:[#allocation57_spill] sm:$0xff] %v4845_v0  ;;  %6617 = vst [vmem:[#allocation58_spill] sm:$0xff] %v4850_v53  ;;  %v4860_v61 = vld [vmem:[%s6340_s2 + $0x98] sm:$0xff]  ;;  %v4865_v56 = vld [vmem:[%s6340_s2 + $0xa0] sm:$0xff] }
  0x3b   : > { %6618 = vst [vmem:[#allocation59_spill] sm:$0xff] %v4855_v54  ;;  %6619 = vst [vmem:[#allocation60_spill] sm:$0xff] %v4860_v61  ;;  %v4870_v57 = vld [vmem:[%s6340_s2 + $0xa8] sm:$0xff]  ;;  %v4875_v53 = vld [vmem:[%s6340_s2 + $0xb0] sm:$0xff] }
  0x3c   : > { %6620 = vst [vmem:[#allocation61_spill] sm:$0xff] %v4865_v56  ;;  %6621 = vst [vmem:[#allocation62_spill] sm:$0xff] %v4870_v57  ;;  %v4880_v59 = vld [vmem:[%s6340_s2 + $0xb8] sm:$0xff]  ;;  %v4885_v60 = vld [vmem:[%s6340_s2 + $0xc0] sm:$0xff] }
  0x3d   : > { %6622 = vst [vmem:[#allocation63_spill] sm:$0xff] %v4875_v53  ;;  %6623 = vst [vmem:[#allocation64_spill] sm:$0xff] %v4880_v59  ;;  %v4890_v56 = vld [vmem:[%s6340_s2 + $0xc8] sm:$0xff]  ;;  %v4895_v62 = vld [vmem:[%s6340_s2 + $0xd0] sm:$0xff] }
  0x3e   : > { %6624 = vst [vmem:[#allocation65_spill] sm:$0xff] %v4885_v60  ;;  %6625 = vst [vmem:[#allocation66_spill] sm:$0xff] %v4890_v56  ;;  %v4900_v63 = vld [vmem:[%s6340_s2 + $0xd8] sm:$0xff]  ;;  %v4905_v59 = vld [vmem:[%s6340_s2 + $0xe0] sm:$0xff] }
  0x3f   : > { %6626 = vst [vmem:[#allocation67_spill] sm:$0xff] %v4895_v62  ;;  %6627 = vst [vmem:[#allocation68_spill] sm:$0xff] %v4900_v63  ;;  %v4910_v55 = vld [vmem:[%s6340_s2 + $0xe8] sm:$0xff]  ;;  %v4915_v58 = vld [vmem:[%s6340_s2 + $0xf0] sm:$0xff] }
  0x40   : > { %6628 = vst [vmem:[#allocation69_spill] sm:$0xff] %v4905_v59  ;;  %6629 = vst [vmem:[#allocation70_spill] sm:$0xff] %v4910_v55  ;;  %v4920_v62 = vld [vmem:[%s6340_s2 + $0xf8] sm:$0xff]  ;;  %v4925_v2 = vld [vmem:[%s6340_s2 + $0x100] sm:$0xff] }
  0x41   : > { %6630 = vst [vmem:[#allocation71_spill] sm:$0xff] %v4915_v58  ;;  %6631 = vst [vmem:[#allocation72_spill] sm:$0xff] %v4920_v62  ;;  %v4930_v0 = vld [vmem:[%s6340_s2 + $0x108] sm:$0xff]  ;;  %v4935_v55 = vld [vmem:[%s6340_s2 + $0x110] sm:$0xff] }
  0x42   : > { %6632 = vst [vmem:[#allocation73_spill] sm:$0xff] %v4925_v2  ;;  %6633 = vst [vmem:[#allocation74_spill] sm:$0xff] %v4930_v0  ;;  %v4940_v54 = vld [vmem:[%s6340_s2 + $0x118] sm:$0xff]  ;;  %v4945_v61 = vld [vmem:[%s6340_s2 + $0x120] sm:$0xff] }
  0x43   : > { %6634 = vst [vmem:[#allocation75_spill] sm:$0xff] %v4935_v55  ;;  %6635 = vst [vmem:[#allocation76_spill] sm:$0xff] %v4940_v54  ;;  %v4950_v2 = vld [vmem:[%s6340_s2 + $0x128] sm:$0xff]  ;;  %v4955_v57 = vld [vmem:[%s6340_s2 + $0x130] sm:$0xff] }
  0x44   : > { %6636 = vst [vmem:[#allocation77_spill] sm:$0xff] %v4945_v61  ;;  %6637 = vst [vmem:[#allocation78_spill] sm:$0xff] %v4950_v2  ;;  %v4960_v53 = vld [vmem:[%s6340_s2 + $0x138] sm:$0xff]  ;;  %v4965_v54 = vld [vmem:[%s6340_s2 + $0x140] sm:$0xff] }
  0x45   : > { %6638 = vst [vmem:[#allocation79_spill] sm:$0xff] %v4955_v57  ;;  %6639 = vst [vmem:[#allocation80_spill] sm:$0xff] %v4960_v53  ;;  %v4970_v60 = vld [vmem:[%s6340_s2 + $0x148] sm:$0xff]  ;;  %v4975_v56 = vld [vmem:[%s6340_s2 + $0x150] sm:$0xff] }
  0x46   : > { %6640 = vst [vmem:[#allocation81_spill] sm:$0xff] %v4965_v54  ;;  %6641 = vst [vmem:[#allocation82_spill] sm:$0xff] %v4970_v60  ;;  %v4980_v57 = vld [vmem:[%s6340_s2 + $0x158] sm:$0xff]  ;;  %v4985_v63 = vld [vmem:[%s6340_s2 + $0x160] sm:$0xff] }
  0x47   : > { %6642 = vst [vmem:[#allocation83_spill] sm:$0xff] %v4975_v56  ;;  %6643 = vst [vmem:[#allocation84_spill] sm:$0xff] %v4980_v57  ;;  %v4990_v59 = vld [vmem:[%s6340_s2 + $0x168] sm:$0xff]  ;;  %v4995_v60 = vld [vmem:[%s6340_s2 + $0x170] sm:$0xff] }
  0x48   : > { %6644 = vst [vmem:[#allocation85_spill] sm:$0xff] %v4985_v63  ;;  %6645 = vst [vmem:[#allocation86_spill] sm:$0xff] %v4990_v59  ;;  %v5000_v58 = vld [vmem:[%s6340_s2 + $0x178] sm:$0xff]  ;;  %v5002_v62 = vld [vmem:[#allocation2] sm:$0xff] }
  0x49   : > { %6646 = vst [vmem:[#allocation87_spill] sm:$0xff] %v4995_v60  ;;  %6647 = vst [vmem:[#allocation88_spill] sm:$0xff] %v5000_v58  ;;  %v5004_v0 = vld [vmem:[#allocation2 + $0x8] sm:$0xff]  ;;  %v5006_v63 = vld [vmem:[#allocation2 + $0x10] sm:$0xff] }
  0x4a   : > { %6648 = vst [vmem:[#allocation89_spill] sm:$0xff] %v5004_v0  ;;  %v5008_v55 = vld [vmem:[#allocation2 + $0x18] sm:$0xff]  ;;  %v5010_v61 = vld [vmem:[#allocation2 + $0x20] sm:$0xff]  ;;  %v5012_v2 = vld [vmem:[#allocation2 + $0x28] sm:$0xff] }
  0x4b   : > { %v5014_v53 = vld [vmem:[#allocation2 + $0x30] sm:$0xff]  ;;  %v5016_v54 = vld [vmem:[#allocation2 + $0x38] sm:$0xff]  ;;  %v5018_v56 = vld [vmem:[#allocation2 + $0x40] sm:$0xff] }
  0x4c   : > { %v5020_v57 = vld [vmem:[#allocation2 + $0x48] sm:$0xff]  ;;  %v5022_v58 = vld [vmem:[#allocation2 + $0x50] sm:$0xff]  ;;  %v5024_v59 = vld [vmem:[#allocation2 + $0x58] sm:$0xff] }
  0x4d   : > { %v5026_v1 = vld [vmem:[#allocation2 + $0x60] sm:$0xff]  ;;  %v5028_v60 = vld [vmem:[#allocation2 + $0x68] sm:$0xff]  ;;  %v5030_v7 = vld [vmem:[#allocation2 + $0x70] sm:$0xff] }
  0x4e   : > { %6649 = vst [vmem:[#allocation90_spill] sm:$0xff] %v5026_v1  ;;  %v5032_v10 = vld [vmem:[#allocation2 + $0x78] sm:$0xff]  ;;  %v5037_v13 = vld [vmem:[%s6342_s4] sm:$0x3f] }
  0x4f   : > { %6650 = vst [vmem:[#allocation91_spill] sm:$0xff] %v5032_v10  ;;  %6651 = vst [vmem:[#allocation92_spill] sm:$0xff] %v5037_v13 }
  0x50 LB: >> { %v6654_v27 = vld [vmem:[#allocation29_spill] sm:$0xff]  ;;  %v6655_v26 = vld [vmem:[#allocation28_spill] sm:$0xff]  ;;  %v6656_v24 = vld [vmem:[#allocation26_spill] sm:$0xff]  ;;  %6671 = vst [vmem:[#allocation93_spill] sm:$0xff] %v4436_v4  ;;  %v6409_v13 = vmov 0.0   ;;  %vm4450_vm2 = vmmov 0   ;;  %v370_v16 = vadd.f32 %v4436_v4, %v4440_v3  ;;  %v377_v19 = vmul.f32 %v4440_v3, %v4440_v3  ;;  %v4436_v4 = vphi %v4520_v4, %v6999_v4   ;;  %s4444_s21 = sphi %s5045_s21, %s367_s21   ;;  %v4440_v3 = vphi %v4518_v3, %v7000_v3  }
  0x51   : >> { %v6653_v0 = vld [vmem:[#allocation89_spill] sm:$0xff]  ;;  %v6658_v21 = vld [vmem:[#allocation23_spill] sm:$0xff]  ;;  %v6659_v20 = vld [vmem:[#allocation22_spill] sm:$0xff]  ;;  %6672 = vst [vmem:[#allocation94_spill] sm:$0xff] %v4440_v3  ;;  %3613 = vmatprep.subr.mxu0 %v6409_v13  ;;  %3645 = vmatprep.mubr.msk.f32.mxu0 %vm4450_vm2, %v6409_v13  ;;  %v378_v22 = vmul.f32 %v4436_v4, %v4436_v4  ;;  %vm386_vm3 = vcmask 1040384   ;;  %s367_s21 = sadd.s32 1, %s4444_s21  }
  0x52   : >> { %v6657_v23 = vld [vmem:[#allocation25_spill] sm:$0xff]  ;;  %v6660_v18 = vld [vmem:[#allocation20_spill] sm:$0xff]  ;;  %v6661_v17 = vld [vmem:[#allocation19_spill] sm:$0xff]  ;;  %557 = vmatprep.mubr.f32.mxu1 %v6409_v13  ;;  %p364_p1 = scmp.ge.s32.totalorder %s367_s21, 2  }
  0x53   : >> { %v6662_v49 = vld [vmem:[#allocation39_spill] sm:$0xff]  ;;  %v6663_v46 = vld [vmem:[#allocation38_spill] sm:$0xff]  ;;  %v6664_v43 = vld [vmem:[#allocation37_spill] sm:$0xff] }
  0x54   : >> { %v6665_v40 = vld [vmem:[#allocation35_spill] sm:$0xff]  ;;  %v6666_v37 = vld [vmem:[#allocation33_spill] sm:$0xff]  ;;  %v6667_v34 = vld [vmem:[#allocation32_spill] sm:$0xff] }
  0x55   : >> { %v6652_v1 = vld [vmem:[#allocation90_spill] sm:$0xff]  ;;  %v6668_v31 = vld [vmem:[#allocation31_spill] sm:$0xff]  ;;  %v6673_v51 = vld [vmem:[#allocation40_spill] sm:$0xff] }
  0x56   : >> { %v6669_v28 = vld [vmem:[#allocation30_spill] sm:$0xff]  ;;  %v6670_v25 = vld [vmem:[#allocation27_spill] sm:$0xff]  ;;  %493 = vmatprep.subr.mxu1 %v6673_v51  ;;  %v379_v51 = vadd.f32 %v378_v22, %v377_v19  ;;  %v6675_v41 = vld [vmem:[#allocation36_spill] sm:$0xff] }
  0x57   : >> { %v6674_v10 = vld [vmem:[#allocation91_spill] sm:$0xff]  ;;  %494 = vmatpush1.msra.mxu1 %v4750_v50  ;;  %v6676_v39 = vld [vmem:[#allocation34_spill] sm:$0xff]  ;;  %v6677_v15 = vld [vmem:[#allocation17_spill] sm:$0xff] }
  0x58   : >> { %3614 = vmatpush3.msra.mxu0 %v6674_v10  ;;  %495 = vmatprep.subr.mxu1 %v4740_v48  ;;  %v371_v10 = vrot.slane %v370_v16, 4  ;;  %v380_v3 = vrot.slane %v379_v51, 4  ;;  %v6678_v14 = vld [vmem:[#allocation16_spill] sm:$0xff]  ;;  %v6679_v12 = vld [vmem:[#allocation14_spill] sm:$0xff]  ;;  %v6680_v11 = vld [vmem:[#allocation13_spill] sm:$0xff] }
  0x59   : >> { %3615 = vmatprep.subr.mxu0 %v6409_v13  ;;  %496 = vmatpush1.msra.mxu1 %v4735_v47  ;;  %v6681_v9 = vld [vmem:[#allocation11_spill] sm:$0xff]  ;;  %v6682_v8 = vld [vmem:[#allocation10_spill] sm:$0xff]  ;;  %v6683_v6 = vld [vmem:[#allocation8_spill] sm:$0xff] }
  0x5a   : >> { %3616 = vmatpush3.msra.mxu0 %v5030_v7  ;;  %497 = vmatprep.subr.mxu1 %v4725_v45  ;;  %v372_v19 = vadd.f32 %v371_v10, %v370_v16  ;;  %v381_v22 = vadd.f32 %v380_v3, %v379_v51  ;;  %v6684_v5 = vld [vmem:[#allocation7_spill] sm:$0xff] }
  0x5b   : >> { %3617 = vmatprep.subr.mxu0 %v6409_v13  ;;  %498 = vmatpush1.msra.mxu1 %v4720_v44 }
  0x5c   : >> { %3618 = vmatpush3.msra.mxu0 %v5028_v60  ;;  %499 = vmatprep.subr.mxu1 %v4710_v42 }
  0x5d   : >> { %3619 = vmatprep.subr.mxu0 %v6409_v13  ;;  %500 = vmatpush1.msra.mxu1 %v6675_v41  ;;  %v382_v41 = vrot.slane %v381_v22, 2 }
  0x5e   : >> { %3620 = vmatpush3.msra.mxu0 %v6652_v1  ;;  %501 = vmatprep.subr.mxu1 %v6676_v39  ;;  %v373_v39 = vrot.slane %v372_v19, 2 }
  0x5f   : >> { %3621 = vmatprep.subr.mxu0 %v6409_v13  ;;  %502 = vmatpush1.msra.mxu1 %v4690_v38  ;;  %v383_v10 = vadd.f32 %v382_v41, %v381_v22  ;;  %v6685_v22 = vld [vmem:[#allocation24_spill] sm:$0xff] }
  0x60   : >> { %3622 = vmatpush3.msra.mxu0 %v5024_v59  ;;  %503 = vmatprep.subr.mxu1 %v4680_v36  ;;  %v374_v3 = vadd.f32 %v373_v39, %v372_v19 }
  0x61   : >> { %3623 = vmatprep.subr.mxu0 %v6409_v13  ;;  %504 = vmatpush1.msra.mxu1 %v4675_v35  ;;  %v384_v51 = vrot.slane %v383_v10, 1 }
  0x62   : >> { %3624 = vmatpush3.msra.mxu0 %v5022_v58  ;;  %505 = vmatprep.subr.mxu1 %v4665_v33  ;;  %v375_v16 = vrot.slane %v374_v3, 1 }
  0x63   : >> { %3625 = vmatprep.subr.mxu0 %v6409_v13  ;;  %506 = vmatpush1.msra.mxu1 %v4660_v32  ;;  %v385_v41 = vadd.f32 %v384_v51, %v383_v10  ;;  %v6689_v51 = vld [vmem:[#allocation15_spill] sm:$0xff] }
  0x64   : >> { %3626 = vmatpush3.msra.mxu0 %v5020_v57  ;;  %507 = vmatprep.subr.mxu1 %v4650_v30  ;;  %v376_v39 = vadd.f32 %v375_v16, %v374_v3  ;;  %v6686_v3 = vld [vmem:[#allocation21_spill] sm:$0xff]  ;;  %v6688_v16 = vld [vmem:[#allocation18_spill] sm:$0xff] }
  0x65   : >> { %3627 = vmatprep.subr.mxu0 %v6409_v13  ;;  %508 = vmatpush1.msra.mxu1 %v4645_v29  ;;  %v6687_v10 = vmov %v6686_v3 }
  0x66   : >> { %3628 = vmatpush3.msra.mxu0 %v5018_v56  ;;  %509 = vmatprep.subr.mxu1 %v6654_v27  ;;  %v387_v19 = vsel %vm386_vm3, %v376_v39, %v385_v41  ;;  %v6690_v39 = vld [vmem:[#allocation12_spill] sm:$0xff]  ;;  %v6691_v41 = vld [vmem:[#allocation9_spill] sm:$0xff] }
  0x67   : >> { %3629 = vmatprep.subr.mxu0 %v6409_v13  ;;  %510 = vmatpush1.msra.mxu1 %v6655_v26 }
  0x68   : >> { %3630 = vmatpush3.msra.mxu0 %v5016_v54  ;;  %511 = vmatprep.subr.mxu1 %v6656_v24 }
  0x69   : >> { %3631 = vmatprep.subr.mxu0 %v6409_v13  ;;  %512 = vmatpush1.msra.mxu1 %v6657_v23 }
  0x6a   : >> { %3632 = vmatpush3.msra.mxu0 %v5014_v53  ;;  %513 = vmatprep.subr.mxu1 %v6658_v21 }
  0x6b   : >> { %3633 = vmatprep.subr.mxu0 %v6409_v13  ;;  %514 = vmatpush1.msra.mxu1 %v6659_v20 }
  0x6c   : >> { %3634 = vmatpush3.msra.mxu0 %v5012_v2  ;;  %515 = vmatprep.subr.mxu1 %v6660_v18 }
  0x6d   : >> { %3635 = vmatprep.subr.mxu0 %v6409_v13  ;;  %516 = vmatpush1.msra.mxu1 %v6661_v17 }
  0x6e   : >> { %3636 = vmatpush3.msra.mxu0 %v5010_v61  ;;  %517 = vmatprep.subr.mxu1 %v6677_v15  ;;  %v6732_v15 = vld [vmem:[#allocation85_spill] sm:$0xff] }
  0x6f   : >> { %3637 = vmatprep.subr.mxu0 %v6409_v13  ;;  %518 = vmatpush1.msra.mxu1 %v6678_v14 }
  0x70   : >> { %3638 = vmatpush3.msra.mxu0 %v5008_v55  ;;  %519 = vmatprep.subr.mxu1 %v6679_v12 }
  0x71   : >> { %3639 = vmatprep.subr.mxu0 %v6409_v13  ;;  %520 = vmatpush1.msra.mxu1 %v6680_v11 }
  0x72   : >> { %3640 = vmatpush3.msra.mxu0 %v5006_v63  ;;  %521 = vmatprep.subr.mxu1 %v6681_v9 }
  0x73   : >> { %3641 = vmatprep.subr.mxu0 %v6409_v13  ;;  %522 = vmatpush1.msra.mxu1 %v6682_v8 }
  0x74   : >> { %3642 = vmatpush3.msra.mxu0 %v6653_v0  ;;  %523 = vmatprep.subr.mxu1 %v6683_v6 }
  0x75   : >> { %3643 = vmatprep.subr.mxu0 %v6409_v13  ;;  %524 = vmatpush1.msra.mxu1 %v6684_v5 }
  0x76   : >> { %3644 = vmatpush3.msra.mxu0 %v5002_v62  ;;  %3683 = vmatprep.subr.mxu1 %v6409_v13 }
  0x77   : >> { %3646 = vmatmul.mubr.f32.vlgmr.msra.gmra.mxu0 %v387_v19  ;;  %3648 = vmatprep.subr.mxu0 %v4760_v52  ;;  %v6692_v19 = vld [vmem:[#allocation87_spill] sm:$0xff] }
  0x78   : >> { %3649 = vmatpush3.msra.mxu0 %v4760_v52 }
  0x79   : >> { %3650 = vmatprep.subr.mxu0 %v6662_v49 }
  0x7a   : >> { %3651 = vmatpush3.msra.mxu0 %v6662_v49 }
  0x7b   : >> { %3652 = vmatprep.subr.mxu0 %v6663_v46 }
  0x7c   : >> { %3653 = vmatpush3.msra.mxu0 %v6663_v46 }
  0x7d   : >> { %3654 = vmatprep.subr.mxu0 %v6664_v43 }
  0x7e   : >> { %3655 = vmatpush3.msra.mxu0 %v6664_v43  ;;  %v6695_v43 = vld [vmem:[#allocation5_spill] sm:$0xff] }
  0x7f   : >> { %3656 = vmatprep.subr.mxu0 %v6665_v40  ;;  %vm654_vm4 = vcmp.lt.s32.totalorder %v6695_v43, 7  ;;  %vm647_vm5 = vcmp.lt.s32.totalorder %v6695_v43, 1 }
  0x80   : >> { %3657 = vmatpush3.msra.mxu0 %v6665_v40 }
  0x81   : >> { %3658 = vmatprep.subr.mxu0 %v6666_v37 }
  0x82   : >> { %3659 = vmatpush3.msra.mxu0 %v6666_v37 }
  0x83   : >> { %3660 = vmatprep.subr.mxu0 %v6667_v34 }
  0x84   : >> { %3661 = vmatpush3.msra.mxu0 %v6667_v34 }
  0x85   : >> { %3662 = vmatprep.subr.mxu0 %v6668_v31 }
  0x86   : >> { %3663 = vmatpush3.msra.mxu0 %v6668_v31 }
  0x87   : >> { %3664 = vmatprep.subr.mxu0 %v6669_v28 }
  0x88   : >> { %3665 = vmatpush3.msra.mxu0 %v6669_v28 }
  0x89   : >> { %3666 = vmatprep.subr.mxu0 %v6670_v25 }
  0x8a   : >> { %3667 = vmatpush3.msra.mxu0 %v6670_v25 }
  0x8b   : >> { %3668 = vmatprep.subr.mxu0 %v6685_v22 }
  0x8c   : >> { %3669 = vmatpush3.msra.mxu0 %v6685_v22 }
  0x8d   : >> { %3670 = vmatprep.subr.mxu0 %v6686_v3 }
  0x8e   : >> { %3671 = vmatpush3.msra.mxu0 %v6687_v10 }
  0x8f   : >> { %3672 = vmatprep.subr.mxu0 %v6688_v16 }
  0x90   : >> { %3673 = vmatpush3.msra.mxu0 %v6688_v16 }
  0x91   : >> { %3674 = vmatprep.subr.mxu0 %v6689_v51 }
  0x92   : >> { %3675 = vmatpush3.msra.mxu0 %v6689_v51  ;;  %v6693_v51 = vld [vmem:[#allocation92_spill] sm:$0xff] }
  0x93   : >> { %3676 = vmatprep.subr.mxu0 %v6690_v39  ;;  %v5165_v34 = vrot.slane %v6693_v51, 7 }
  0x94   : >> { %3677 = vmatpush3.msra.mxu0 %v6690_v39 }
  0x95   : >> { %3678 = vmatprep.subr.mxu0 %v6691_v41  ;;  %6694 = vst [vmem:[#allocation95_spill] sm:$0xff] %v5165_v34 }
  0x96   : >> { %3679 = vmatpush3.msra.mxu0 %v6691_v41  ;;  %v5169_v41 = vsub.s32 1, %v6695_v43 }
  0x97   : >> { %784 = vmatprep.subr.mxu0 %v6692_v19 }
 0x137   : >> { %v454_v3 = vpop.f32.mrf.mxu0 }
 0x138   : >> { %v458_v13 = vmul.f32 0.00390625, %v454_v3 }
 0x139   : >> { %v3647_v10 = vpop.f32.mrf.mxu0 }
 0x13a   : >> { %v459_v22 = vmul.f32 %v458_v13, %v458_v13 }
 0x13c   : >> { %v461_v25 = vrot.slane %v459_v22, 7 }
 0x13e   : >> { %v463_v16 = vsub.f32 %v458_v13, %v461_v25  ;;  %v6696_v25 = vld [vmem:[#allocation94_spill] sm:$0xff] }
 0x140   : >> { %v464_v28 = vmax.f32 %v463_v16, 0.0 }
 0x142   : >> { %v465_v31 = vadd.f32 1e-05, %v464_v28 }
 0x144   : >> { %4360 = vrsqrt.f32 %v465_v31 }
 0x151   : >> { %v4361_v37 = vpop.eup %4360 }
 0x152   : >> { %v470_v39 = vmul.f32 %v4361_v37, %v5165_v34  ;;  %v6697_v34 = vmov 0.0  }
 0x154   : >> { %v472_v40 = vrot.slane %v470_v39, 1  ;;  %v482_v10 = vrot.slane %v470_v39, %v5169_v41  ;;  %v6701_v39 = vld [vmem:[#allocation83_spill] sm:$0xff] }
 0x156   : >> { %v474_v19 = vmul.f32 %v472_v40, %v458_v13  ;;  %v483_v16 = vmul.f32 %v6696_v25, %v482_v10  ;;  %v484_v31 = vmul.f32 %v4436_v4, %v482_v10  ;;  %v6698_v13 = vld [vmem:[#allocation91_spill] sm:$0xff]  ;;  %v6699_v40 = vld [vmem:[#allocation86_spill] sm:$0xff]  ;;  %v6705_v10 = vld [vmem:[#allocation77_spill] sm:$0xff] }
 0x158   : >> { %v476_v46 = vrot.slane %v474_v19, 7  ;;  %v6704_v19 = vld [vmem:[#allocation78_spill] sm:$0xff] }
 0x15a   : >> { %v478_v22 = vsub.f32 %v6693_v51, %v476_v46  ;;  %v6700_v46 = vld [vmem:[#allocation84_spill] sm:$0xff] }
 0x15c   : >> { %v488_v28 = vrot.slane %v478_v22, %v5169_v41  ;;  %v6706_v22 = vld [vmem:[#allocation75_spill] sm:$0xff] }
 0x15e   : >> { %v489_v3 = vadd.f32 %v488_v28, %v483_v16  ;;  %v490_v49 = vadd.f32 %v488_v28, %v484_v31  ;;  %v6707_v16 = vld [vmem:[#allocation74_spill] sm:$0xff]  ;;  %v6708_v28 = vld [vmem:[#allocation72_spill] sm:$0xff]  ;;  %v6709_v31 = vld [vmem:[#allocation71_spill] sm:$0xff] }
 0x160   : >> { %v491_v5 = vmax.f32 %v489_v3, 0.0  ;;  %v492_v37 = vmax.f32 %v490_v49, 0.0  ;;  %v6703_v49 = vld [vmem:[#allocation80_spill] sm:$0xff]  ;;  %v6710_v3 = vld [vmem:[#allocation69_spill] sm:$0xff] }
 0x162   : >> { %558 = vmatmul.mubr.f32.vlgmr.msra.gmra.mxu1 %v491_v5  ;;  %3680 = vmatprep.mubr.f32.mxu0 %v491_v5  ;;  %v6702_v5 = vld [vmem:[#allocation81_spill] sm:$0xff] }
 0x163   : >> { %3681 = vmatmul.mubr.f32.vlgmr.msra.gmra.mxu0 %v492_v37  ;;  %563 = vmatprep.mubr.f32.mxu1 %v6697_v34 }
 0x164   : >> { %3684 = vmatpush3.msra.mxu1 %v6698_v13  ;;  %785 = vmatpush1.msra.mxu0 %v6699_v40 }
 0x165   : >> { %3685 = vmatprep.subr.mxu1 %v6697_v34  ;;  %786 = vmatprep.subr.mxu0 %v6700_v46 }
 0x166   : >> { %564 = vmatmul.mubr.f32.gmra.mxu1 %v492_v37  ;;  %787 = vmatpush1.msra.mxu0 %v6701_v39  ;;  %v6715_v37 = vld [vmem:[#allocation62_spill] sm:$0xff] }
 0x167   : >> { %3686 = vmatpush3.msra.mxu1 %v5030_v7  ;;  %3715 = vmatprep.mubr.msk.f32.mxu1 %vm4450_vm2, %v6697_v34 }
 0x168   : >> { %3687 = vmatprep.subr.mxu1 %v6697_v34  ;;  %788 = vmatprep.subr.mxu0 %v6702_v5 }
 0x169   : >> { %3688 = vmatpush3.msra.mxu1 %v5028_v60  ;;  %789 = vmatpush1.msra.mxu0 %v6703_v49 }
 0x16a   : >> { %3689 = vmatprep.subr.mxu1 %v6697_v34  ;;  %790 = vmatprep.subr.mxu0 %v6704_v19 }
 0x16b   : >> { %3690 = vmatpush3.msra.mxu1 %v6652_v1  ;;  %791 = vmatpush1.msra.mxu0 %v6705_v10  ;;  %v6711_v10 = vld [vmem:[#allocation68_spill] sm:$0xff] }
 0x16c   : >> { %3691 = vmatprep.subr.mxu1 %v6697_v34  ;;  %792 = vmatprep.subr.mxu0 %v6706_v22  ;;  %v6712_v22 = vld [vmem:[#allocation66_spill] sm:$0xff] }
 0x16d   : >> { %3692 = vmatpush3.msra.mxu1 %v5024_v59  ;;  %793 = vmatpush1.msra.mxu0 %v6707_v16  ;;  %v6713_v16 = vld [vmem:[#allocation65_spill] sm:$0xff] }
 0x16e   : >> { %3693 = vmatprep.subr.mxu1 %v6697_v34  ;;  %794 = vmatprep.subr.mxu0 %v6708_v28  ;;  %v6714_v28 = vld [vmem:[#allocation63_spill] sm:$0xff] }
 0x16f   : >> { %3694 = vmatpush3.msra.mxu1 %v5022_v58  ;;  %795 = vmatpush1.msra.mxu0 %v6709_v31  ;;  %v6721_v31 = vld [vmem:[#allocation53_spill] sm:$0xff] }
 0x170   : >> { %3695 = vmatprep.subr.mxu1 %v6697_v34  ;;  %796 = vmatprep.subr.mxu0 %v6710_v3  ;;  %v6716_v3 = vld [vmem:[#allocation60_spill] sm:$0xff] }
 0x171   : >> { %3696 = vmatpush3.msra.mxu1 %v5020_v57  ;;  %797 = vmatpush1.msra.mxu0 %v6711_v10  ;;  %v6717_v10 = vld [vmem:[#allocation59_spill] sm:$0xff] }
 0x172   : >> { %3697 = vmatprep.subr.mxu1 %v6697_v34  ;;  %798 = vmatprep.subr.mxu0 %v6712_v22  ;;  %v6718_v22 = vld [vmem:[#allocation57_spill] sm:$0xff] }
 0x173   : >> { %3698 = vmatpush3.msra.mxu1 %v5018_v56  ;;  %799 = vmatpush1.msra.mxu0 %v6713_v16  ;;  %v6719_v16 = vld [vmem:[#allocation56_spill] sm:$0xff] }
 0x174   : >> { %3699 = vmatprep.subr.mxu1 %v6697_v34  ;;  %800 = vmatprep.subr.mxu0 %v6714_v28  ;;  %v6720_v28 = vld [vmem:[#allocation54_spill] sm:$0xff] }
 0x175   : >> { %3700 = vmatpush3.msra.mxu1 %v5016_v54  ;;  %801 = vmatpush1.msra.mxu0 %v6715_v37  ;;  %v6727_v37 = vld [vmem:[#allocation44_spill] sm:$0xff] }
 0x176   : >> { %3701 = vmatprep.subr.mxu1 %v6697_v34  ;;  %802 = vmatprep.subr.mxu0 %v6716_v3  ;;  %v6722_v3 = vld [vmem:[#allocation51_spill] sm:$0xff] }
 0x177   : >> { %3702 = vmatpush3.msra.mxu1 %v5014_v53  ;;  %803 = vmatpush1.msra.mxu0 %v6717_v10  ;;  %v6723_v10 = vld [vmem:[#allocation50_spill] sm:$0xff] }
 0x178   : >> { %3703 = vmatprep.subr.mxu1 %v6697_v34  ;;  %804 = vmatprep.subr.mxu0 %v6718_v22  ;;  %v6724_v22 = vld [vmem:[#allocation48_spill] sm:$0xff] }
 0x179   : >> { %3704 = vmatpush3.msra.mxu1 %v5012_v2  ;;  %805 = vmatpush1.msra.mxu0 %v6719_v16  ;;  %v6725_v16 = vld [vmem:[#allocation47_spill] sm:$0xff] }
 0x17a   : >> { %3705 = vmatprep.subr.mxu1 %v6697_v34  ;;  %806 = vmatprep.subr.mxu0 %v6720_v28  ;;  %v6726_v28 = vld [vmem:[#allocation45_spill] sm:$0xff] }
 0x17b   : >> { %3706 = vmatpush3.msra.mxu1 %v5010_v61  ;;  %807 = vmatpush1.msra.mxu0 %v6721_v31 }
 0x17c   : >> { %3707 = vmatprep.subr.mxu1 %v6697_v34  ;;  %808 = vmatprep.subr.mxu0 %v6722_v3  ;;  %v6728_v3 = vld [vmem:[#allocation42_spill] sm:$0xff] }
 0x17d   : >> { %3708 = vmatpush3.msra.mxu1 %v5008_v55  ;;  %809 = vmatpush1.msra.mxu0 %v6723_v10  ;;  %v6729_v10 = vld [vmem:[#allocation41_spill] sm:$0xff] }
 0x17e   : >> { %3709 = vmatprep.subr.mxu1 %v6697_v34  ;;  %810 = vmatprep.subr.mxu0 %v6724_v22  ;;  %v6730_v22 = vld [vmem:[#allocation88_spill] sm:$0xff] }
 0x17f   : >> { %3710 = vmatpush3.msra.mxu1 %v5006_v63  ;;  %811 = vmatpush1.msra.mxu0 %v6725_v16 }
 0x180   : >> { %3711 = vmatprep.subr.mxu1 %v6697_v34  ;;  %812 = vmatprep.subr.mxu0 %v6726_v28 }
 0x181   : >> { %3712 = vmatpush3.msra.mxu1 %v6653_v0  ;;  %813 = vmatpush1.msra.mxu0 %v6727_v37 }
 0x182   : >> { %3713 = vmatprep.subr.mxu1 %v6697_v34  ;;  %814 = vmatprep.subr.mxu0 %v6728_v3 }
 0x183   : >> { %3714 = vmatpush3.msra.mxu1 %v5002_v62  ;;  %815 = vmatpush1.msra.mxu0 %v6729_v10 }
 0x184   : >> { %3718 = vmatprep.subr.mxu1 %v6730_v22  ;;  %848 = vmatprep.mubr.f32.mxu0 %v6697_v34 }
 0x185   : >> { %3753 = vmatprep.subr.mxu0 %v6697_v34 }
 0x222   : >> { %v559_v16 = vpop.f32.mrf.mxu1 }
 0x223   : >> { %v3682_v28 = vpop.f32.mrf.mxu0  ;;  %v645_v3 = vrot.slane %v559_v16, 7 }
 0x224   : >> { %v561_v19 = vpop.f32.mrf.mxu1  ;;  %v653_v37 = vrot.slane %v3682_v28, 1 }
 0x225   : >> { %v636_v49 = vpop.f32.mrf.mxu0 }
 0x226   : >> { %v652_v5 = vrot.slane %v636_v49, 1  ;;  %v565_v31 = vpop.f32.mrf.mxu1 }
 0x227   : >> { %v646_v39 = vrot.slane %v565_v31, 7 }
 0x228   : >> { %v567_v10 = vpop.f32.mrf.mxu1  ;;  %v656_v46 = vsel %vm654_vm4, %v653_v37, %v652_v5  ;;  %v655_v16 = vsel %vm654_vm4, %v652_v5, %v653_v37 }
 0x229   : >> { %v649_v40 = vsel %vm647_vm5, %v646_v39, %v645_v3  ;;  %v648_v4 = vsel %vm647_vm5, %v645_v3, %v646_v39  ;;  %v658_v8 = vsel %vm361_vm1, %v656_v46, 0.0 }
 0x22a   : >> { %v650_v25 = vsel %vm358_vm0, %v649_v40, 0.0  ;;  %v660_v28 = vadd.f32 %v648_v4, %v567_v10 }
 0x22b   : >> { %v659_v49 = vadd.f32 %v650_v25, %v561_v19 }
 0x22c   : >> { %v5258_v31 = vadd.f32 %v660_v28, %v658_v8 }
 0x22d   : >> { %v5260_v9 = vadd.f32 %v659_v49, %v655_v16 }
 0x22e   : >> { %v671_v11 = vmul.f32 %v5258_v31, %v5258_v31 }
 0x22f   : >> { %v663_v39 = vadd.f32 %v5258_v31, %v5260_v9  ;;  %v670_v4 = vmul.f32 %v5260_v9, %v5260_v9 }
 0x231   : >> { %v664_v25 = vrot.slane %v663_v39, 4  ;;  %v672_v40 = vadd.f32 %v671_v11, %v670_v4  ;;  %v6733_v11 = vld [vmem:[#allocation82_spill] sm:$0xff]  ;;  %v6735_v4 = vld [vmem:[#allocation76_spill] sm:$0xff] }
 0x233   : >> { %v665_v19 = vadd.f32 %v664_v25, %v663_v39  ;;  %v673_v46 = vrot.slane %v672_v40, 4  ;;  %v6734_v39 = vld [vmem:[#allocation79_spill] sm:$0xff]  ;;  %v6736_v25 = vmov %v6735_v4 }
 0x235   : >> { %v666_v10 = vrot.slane %v665_v19, 2  ;;  %v674_v3 = vadd.f32 %v673_v46, %v672_v40  ;;  %v6739_v40 = vld [vmem:[#allocation67_spill] sm:$0xff]  ;;  %v6741_v46 = vld [vmem:[#allocation61_spill] sm:$0xff] }
 0x237   : >> { %v667_v5 = vadd.f32 %v666_v10, %v665_v19  ;;  %v675_v8 = vrot.slane %v674_v3, 2  ;;  %v6740_v19 = vld [vmem:[#allocation64_spill] sm:$0xff]  ;;  %v6742_v10 = vld [vmem:[#allocation58_spill] sm:$0xff] }
 0x239   : >> { %v668_v37 = vrot.slane %v667_v5, 1  ;;  %v676_v28 = vadd.f32 %v675_v8, %v674_v3  ;;  %v6743_v3 = vld [vmem:[#allocation55_spill] sm:$0xff]  ;;  %v6745_v8 = vld [vmem:[#allocation52_spill] sm:$0xff] }
 0x23b   : >> { %v677_v49 = vrot.slane %v676_v28, 1  ;;  %v669_v16 = vadd.f32 %v668_v37, %v667_v5  ;;  %v6744_v5 = vmov %v6743_v3  ;;  %v6746_v37 = vld [vmem:[#allocation49_spill] sm:$0xff] }
 0x23d   : >> { %v678_v12 = vadd.f32 %v677_v49, %v676_v28  ;;  %v6747_v28 = vld [vmem:[#allocation46_spill] sm:$0xff]  ;;  %v6748_v49 = vld [vmem:[#allocation43_spill] sm:$0xff] }
 0x23f   : >> { %v679_v14 = vsel %vm386_vm3, %v669_v16, %v678_v12  ;;  %v6737_v12 = vld [vmem:[#allocation73_spill] sm:$0xff] }
 0x240   : >> { %3716 = vmatmul.mubr.f32.vlgmr.msra.gmra.mxu1 %v679_v14  ;;  %v6738_v14 = vld [vmem:[#allocation70_spill] sm:$0xff] }
 0x241   : >> { %3719 = vmatpush3.msra.mxu1 %v6730_v22 }
 0x242   : >> { %3720 = vmatprep.subr.mxu1 %v6732_v15 }
 0x243   : >> { %3721 = vmatpush3.msra.mxu1 %v6732_v15 }
 0x244   : >> { %3722 = vmatprep.subr.mxu1 %v6733_v11 }
 0x245   : >> { %3723 = vmatpush3.msra.mxu1 %v6733_v11 }
 0x246   : >> { %3724 = vmatprep.subr.mxu1 %v6734_v39 }
 0x247   : >> { %3725 = vmatpush3.msra.mxu1 %v6734_v39 }
 0x248   : >> { %3726 = vmatprep.subr.mxu1 %v6735_v4 }
 0x249   : >> { %3727 = vmatpush3.msra.mxu1 %v6736_v25 }
 0x24a   : >> { %3728 = vmatprep.subr.mxu1 %v6737_v12 }
 0x24b   : >> { %3729 = vmatpush3.msra.mxu1 %v6737_v12 }
 0x24c   : >> { %3730 = vmatprep.subr.mxu1 %v6738_v14 }
 0x24d   : >> { %3731 = vmatpush3.msra.mxu1 %v6738_v14 }
 0x24e   : >> { %3732 = vmatprep.subr.mxu1 %v6739_v40 }
 0x24f   : >> { %3733 = vmatpush3.msra.mxu1 %v6739_v40 }
 0x250   : >> { %3734 = vmatprep.subr.mxu1 %v6740_v19 }
 0x251   : >> { %3735 = vmatpush3.msra.mxu1 %v6740_v19 }
 0x252   : >> { %3736 = vmatprep.subr.mxu1 %v6741_v46 }
 0x253   : >> { %3737 = vmatpush3.msra.mxu1 %v6741_v46 }
 0x254   : >> { %3738 = vmatprep.subr.mxu1 %v6742_v10 }
 0x255   : >> { %3739 = vmatpush3.msra.mxu1 %v6742_v10 }
 0x256   : >> { %3740 = vmatprep.subr.mxu1 %v6743_v3 }
 0x257   : >> { %3741 = vmatpush3.msra.mxu1 %v6744_v5 }
 0x258   : >> { %3742 = vmatprep.subr.mxu1 %v6745_v8 }
 0x259   : >> { %3743 = vmatpush3.msra.mxu1 %v6745_v8 }
 0x25a   : >> { %3744 = vmatprep.subr.mxu1 %v6746_v37 }
 0x25b   : >> { %3745 = vmatpush3.msra.mxu1 %v6746_v37  ;;  %v5302_v37 = vrot.slane %v6693_v51, 1 }
 0x25c   : >> { %3746 = vmatprep.subr.mxu1 %v6747_v28 }
 0x25d   : >> { %3747 = vmatpush3.msra.mxu1 %v6747_v28  ;;  %6749 = vst [vmem:[#allocation96_spill] sm:$0xff] %v5302_v37 }
 0x25e   : >> { %3748 = vmatprep.subr.mxu1 %v6748_v49 }
 0x25f   : >> { %3749 = vmatpush3.msra.mxu1 %v6748_v49 }
 0x260   : >> { %3788 = vmatprep.subr.mxu1 %v6697_v34 }
 0x300   : >> { %v746_v16 = vpop.f32.mrf.mxu1 }
 0x301   : >> { %v750_v4 = vmul.f32 0.00390625, %v746_v16  ;;  %v5307_v16 = vsub.s32 3, %v6695_v43 }
 0x302   : >> { %v3717_v3 = vpop.f32.mrf.mxu1 }
 0x303   : >> { %v751_v5 = vmul.f32 %v750_v4, %v750_v4  ;;  %6750 = vst [vmem:[#allocation97_spill] sm:$0xff] %v5307_v16 }
 0x305   : >> { %v753_v10 = vrot.slane %v751_v5, 7 }
 0x307   : >> { %v755_v8 = vsub.f32 %v750_v4, %v753_v10 }
 0x309   : >> { %v756_v46 = vmax.f32 %v755_v8, 0.0 }
 0x30b   : >> { %v757_v19 = vadd.f32 1e-05, %v756_v46 }
 0x30d   : >> { %4362 = vrsqrt.f32 %v757_v19 }
 0x31a   : >> { %v4363_v40 = vpop.eup %4362 }
 0x31b   : >> { %v761_v28 = vmul.f32 %v4363_v40, %v5302_v37 }
 0x31d   : >> { %v763_v14 = vrot.slane %v761_v28, 1  ;;  %v773_v25 = vrot.slane %v761_v28, %v5169_v41 }
 0x31f   : >> { %v765_v12 = vmul.f32 %v763_v14, %v750_v4  ;;  %v774_v19 = vmul.f32 %v773_v25, %v5260_v9  ;;  %v775_v46 = vmul.f32 %v773_v25, %v5258_v31  ;;  %v6751_v9 = vld [vmem:[#allocation40_spill] sm:$0xff] }
 0x321   : >> { %v767_v49 = vrot.slane %v765_v12, 5 }
 0x323   : >> { %v769_v5 = vsub.f32 %v6693_v51, %v767_v49 }
 0x325   : >> { %v779_v10 = vrot.slane %v769_v5, %v5307_v16 }
 0x327   : >> { %v780_v8 = vadd.f32 %v779_v10, %v774_v19  ;;  %v781_v3 = vadd.f32 %v779_v10, %v775_v46 }
 0x329   : >> { %v782_v39 = vmax.f32 %v780_v8, 0.0  ;;  %v783_v40 = vmax.f32 %v781_v3, 0.0 }
 0x32b   : >> { %849 = vmatmul.mubr.f32.vlgmr.msra.gmra.mxu0 %v782_v39  ;;  %3750 = vmatprep.mubr.f32.mxu1 %v782_v39 }
 0x32c   : >> { %3751 = vmatmul.mubr.f32.vlgmr.msra.gmra.mxu1 %v783_v40  ;;  %854 = vmatprep.mubr.f32.mxu0 %v6697_v34 }
 0x32d   : >> { %3754 = vmatpush3.msra.mxu0 %v6698_v13  ;;  %3789 = vmatpush3.msra.mxu1 %v6698_v13 }
 0x32e   : >> { %3755 = vmatprep.subr.mxu0 %v6697_v34  ;;  %3790 = vmatprep.subr.mxu1 %v6697_v34 }
 0x32f   : >> { %855 = vmatmul.mubr.f32.gmra.mxu0 %v783_v40  ;;  %3791 = vmatpush3.msra.mxu1 %v5030_v7 }
 0x330   : >> { %3756 = vmatpush3.msra.mxu0 %v5030_v7  ;;  %3785 = vmatprep.mubr.msk.f32.mxu0 %vm4450_vm2, %v6697_v34 }
 0x331   : >> { %3757 = vmatprep.subr.mxu0 %v6697_v34  ;;  %3792 = vmatprep.subr.mxu1 %v6697_v34 }
 0x332   : >> { %3758 = vmatpush3.msra.mxu0 %v5028_v60  ;;  %3793 = vmatpush3.msra.mxu1 %v5028_v60 }
 0x333   : >> { %3759 = vmatprep.subr.mxu0 %v6697_v34  ;;  %3794 = vmatprep.subr.mxu1 %v6697_v34 }
 0x334   : >> { %3760 = vmatpush3.msra.mxu0 %v6652_v1  ;;  %3795 = vmatpush3.msra.mxu1 %v6652_v1 }
 0x335   : >> { %3761 = vmatprep.subr.mxu0 %v6697_v34  ;;  %3796 = vmatprep.subr.mxu1 %v6697_v34 }
 0x336   : >> { %3762 = vmatpush3.msra.mxu0 %v5024_v59  ;;  %3797 = vmatpush3.msra.mxu1 %v5024_v59 }
 0x337   : >> { %3763 = vmatprep.subr.mxu0 %v6697_v34  ;;  %3798 = vmatprep.subr.mxu1 %v6697_v34 }
 0x338   : >> { %3764 = vmatpush3.msra.mxu0 %v5022_v58  ;;  %3799 = vmatpush3.msra.mxu1 %v5022_v58 }
 0x339   : >> { %3765 = vmatprep.subr.mxu0 %v6697_v34  ;;  %3800 = vmatprep.subr.mxu1 %v6697_v34 }
 0x33a   : >> { %3766 = vmatpush3.msra.mxu0 %v5020_v57  ;;  %3801 = vmatpush3.msra.mxu1 %v5020_v57 }
 0x33b   : >> { %3767 = vmatprep.subr.mxu0 %v6697_v34  ;;  %3802 = vmatprep.subr.mxu1 %v6697_v34 }
 0x33c   : >> { %3768 = vmatpush3.msra.mxu0 %v5018_v56  ;;  %3803 = vmatpush3.msra.mxu1 %v5018_v56 }
 0x33d   : >> { %3769 = vmatprep.subr.mxu0 %v6697_v34  ;;  %3804 = vmatprep.subr.mxu1 %v6697_v34 }
 0x33e   : >> { %3770 = vmatpush3.msra.mxu0 %v5016_v54  ;;  %3805 = vmatpush3.msra.mxu1 %v5016_v54 }
 0x33f   : >> { %3771 = vmatprep.subr.mxu0 %v6697_v34  ;;  %3806 = vmatprep.subr.mxu1 %v6697_v34 }
 0x340   : >> { %3772 = vmatpush3.msra.mxu0 %v5014_v53  ;;  %3807 = vmatpush3.msra.mxu1 %v5014_v53 }
 0x341   : >> { %3773 = vmatprep.subr.mxu0 %v6697_v34  ;;  %3808 = vmatprep.subr.mxu1 %v6697_v34 }
 0x342   : >> { %3774 = vmatpush3.msra.mxu0 %v5012_v2  ;;  %3809 = vmatpush3.msra.mxu1 %v5012_v2 }
 0x343   : >> { %3775 = vmatprep.subr.mxu0 %v6697_v34  ;;  %3810 = vmatprep.subr.mxu1 %v6697_v34 }
 0x344   : >> { %3776 = vmatpush3.msra.mxu0 %v5010_v61  ;;  %3811 = vmatpush3.msra.mxu1 %v5010_v61 }
 0x345   : >> { %3777 = vmatprep.subr.mxu0 %v6697_v34  ;;  %3812 = vmatprep.subr.mxu1 %v6697_v34 }
 0x346   : >> { %3778 = vmatpush3.msra.mxu0 %v5008_v55  ;;  %3813 = vmatpush3.msra.mxu1 %v5008_v55 }
 0x347   : >> { %3779 = vmatprep.subr.mxu0 %v6697_v34  ;;  %3814 = vmatprep.subr.mxu1 %v6697_v34 }
 0x348   : >> { %3780 = vmatpush3.msra.mxu0 %v5006_v63  ;;  %3815 = vmatpush3.msra.mxu1 %v5006_v63 }
 0x349   : >> { %3781 = vmatprep.subr.mxu0 %v6697_v34  ;;  %3816 = vmatprep.subr.mxu1 %v6697_v34 }
 0x34a   : >> { %3782 = vmatpush3.msra.mxu0 %v6653_v0  ;;  %3817 = vmatpush3.msra.mxu1 %v6653_v0 }
 0x34b   : >> { %3783 = vmatprep.subr.mxu0 %v6697_v34  ;;  %3818 = vmatprep.subr.mxu1 %v6697_v34 }
 0x34c   : >> { %3784 = vmatpush3.msra.mxu0 %v5002_v62  ;;  %3819 = vmatpush3.msra.mxu1 %v5002_v62 }
 0x34d   : >> { %3820 = vmatprep.mubr.msk.f32.mxu1 %vm4450_vm2, %v6697_v34  ;;  %1194 = vmatprep.subr.mxu0 %v6751_v9 }
 0x34e   : >> { %3823 = vmatprep.subr.mxu1 %v4760_v52 }
 0x3eb   : >> { %v850_v31 = vpop.f32.mrf.mxu0 }
 0x3ec   : >> { %v3752_v39 = vpop.f32.mrf.mxu1  ;;  %v936_v4 = vrot.slane %v850_v31, 7 }
 0x3ed   : >> { %v852_v25 = vpop.f32.mrf.mxu0  ;;  %v943_v14 = vrot.slane %v3752_v39, 1 }
 0x3ee   : >> { %v927_v12 = vpop.f32.mrf.mxu1 }
 0x3ef   : >> { %v942_v28 = vrot.slane %v927_v12, 1  ;;  %v856_v49 = vpop.f32.mrf.mxu0 }
 0x3f0   : >> { %v937_v5 = vrot.slane %v856_v49, 7 }
 0x3f1   : >> { %v858_v10 = vpop.f32.mrf.mxu0  ;;  %v945_v19 = vsel %vm654_vm4, %v943_v14, %v942_v28  ;;  %v944_v31 = vsel %vm654_vm4, %v942_v28, %v943_v14 }
 0x3f2   : >> { %v939_v46 = vsel %vm647_vm5, %v937_v5, %v936_v4  ;;  %v938_v8 = vsel %vm647_vm5, %v936_v4, %v937_v5  ;;  %v947_v39 = vsel %vm361_vm1, %v945_v19, 0.0 }
 0x3f3   : >> { %v940_v3 = vsel %vm358_vm0, %v939_v46, 0.0  ;;  %v949_v40 = vadd.f32 %v938_v8, %v858_v10 }
 0x3f4   : >> { %v948_v9 = vadd.f32 %v940_v3, %v852_v25 }
 0x3f5   : >> { %v5394_v12 = vadd.f32 %v949_v40, %v947_v39 }
 0x3f6   : >> { %v5396_v49 = vadd.f32 %v948_v9, %v944_v31 }
 0x3f7   : >> { %v960_v16 = vmul.f32 %v5394_v12, %v5394_v12 }
 0x3f8   : >> { %v952_v4 = vadd.f32 %v5394_v12, %v5396_v49  ;;  %v959_v5 = vmul.f32 %v5396_v49, %v5396_v49 }
 0x3fa   : >> { %v953_v25 = vrot.slane %v952_v4, 4  ;;  %v961_v10 = vadd.f32 %v960_v16, %v959_v5  ;;  %v6752_v16 = vld [vmem:[#allocation36_spill] sm:$0xff]  ;;  %v6756_v5 = vld [vmem:[#allocation14_spill] sm:$0xff] }
 0x3fc   : >> { %v954_v46 = vadd.f32 %v953_v25, %v952_v4  ;;  %v962_v19 = vrot.slane %v961_v10, 4  ;;  %v6753_v4 = vld [vmem:[#allocation34_spill] sm:$0xff]  ;;  %v6757_v25 = vld [vmem:[#allocation13_spill] sm:$0xff] }
 0x3fe   : >> { %v955_v8 = vrot.slane %v954_v46, 2  ;;  %v963_v3 = vadd.f32 %v962_v19, %v961_v10  ;;  %v6758_v10 = vld [vmem:[#allocation11_spill] sm:$0xff]  ;;  %v6760_v19 = vld [vmem:[#allocation8_spill] sm:$0xff] }
 0x400   : >> { %v956_v14 = vadd.f32 %v955_v8, %v954_v46  ;;  %v964_v28 = vrot.slane %v963_v3, 2  ;;  %v6759_v46 = vld [vmem:[#allocation10_spill] sm:$0xff]  ;;  %v6761_v8 = vld [vmem:[#allocation7_spill] sm:$0xff] }
 0x402   : >> { %v957_v40 = vrot.slane %v956_v14, 1  ;;  %v965_v9 = vadd.f32 %v964_v28, %v963_v3 }
 0x404   : >> { %v966_v39 = vrot.slane %v965_v9, 1  ;;  %v958_v31 = vadd.f32 %v957_v40, %v956_v14 }
 0x406   : >> { %v967_v37 = vadd.f32 %v966_v39, %v965_v9 }
 0x408   : >> { %v968_v11 = vsel %vm386_vm3, %v958_v31, %v967_v37  ;;  %v6755_v37 = vld [vmem:[#allocation16_spill] sm:$0xff] }
 0x409   : >> { %3786 = vmatmul.mubr.f32.vlgmr.msra.gmra.mxu0 %v968_v11  ;;  %v6754_v11 = vld [vmem:[#allocation17_spill] sm:$0xff] }
 0x40a   : >> { %1195 = vmatpush1.msra.mxu0 %v4750_v50  ;;  %1258 = vmatprep.mubr.f32.mxu0 %v6697_v34 }
 0x40b   : >> { %1196 = vmatprep.subr.mxu0 %v4740_v48 }
 0x40c   : >> { %1197 = vmatpush1.msra.mxu0 %v4735_v47 }
 0x40d   : >> { %1198 = vmatprep.subr.mxu0 %v4725_v45 }
 0x40e   : >> { %1199 = vmatpush1.msra.mxu0 %v4720_v44 }
 0x40f   : >> { %1200 = vmatprep.subr.mxu0 %v4710_v42 }
 0x410   : >> { %1201 = vmatpush1.msra.mxu0 %v6752_v16 }
 0x411   : >> { %1202 = vmatprep.subr.mxu0 %v6753_v4 }
 0x412   : >> { %1203 = vmatpush1.msra.mxu0 %v4690_v38 }
 0x413   : >> { %1204 = vmatprep.subr.mxu0 %v4680_v36 }
 0x414   : >> { %1205 = vmatpush1.msra.mxu0 %v4675_v35 }
 0x415   : >> { %1206 = vmatprep.subr.mxu0 %v4665_v33 }
 0x416   : >> { %1207 = vmatpush1.msra.mxu0 %v4660_v32 }
 0x417   : >> { %1208 = vmatprep.subr.mxu0 %v4650_v30 }
 0x418   : >> { %1209 = vmatpush1.msra.mxu0 %v4645_v29 }
 0x419   : >> { %1210 = vmatprep.subr.mxu0 %v6654_v27 }
 0x41a   : >> { %1211 = vmatpush1.msra.mxu0 %v6655_v26 }
 0x41b   : >> { %1212 = vmatprep.subr.mxu0 %v6656_v24 }
 0x41c   : >> { %1213 = vmatpush1.msra.mxu0 %v6657_v23 }
 0x41d   : >> { %1214 = vmatprep.subr.mxu0 %v6658_v21 }
 0x41e   : >> { %1215 = vmatpush1.msra.mxu0 %v6659_v20  ;;  %v6768_v20 = vld [vmem:[#allocation39_spill] sm:$0xff] }
 0x41f   : >> { %1216 = vmatprep.subr.mxu0 %v6660_v18 }
 0x420   : >> { %1217 = vmatpush1.msra.mxu0 %v6661_v17 }
 0x421   : >> { %1218 = vmatprep.subr.mxu0 %v6754_v11 }
 0x422   : >> { %1219 = vmatpush1.msra.mxu0 %v6755_v37 }
 0x423   : >> { %1220 = vmatprep.subr.mxu0 %v6756_v5 }
 0x424   : >> { %1221 = vmatpush1.msra.mxu0 %v6757_v25  ;;  %v5439_v25 = vrot.slane %v6693_v51, 3 }
 0x425   : >> { %1222 = vmatprep.subr.mxu0 %v6758_v10 }
 0x426   : >> { %1223 = vmatpush1.msra.mxu0 %v6759_v46  ;;  %6762 = vst [vmem:[#allocation98_spill] sm:$0xff] %v5439_v25 }
 0x427   : >> { %1224 = vmatprep.subr.mxu0 %v6760_v19 }
 0x428   : >> { %1225 = vmatpush1.msra.mxu0 %v6761_v8 }
 0x429   : >> { %3858 = vmatprep.subr.mxu0 %v6697_v34 }
 0x4c9   : >> { %v1035_v3 = vpop.f32.mrf.mxu0 }
 0x4ca   : >> { %v1039_v14 = vmul.f32 0.00390625, %v1035_v3  ;;  %v5444_v3 = vsub.s32 5, %v6695_v43 }
 0x4cb   : >> { %v3787_v28 = vpop.f32.mrf.mxu0 }
 0x4cc   : >> { %v1040_v40 = vmul.f32 %v1039_v14, %v1039_v14  ;;  %6763 = vst [vmem:[#allocation99_spill] sm:$0xff] %v5444_v3 }
 0x4ce   : >> { %v1042_v9 = vrot.slane %v1040_v40, 7 }
 0x4d0   : >> { %v1044_v39 = vsub.f32 %v1039_v14, %v1042_v9 }
 0x4d2   : >> { %v1045_v31 = vmax.f32 %v1044_v39, 0.0 }
 0x4d4   : >> { %v1046_v5 = vadd.f32 1e-05, %v1045_v31 }
 0x4d6   : >> { %4364 = vrsqrt.f32 %v1046_v5 }
 0x4e3   : >> { %v4365_v10 = vpop.eup %4364 }
 0x4e4   : >> { %v1050_v46 = vmul.f32 %v4365_v10, %v5439_v25 }
 0x4e6   : >> { %v1052_v19 = vrot.slane %v1050_v46, 1  ;;  %v1062_v11 = vrot.slane %v1050_v46, %v5169_v41  ;;  %v6766_v46 = vld [vmem:[#allocation94_spill] sm:$0xff] }
 0x4e8   : >> { %v1054_v37 = vmul.f32 %v1052_v19, %v1039_v14  ;;  %v1063_v40 = vmul.f32 %v1062_v11, %v5396_v49  ;;  %v1064_v5 = vmul.f32 %v1062_v11, %v5394_v12  ;;  %v6767_v14 = vld [vmem:[#allocation93_spill] sm:$0xff] }
 0x4ea   : >> { %v1056_v8 = vrot.slane %v1054_v37, 3 }
 0x4ec   : >> { %v1058_v28 = vsub.f32 %v6693_v51, %v1056_v8 }
 0x4ee   : >> { %v1068_v9 = vrot.slane %v1058_v28, %v5444_v3 }
 0x4f0   : >> { %v5450_v39 = vadd.f32 %v1068_v9, %v1063_v40  ;;  %v5452_v31 = vadd.f32 %v1068_v9, %v1064_v5 }
 0x4f2   : >> { %6764 = vst [vmem:[#allocation100_spill] sm:$0xff] %v5450_v39  ;;  %6765 = vst [vmem:[#allocation101_spill] sm:$0xff] %v5452_v31  ;;  %v1071_v10 = vmul.f32 0.25, %v5450_v39  ;;  %v1072_v37 = vmul.f32 0.25, %v5452_v31 }
 0x4f4   : >> { %v5457_v19 = vadd.f32 %v6766_v46, %v1071_v10  ;;  %v5460_v25 = vadd.f32 %v6767_v14, %v1072_v37 }
 0x4f6   : >> { %v1075_v49 = vadd.f32 %v5460_v25, %v5457_v19  ;;  %v1082_v12 = vmul.f32 %v5457_v19, %v5457_v19  ;;  %v1083_v11 = vmul.f32 %v5460_v25, %v5460_v25 }
 0x4f8   : >> { %v1076_v8 = vrot.slane %v1075_v49, 4  ;;  %v1084_v28 = vadd.f32 %v1083_v11, %v1082_v12  ;;  %v6770_v12 = vld [vmem:[#allocation37_spill] sm:$0xff] }
 0x4f9   : >> { %v6778_v11 = vld [vmem:[#allocation21_spill] sm:$0xff] }
 0x4fa   : >> { %v1077_v40 = vadd.f32 %v1076_v8, %v1075_v49  ;;  %v1085_v5 = vrot.slane %v1084_v28, 4  ;;  %v6769_v49 = vld [vmem:[#allocation38_spill] sm:$0xff] }
 0x4fb   : >> { %v6779_v8 = vld [vmem:[#allocation18_spill] sm:$0xff] }
 0x4fc   : >> { %v1078_v9 = vrot.slane %v1077_v40, 2  ;;  %v1086_v31 = vadd.f32 %v1085_v5, %v1084_v28  ;;  %v6780_v28 = vld [vmem:[#allocation15_spill] sm:$0xff]  ;;  %v6782_v5 = vld [vmem:[#allocation9_spill] sm:$0xff] }
 0x4fe   : >> { %v1079_v10 = vadd.f32 %v1078_v9, %v1077_v40  ;;  %v1087_v39 = vrot.slane %v1086_v31, 2  ;;  %v6781_v40 = vld [vmem:[#allocation12_spill] sm:$0xff]  ;;  %v6783_v9 = vld [vmem:[#allocation87_spill] sm:$0xff] }
 0x500   : >> { %v1080_v46 = vrot.slane %v1079_v10, 1  ;;  %v1088_v37 = vadd.f32 %v1087_v39, %v1086_v31  ;;  %v6771_v39 = vld [vmem:[#allocation35_spill] sm:$0xff]  ;;  %v6775_v31 = vld [vmem:[#allocation30_spill] sm:$0xff] }
 0x502   : >> { %v1089_v14 = vrot.slane %v1088_v37, 1  ;;  %v1081_v3 = vadd.f32 %v1080_v46, %v1079_v10  ;;  %v6776_v46 = vld [vmem:[#allocation27_spill] sm:$0xff] }
 0x504   : >> { %v1090_v17 = vadd.f32 %v1089_v14, %v1088_v37  ;;  %v6777_v14 = vld [vmem:[#allocation24_spill] sm:$0xff] }
 0x506   : >> { %v1091_v18 = vsel %vm386_vm3, %v1081_v3, %v1090_v17  ;;  %v6772_v17 = vld [vmem:[#allocation33_spill] sm:$0xff]  ;;  %v6774_v3 = vld [vmem:[#allocation31_spill] sm:$0xff] }
 0x507   : >> { %3821 = vmatmul.mubr.f32.vlgmr.msra.gmra.mxu1 %v1091_v18  ;;  %v6773_v18 = vld [vmem:[#allocation32_spill] sm:$0xff] }
 0x508   : >> { %3824 = vmatpush3.msra.mxu1 %v4760_v52 }
 0x509   : >> { %3825 = vmatprep.subr.mxu1 %v6768_v20 }
 0x50a   : >> { %3826 = vmatpush3.msra.mxu1 %v6768_v20 }
 0x50b   : >> { %3827 = vmatprep.subr.mxu1 %v6769_v49 }
 0x50c   : >> { %3828 = vmatpush3.msra.mxu1 %v6769_v49 }
 0x50d   : >> { %3829 = vmatprep.subr.mxu1 %v6770_v12 }
 0x50e   : >> { %3830 = vmatpush3.msra.mxu1 %v6770_v12 }
 0x50f   : >> { %3831 = vmatprep.subr.mxu1 %v6771_v39 }
 0x510   : >> { %3832 = vmatpush3.msra.mxu1 %v6771_v39 }
 0x511   : >> { %3833 = vmatprep.subr.mxu1 %v6772_v17 }
 0x512   : >> { %3834 = vmatpush3.msra.mxu1 %v6772_v17 }
 0x513   : >> { %3835 = vmatprep.subr.mxu1 %v6773_v18 }
 0x514   : >> { %3836 = vmatpush3.msra.mxu1 %v6773_v18  ;;  %v6784_v18 = vld [vmem:[#allocation95_spill] sm:$0xff] }
 0x515   : >> { %3837 = vmatprep.subr.mxu1 %v6774_v3 }
 0x516   : >> { %3838 = vmatpush3.msra.mxu1 %v6774_v3 }
 0x517   : >> { %3839 = vmatprep.subr.mxu1 %v6775_v31 }
 0x518   : >> { %3840 = vmatpush3.msra.mxu1 %v6775_v31 }
 0x519   : >> { %3841 = vmatprep.subr.mxu1 %v6776_v46 }
 0x51a   : >> { %3842 = vmatpush3.msra.mxu1 %v6776_v46 }
 0x51b   : >> { %3843 = vmatprep.subr.mxu1 %v6777_v14 }
 0x51c   : >> { %3844 = vmatpush3.msra.mxu1 %v6777_v14 }
 0x51d   : >> { %3845 = vmatprep.subr.mxu1 %v6778_v11 }
 0x51e   : >> { %3846 = vmatpush3.msra.mxu1 %v6778_v11 }
 0x51f   : >> { %3847 = vmatprep.subr.mxu1 %v6779_v8 }
 0x520   : >> { %3848 = vmatpush3.msra.mxu1 %v6779_v8 }
 0x521   : >> { %3849 = vmatprep.subr.mxu1 %v6780_v28 }
 0x522   : >> { %3850 = vmatpush3.msra.mxu1 %v6780_v28 }
 0x523   : >> { %3851 = vmatprep.subr.mxu1 %v6781_v40 }
 0x524   : >> { %3852 = vmatpush3.msra.mxu1 %v6781_v40 }
 0x525   : >> { %3853 = vmatprep.subr.mxu1 %v6782_v5 }
 0x526   : >> { %3854 = vmatpush3.msra.mxu1 %v6782_v5 }
 0x527   : >> { %1481 = vmatprep.subr.mxu1 %v6783_v9 }
 0x5c7   : >> { %v1158_v10 = vpop.f32.mrf.mxu1 }
 0x5c8   : >> { %v1162_v37 = vmul.f32 0.00390625, %v1158_v10  ;;  %v6795_v10 = vld [vmem:[#allocation71_spill] sm:$0xff] }
 0x5c9   : >> { %v3822_v11 = vpop.f32.mrf.mxu1 }
 0x5ca   : >> { %v1163_v14 = vmul.f32 %v1162_v37, %v1162_v37 }
 0x5cc   : >> { %v1165_v46 = vrot.slane %v1163_v14, 7 }
 0x5ce   : >> { %v1167_v8 = vsub.f32 %v1162_v37, %v1165_v46 }
 0x5d0   : >> { %v1168_v31 = vmax.f32 %v1167_v8, 0.0 }
 0x5d2   : >> { %v1169_v3 = vadd.f32 1e-05, %v1168_v31 }
 0x5d4   : >> { %4366 = vrsqrt.f32 %v1169_v3 }
 0x5e1   : >> { %v4367_v28 = vpop.eup %4366 }
 0x5e2   : >> { %v1171_v17 = vmul.f32 %v4367_v28, %v6784_v18  ;;  %v6791_v28 = vld [vmem:[#allocation77_spill] sm:$0xff] }
 0x5e4   : >> { %v1173_v39 = vrot.slane %v1171_v17, 1  ;;  %v1183_v49 = vrot.slane %v1171_v17, %v5169_v41  ;;  %v6790_v17 = vld [vmem:[#allocation78_spill] sm:$0xff] }
 0x5e6   : >> { %v1175_v40 = vmul.f32 %v1173_v39, %v1162_v37  ;;  %v1184_v11 = vmul.f32 %v1183_v49, %v5457_v19  ;;  %v1185_v14 = vmul.f32 %v1183_v49, %v5460_v25  ;;  %v6785_v39 = vld [vmem:[#allocation86_spill] sm:$0xff]  ;;  %v6787_v19 = vld [vmem:[#allocation83_spill] sm:$0xff]  ;;  %v6788_v25 = vld [vmem:[#allocation81_spill] sm:$0xff] }
 0x5e7   : >> { %v6789_v49 = vld [vmem:[#allocation80_spill] sm:$0xff]  ;;  %v6796_v37 = vld [vmem:[#allocation69_spill] sm:$0xff] }
 0x5e8   : >> { %v1177_v12 = vrot.slane %v1175_v40, 7  ;;  %v6792_v40 = vld [vmem:[#allocation75_spill] sm:$0xff] }
 0x5ea   : >> { %v1179_v5 = vsub.f32 %v6693_v51, %v1177_v12  ;;  %v6786_v12 = vld [vmem:[#allocation84_spill] sm:$0xff] }
 0x5ec   : >> { %v1189_v9 = vrot.slane %v1179_v5, %v5169_v41  ;;  %v6793_v5 = vld [vmem:[#allocation74_spill] sm:$0xff] }
 0x5ee   : >> { %v1190_v46 = vadd.f32 %v1189_v9, %v1184_v11  ;;  %v1191_v8 = vadd.f32 %v1189_v9, %v1185_v14  ;;  %v6794_v9 = vld [vmem:[#allocation72_spill] sm:$0xff]  ;;  %v6798_v14 = vld [vmem:[#allocation66_spill] sm:$0xff] }
 0x5ef   : >> { %v6797_v11 = vld [vmem:[#allocation68_spill] sm:$0xff] }
 0x5f0   : >> { %v1192_v31 = vmax.f32 %v1190_v46, 0.0  ;;  %v1193_v3 = vmax.f32 %v1191_v8, 0.0  ;;  %v6799_v46 = vld [vmem:[#allocation65_spill] sm:$0xff]  ;;  %v6800_v8 = vld [vmem:[#allocation63_spill] sm:$0xff] }
 0x5f2   : >> { %1259 = vmatmul.mubr.f32.vlgmr.msra.gmra.mxu0 %v1192_v31  ;;  %3855 = vmatprep.mubr.f32.mxu1 %v1192_v31  ;;  %v6801_v31 = vld [vmem:[#allocation62_spill] sm:$0xff] }
 0x5f3   : >> { %3856 = vmatmul.mubr.f32.vlgmr.msra.gmra.mxu1 %v1193_v3  ;;  %1264 = vmatprep.mubr.f32.mxu0 %v6697_v34 }
 0x5f4   : >> { %3859 = vmatpush3.msra.mxu0 %v6698_v13  ;;  %1482 = vmatpush1.msra.mxu1 %v6785_v39 }
 0x5f5   : >> { %3860 = vmatprep.subr.mxu0 %v6697_v34  ;;  %1483 = vmatprep.subr.mxu1 %v6786_v12 }
 0x5f6   : >> { %1265 = vmatmul.mubr.f32.gmra.mxu0 %v1193_v3  ;;  %1484 = vmatpush1.msra.mxu1 %v6787_v19  ;;  %v6802_v3 = vld [vmem:[#allocation60_spill] sm:$0xff] }
 0x5f7   : >> { %3861 = vmatpush3.msra.mxu0 %v5030_v7  ;;  %3890 = vmatprep.mubr.msk.f32.mxu0 %vm4450_vm2, %v6697_v34 }
 0x5f8   : >> { %3862 = vmatprep.subr.mxu0 %v6697_v34  ;;  %1485 = vmatprep.subr.mxu1 %v6788_v25 }
 0x5f9   : >> { %3863 = vmatpush3.msra.mxu0 %v5028_v60  ;;  %1486 = vmatpush1.msra.mxu1 %v6789_v49 }
 0x5fa   : >> { %3864 = vmatprep.subr.mxu0 %v6697_v34  ;;  %1487 = vmatprep.subr.mxu1 %v6790_v17 }
 0x5fb   : >> { %3865 = vmatpush3.msra.mxu0 %v6652_v1  ;;  %1488 = vmatpush1.msra.mxu1 %v6791_v28 }
 0x5fc   : >> { %3866 = vmatprep.subr.mxu0 %v6697_v34  ;;  %1489 = vmatprep.subr.mxu1 %v6792_v40 }
 0x5fd   : >> { %3867 = vmatpush3.msra.mxu0 %v5024_v59  ;;  %1490 = vmatpush1.msra.mxu1 %v6793_v5 }
 0x5fe   : >> { %3868 = vmatprep.subr.mxu0 %v6697_v34  ;;  %1491 = vmatprep.subr.mxu1 %v6794_v9 }
 0x5ff   : >> { %3869 = vmatpush3.msra.mxu0 %v5022_v58  ;;  %1492 = vmatpush1.msra.mxu1 %v6795_v10 }
 0x600   : >> { %3870 = vmatprep.subr.mxu0 %v6697_v34  ;;  %1493 = vmatprep.subr.mxu1 %v6796_v37  ;;  %v6807_v37 = vld [vmem:[#allocation53_spill] sm:$0xff] }
 0x601   : >> { %3871 = vmatpush3.msra.mxu0 %v5020_v57  ;;  %1494 = vmatpush1.msra.mxu1 %v6797_v11  ;;  %v6803_v11 = vld [vmem:[#allocation59_spill] sm:$0xff] }
 0x602   : >> { %3872 = vmatprep.subr.mxu0 %v6697_v34  ;;  %1495 = vmatprep.subr.mxu1 %v6798_v14  ;;  %v6804_v14 = vld [vmem:[#allocation57_spill] sm:$0xff] }
 0x603   : >> { %3873 = vmatpush3.msra.mxu0 %v5018_v56  ;;  %1496 = vmatpush1.msra.mxu1 %v6799_v46  ;;  %v6805_v46 = vld [vmem:[#allocation56_spill] sm:$0xff] }
 0x604   : >> { %3874 = vmatprep.subr.mxu0 %v6697_v34  ;;  %1497 = vmatprep.subr.mxu1 %v6800_v8  ;;  %v6806_v8 = vld [vmem:[#allocation54_spill] sm:$0xff] }
 0x605   : >> { %3875 = vmatpush3.msra.mxu0 %v5016_v54  ;;  %1498 = vmatpush1.msra.mxu1 %v6801_v31  ;;  %v6813_v31 = vld [vmem:[#allocation44_spill] sm:$0xff] }
 0x606   : >> { %3876 = vmatprep.subr.mxu0 %v6697_v34  ;;  %1499 = vmatprep.subr.mxu1 %v6802_v3  ;;  %v6808_v3 = vld [vmem:[#allocation51_spill] sm:$0xff] }
 0x607   : >> { %3877 = vmatpush3.msra.mxu0 %v5014_v53  ;;  %1500 = vmatpush1.msra.mxu1 %v6803_v11  ;;  %v6809_v11 = vld [vmem:[#allocation50_spill] sm:$0xff] }
 0x608   : >> { %3878 = vmatprep.subr.mxu0 %v6697_v34  ;;  %1501 = vmatprep.subr.mxu1 %v6804_v14  ;;  %v6810_v14 = vld [vmem:[#allocation48_spill] sm:$0xff] }
 0x609   : >> { %3879 = vmatpush3.msra.mxu0 %v5012_v2  ;;  %1502 = vmatpush1.msra.mxu1 %v6805_v46  ;;  %v6811_v46 = vld [vmem:[#allocation47_spill] sm:$0xff] }
 0x60a   : >> { %3880 = vmatprep.subr.mxu0 %v6697_v34  ;;  %1503 = vmatprep.subr.mxu1 %v6806_v8  ;;  %v6812_v8 = vld [vmem:[#allocation45_spill] sm:$0xff] }
 0x60b   : >> { %3881 = vmatpush3.msra.mxu0 %v5010_v61  ;;  %1504 = vmatpush1.msra.mxu1 %v6807_v37 }
 0x60c   : >> { %3882 = vmatprep.subr.mxu0 %v6697_v34  ;;  %1505 = vmatprep.subr.mxu1 %v6808_v3  ;;  %v6814_v3 = vld [vmem:[#allocation42_spill] sm:$0xff] }
 0x60d   : >> { %3883 = vmatpush3.msra.mxu0 %v5008_v55  ;;  %1506 = vmatpush1.msra.mxu1 %v6809_v11  ;;  %v6815_v11 = vld [vmem:[#allocation41_spill] sm:$0xff] }
 0x60e   : >> { %3884 = vmatprep.subr.mxu0 %v6697_v34  ;;  %1507 = vmatprep.subr.mxu1 %v6810_v14 }
 0x60f   : >> { %3885 = vmatpush3.msra.mxu0 %v5006_v63  ;;  %1508 = vmatpush1.msra.mxu1 %v6811_v46 }
 0x610   : >> { %3886 = vmatprep.subr.mxu0 %v6697_v34  ;;  %1509 = vmatprep.subr.mxu1 %v6812_v8 }
 0x611   : >> { %3887 = vmatpush3.msra.mxu0 %v6653_v0  ;;  %1510 = vmatpush1.msra.mxu1 %v6813_v31 }
 0x612   : >> { %3888 = vmatprep.subr.mxu0 %v6697_v34  ;;  %1511 = vmatprep.subr.mxu1 %v6814_v3 }
 0x613   : >> { %3889 = vmatpush3.msra.mxu0 %v5002_v62  ;;  %1512 = vmatpush1.msra.mxu1 %v6815_v11 }
 0x614   : >> { %3893 = vmatprep.subr.mxu0 %v6730_v22  ;;  %1545 = vmatprep.mubr.f32.mxu1 %v6697_v34 }
 0x615   : >> { %3928 = vmatprep.subr.mxu1 %v6697_v34 }
 0x6b2   : >> { %v1260_v46 = vpop.f32.mrf.mxu0 }
 0x6b3   : >> { %v3857_v8 = vpop.f32.mrf.mxu1  ;;  %v1346_v40 = vrot.slane %v1260_v46, 7 }
 0x6b4   : >> { %v1262_v14 = vpop.f32.mrf.mxu0  ;;  %v1353_v9 = vrot.slane %v3857_v8, 1 }
 0x6b5   : >> { %v1337_v10 = vpop.f32.mrf.mxu1 }
 0x6b6   : >> { %v1352_v31 = vrot.slane %v1337_v10, 1  ;;  %v1266_v5 = vpop.f32.mrf.mxu0 }
 0x6b7   : >> { %v1347_v37 = vrot.slane %v1266_v5, 7 }
 0x6b8   : >> { %v1268_v3 = vpop.f32.mrf.mxu0  ;;  %v1355_v28 = vsel %vm654_vm4, %v1353_v9, %v1352_v31  ;;  %v1354_v5 = vsel %vm654_vm4, %v1352_v31, %v1353_v9 }
 0x6b9   : >> { %v1349_v11 = vsel %vm647_vm5, %v1347_v37, %v1346_v40  ;;  %v1348_v17 = vsel %vm647_vm5, %v1346_v40, %v1347_v37  ;;  %v1357_v10 = vsel %vm361_vm1, %v1355_v28, 0.0 }
 0x6ba   : >> { %v1350_v49 = vsel %vm358_vm0, %v1349_v11, 0.0  ;;  %v1359_v25 = vadd.f32 %v1348_v17, %v1268_v3 }
 0x6bb   : >> { %v1358_v19 = vadd.f32 %v1350_v49, %v1262_v14 }
 0x6bc   : >> { %v5587_v46 = vadd.f32 %v1359_v25, %v1357_v10 }
 0x6bd   : >> { %v5589_v8 = vadd.f32 %v1358_v19, %v1354_v5 }
 0x6be   : >> { %v1370_v12 = vmul.f32 %v5587_v46, %v5587_v46 }
 0x6bf   : >> { %v1362_v40 = vadd.f32 %v5587_v46, %v5589_v8  ;;  %v1369_v17 = vmul.f32 %v5589_v8, %v5589_v8 }
 0x6c1   : >> { %v1363_v49 = vrot.slane %v1362_v40, 4  ;;  %v1371_v37 = vadd.f32 %v1370_v12, %v1369_v17  ;;  %v6816_v12 = vld [vmem:[#allocation82_spill] sm:$0xff]  ;;  %v6818_v17 = vld [vmem:[#allocation76_spill] sm:$0xff] }
 0x6c3   : >> { %v1364_v11 = vadd.f32 %v1363_v49, %v1362_v40  ;;  %v1372_v28 = vrot.slane %v1371_v37, 4  ;;  %v6817_v40 = vld [vmem:[#allocation79_spill] sm:$0xff] }
 0x6c4   : >> { %v6821_v49 = vld [vmem:[#allocation67_spill] sm:$0xff] }
 0x6c5   : >> { %v1365_v14 = vrot.slane %v1364_v11, 2  ;;  %v1373_v3 = vadd.f32 %v1372_v28, %v1371_v37  ;;  %v6822_v37 = vld [vmem:[#allocation64_spill] sm:$0xff]  ;;  %v6824_v28 = vld [vmem:[#allocation58_spill] sm:$0xff] }
 0x6c7   : >> { %v1366_v9 = vadd.f32 %v1365_v14, %v1364_v11  ;;  %v1374_v25 = vrot.slane %v1373_v3, 2  ;;  %v6823_v11 = vld [vmem:[#allocation61_spill] sm:$0xff]  ;;  %v6825_v14 = vld [vmem:[#allocation55_spill] sm:$0xff] }
 0x6c9   : >> { %v1367_v31 = vrot.slane %v1366_v9, 1  ;;  %v1375_v19 = vadd.f32 %v1374_v25, %v1373_v3  ;;  %v6826_v3 = vld [vmem:[#allocation52_spill] sm:$0xff]  ;;  %v6828_v25 = vld [vmem:[#allocation49_spill] sm:$0xff] }
 0x6cb   : >> { %v1376_v10 = vrot.slane %v1375_v19, 1  ;;  %v1368_v5 = vadd.f32 %v1367_v31, %v1366_v9  ;;  %v6827_v9 = vmov %v6826_v3  ;;  %v6829_v31 = vld [vmem:[#allocation46_spill] sm:$0xff] }
 0x6cd   : >> { %v1377_v39 = vadd.f32 %v1376_v10, %v1375_v19  ;;  %v6830_v19 = vld [vmem:[#allocation43_spill] sm:$0xff] }
 0x6cf   : >> { %v1378_v18 = vsel %vm386_vm3, %v1368_v5, %v1377_v39  ;;  %v6819_v39 = vld [vmem:[#allocation73_spill] sm:$0xff] }
 0x6d0   : >> { %3891 = vmatmul.mubr.f32.vlgmr.msra.gmra.mxu0 %v1378_v18  ;;  %v6820_v18 = vld [vmem:[#allocation70_spill] sm:$0xff] }
 0x6d1   : >> { %3894 = vmatpush3.msra.mxu0 %v6730_v22 }
 0x6d2   : >> { %3895 = vmatprep.subr.mxu0 %v6732_v15 }
 0x6d3   : >> { %3896 = vmatpush3.msra.mxu0 %v6732_v15 }
 0x6d4   : >> { %3897 = vmatprep.subr.mxu0 %v6816_v12 }
 0x6d5   : >> { %3898 = vmatpush3.msra.mxu0 %v6816_v12  ;;  %v6832_v12 = vld [vmem:[#allocation97_spill] sm:$0xff] }
 0x6d6   : >> { %3899 = vmatprep.subr.mxu0 %v6817_v40 }
 0x6d7   : >> { %3900 = vmatpush3.msra.mxu0 %v6817_v40 }
 0x6d8   : >> { %3901 = vmatprep.subr.mxu0 %v6818_v17 }
 0x6d9   : >> { %3902 = vmatpush3.msra.mxu0 %v6818_v17 }
 0x6da   : >> { %3903 = vmatprep.subr.mxu0 %v6819_v39 }
 0x6db   : >> { %3904 = vmatpush3.msra.mxu0 %v6819_v39 }
 0x6dc   : >> { %3905 = vmatprep.subr.mxu0 %v6820_v18 }
 0x6dd   : >> { %3906 = vmatpush3.msra.mxu0 %v6820_v18 }
 0x6de   : >> { %3907 = vmatprep.subr.mxu0 %v6821_v49 }
 0x6df   : >> { %3908 = vmatpush3.msra.mxu0 %v6821_v49  ;;  %v6831_v49 = vld [vmem:[#allocation96_spill] sm:$0xff] }
 0x6e0   : >> { %3909 = vmatprep.subr.mxu0 %v6822_v37 }
 0x6e1   : >> { %3910 = vmatpush3.msra.mxu0 %v6822_v37 }
 0x6e2   : >> { %3911 = vmatprep.subr.mxu0 %v6823_v11 }
 0x6e3   : >> { %3912 = vmatpush3.msra.mxu0 %v6823_v11 }
 0x6e4   : >> { %3913 = vmatprep.subr.mxu0 %v6824_v28 }
 0x6e5   : >> { %3914 = vmatpush3.msra.mxu0 %v6824_v28 }
 0x6e6   : >> { %3915 = vmatprep.subr.mxu0 %v6825_v14 }
 0x6e7   : >> { %3916 = vmatpush3.msra.mxu0 %v6825_v14 }
 0x6e8   : >> { %3917 = vmatprep.subr.mxu0 %v6826_v3 }
 0x6e9   : >> { %3918 = vmatpush3.msra.mxu0 %v6827_v9 }
 0x6ea   : >> { %3919 = vmatprep.subr.mxu0 %v6828_v25 }
 0x6eb   : >> { %3920 = vmatpush3.msra.mxu0 %v6828_v25 }
 0x6ec   : >> { %3921 = vmatprep.subr.mxu0 %v6829_v31 }
 0x6ed   : >> { %3922 = vmatpush3.msra.mxu0 %v6829_v31 }
 0x6ee   : >> { %3923 = vmatprep.subr.mxu0 %v6830_v19 }
 0x6ef   : >> { %3924 = vmatpush3.msra.mxu0 %v6830_v19 }
 0x6f0   : >> { %3963 = vmatprep.subr.mxu0 %v6697_v34 }
 0x790   : >> { %v1445_v10 = vpop.f32.mrf.mxu0 }
 0x791   : >> { %v1449_v5 = vmul.f32 0.00390625, %v1445_v10 }
 0x792   : >> { %v3892_v14 = vpop.f32.mrf.mxu0 }
 0x793   : >> { %v1450_v3 = vmul.f32 %v1449_v5, %v1449_v5 }
 0x795   : >> { %v1452_v28 = vrot.slane %v1450_v3, 7 }
 0x797   : >> { %v1454_v9 = vsub.f32 %v1449_v5, %v1452_v28 }
 0x799   : >> { %v1455_v11 = vmax.f32 %v1454_v9, 0.0 }
 0x79b   : >> { %v1456_v37 = vadd.f32 1e-05, %v1455_v11 }
 0x79d   : >> { %4368 = vrsqrt.f32 %v1456_v37 }
 0x7aa   : >> { %v4369_v25 = vpop.eup %4368 }
 0x7ab   : >> { %v1458_v18 = vmul.f32 %v4369_v25, %v6831_v49 }
 0x7ad   : >> { %v1460_v39 = vrot.slane %v1458_v18, 1  ;;  %v1470_v40 = vrot.slane %v1458_v18, %v5169_v41 }
 0x7af   : >> { %v1462_v31 = vmul.f32 %v1460_v39, %v1449_v5  ;;  %v1471_v14 = vmul.f32 %v1470_v40, %v5589_v8  ;;  %v1472_v10 = vmul.f32 %v1470_v40, %v5587_v46 }
 0x7b1   : >> { %v1464_v17 = vrot.slane %v1462_v31, 5 }
 0x7b3   : >> { %v1466_v19 = vsub.f32 %v6693_v51, %v1464_v17 }
 0x7b5   : >> { %v1476_v15 = vrot.slane %v1466_v19, %v6832_v12 }
 0x7b7   : >> { %v1477_v28 = vadd.f32 %v1476_v15, %v1471_v14  ;;  %v1478_v9 = vadd.f32 %v1476_v15, %v1472_v10  ;;  %v6833_v15 = vld [vmem:[#allocation40_spill] sm:$0xff] }
 0x7b9   : >> { %v1479_v11 = vmax.f32 %v1477_v28, 0.0  ;;  %v1480_v37 = vmax.f32 %v1478_v9, 0.0 }
 0x7bb   : >> { %1546 = vmatmul.mubr.f32.vlgmr.msra.gmra.mxu1 %v1479_v11  ;;  %3925 = vmatprep.mubr.f32.mxu0 %v1479_v11 }
 0x7bc   : >> { %3926 = vmatmul.mubr.f32.vlgmr.msra.gmra.mxu0 %v1480_v37  ;;  %1551 = vmatprep.mubr.f32.mxu1 %v6697_v34 }
 0x7bd   : >> { %3929 = vmatpush3.msra.mxu1 %v6698_v13  ;;  %3964 = vmatpush3.msra.mxu0 %v6698_v13 }
 0x7be   : >> { %3930 = vmatprep.subr.mxu1 %v6697_v34  ;;  %3965 = vmatprep.subr.mxu0 %v6697_v34 }
 0x7bf   : >> { %1552 = vmatmul.mubr.f32.gmra.mxu1 %v1480_v37  ;;  %3966 = vmatpush3.msra.mxu0 %v5030_v7 }
 0x7c0   : >> { %3931 = vmatpush3.msra.mxu1 %v5030_v7  ;;  %3960 = vmatprep.mubr.msk.f32.mxu1 %vm4450_vm2, %v6697_v34 }
 0x7c1   : >> { %3932 = vmatprep.subr.mxu1 %v6697_v34  ;;  %3967 = vmatprep.subr.mxu0 %v6697_v34 }
 0x7c2   : >> { %3933 = vmatpush3.msra.mxu1 %v5028_v60  ;;  %3968 = vmatpush3.msra.mxu0 %v5028_v60 }
 0x7c3   : >> { %3934 = vmatprep.subr.mxu1 %v6697_v34  ;;  %3969 = vmatprep.subr.mxu0 %v6697_v34 }
 0x7c4   : >> { %3935 = vmatpush3.msra.mxu1 %v6652_v1  ;;  %3970 = vmatpush3.msra.mxu0 %v6652_v1 }
 0x7c5   : >> { %3936 = vmatprep.subr.mxu1 %v6697_v34  ;;  %3971 = vmatprep.subr.mxu0 %v6697_v34 }
 0x7c6   : >> { %3937 = vmatpush3.msra.mxu1 %v5024_v59  ;;  %3972 = vmatpush3.msra.mxu0 %v5024_v59 }
 0x7c7   : >> { %3938 = vmatprep.subr.mxu1 %v6697_v34  ;;  %3973 = vmatprep.subr.mxu0 %v6697_v34 }
 0x7c8   : >> { %3939 = vmatpush3.msra.mxu1 %v5022_v58  ;;  %3974 = vmatpush3.msra.mxu0 %v5022_v58 }
 0x7c9   : >> { %3940 = vmatprep.subr.mxu1 %v6697_v34  ;;  %3975 = vmatprep.subr.mxu0 %v6697_v34 }
 0x7ca   : >> { %3941 = vmatpush3.msra.mxu1 %v5020_v57  ;;  %3976 = vmatpush3.msra.mxu0 %v5020_v57 }
 0x7cb   : >> { %3942 = vmatprep.subr.mxu1 %v6697_v34  ;;  %3977 = vmatprep.subr.mxu0 %v6697_v34 }
 0x7cc   : >> { %3943 = vmatpush3.msra.mxu1 %v5018_v56  ;;  %3978 = vmatpush3.msra.mxu0 %v5018_v56 }
 0x7cd   : >> { %3944 = vmatprep.subr.mxu1 %v6697_v34  ;;  %3979 = vmatprep.subr.mxu0 %v6697_v34 }
 0x7ce   : >> { %3945 = vmatpush3.msra.mxu1 %v5016_v54  ;;  %3980 = vmatpush3.msra.mxu0 %v5016_v54 }
 0x7cf   : >> { %3946 = vmatprep.subr.mxu1 %v6697_v34  ;;  %3981 = vmatprep.subr.mxu0 %v6697_v34 }
 0x7d0   : >> { %3947 = vmatpush3.msra.mxu1 %v5014_v53  ;;  %3982 = vmatpush3.msra.mxu0 %v5014_v53 }
 0x7d1   : >> { %3948 = vmatprep.subr.mxu1 %v6697_v34  ;;  %3983 = vmatprep.subr.mxu0 %v6697_v34 }
 0x7d2   : >> { %3949 = vmatpush3.msra.mxu1 %v5012_v2  ;;  %3984 = vmatpush3.msra.mxu0 %v5012_v2 }
 0x7d3   : >> { %3950 = vmatprep.subr.mxu1 %v6697_v34  ;;  %3985 = vmatprep.subr.mxu0 %v6697_v34 }
 0x7d4   : >> { %3951 = vmatpush3.msra.mxu1 %v5010_v61  ;;  %3986 = vmatpush3.msra.mxu0 %v5010_v61 }
 0x7d5   : >> { %3952 = vmatprep.subr.mxu1 %v6697_v34  ;;  %3987 = vmatprep.subr.mxu0 %v6697_v34 }
 0x7d6   : >> { %3953 = vmatpush3.msra.mxu1 %v5008_v55  ;;  %3988 = vmatpush3.msra.mxu0 %v5008_v55 }
 0x7d7   : >> { %3954 = vmatprep.subr.mxu1 %v6697_v34  ;;  %3989 = vmatprep.subr.mxu0 %v6697_v34 }
 0x7d8   : >> { %3955 = vmatpush3.msra.mxu1 %v5006_v63  ;;  %3990 = vmatpush3.msra.mxu0 %v5006_v63 }
 0x7d9   : >> { %3956 = vmatprep.subr.mxu1 %v6697_v34  ;;  %3991 = vmatprep.subr.mxu0 %v6697_v34 }
 0x7da   : >> { %3957 = vmatpush3.msra.mxu1 %v6653_v0  ;;  %3992 = vmatpush3.msra.mxu0 %v6653_v0 }
 0x7db   : >> { %3958 = vmatprep.subr.mxu1 %v6697_v34  ;;  %3993 = vmatprep.subr.mxu0 %v6697_v34 }
 0x7dc   : >> { %3959 = vmatpush3.msra.mxu1 %v5002_v62  ;;  %3994 = vmatpush3.msra.mxu0 %v5002_v62 }
 0x7dd   : >> { %3995 = vmatprep.mubr.msk.f32.mxu0 %vm4450_vm2, %v6697_v34  ;;  %1889 = vmatprep.subr.mxu1 %v6833_v15 }
 0x7de   : >> { %3998 = vmatprep.subr.mxu0 %v4760_v52 }
 0x87b   : >> { %v1547_v46 = vpop.f32.mrf.mxu1 }
 0x87c   : >> { %v3927_v8 = vpop.f32.mrf.mxu0  ;;  %v1633_v31 = vrot.slane %v1547_v46, 7 }
 0x87d   : >> { %v1549_v40 = vpop.f32.mrf.mxu1  ;;  %v1640_v39 = vrot.slane %v3927_v8, 1 }
 0x87e   : >> { %v1624_v17 = vpop.f32.mrf.mxu0 }
 0x87f   : >> { %v1639_v18 = vrot.slane %v1624_v17, 1  ;;  %v1553_v25 = vpop.f32.mrf.mxu1 }
 0x880   : >> { %v1634_v19 = vrot.slane %v1553_v25, 7 }
 0x881   : >> { %v1555_v5 = vpop.f32.mrf.mxu1  ;;  %v1642_v3 = vsel %vm654_vm4, %v1640_v39, %v1639_v18  ;;  %v1641_v46 = vsel %vm654_vm4, %v1639_v18, %v1640_v39 }
 0x882   : >> { %v1636_v14 = vsel %vm647_vm5, %v1634_v19, %v1633_v31  ;;  %v1635_v10 = vsel %vm647_vm5, %v1633_v31, %v1634_v19  ;;  %v1644_v37 = vsel %vm361_vm1, %v1642_v3, 0.0 }
 0x883   : >> { %v1637_v28 = vsel %vm358_vm0, %v1636_v14, 0.0  ;;  %v1646_v9 = vadd.f32 %v1635_v10, %v1555_v5 }
 0x884   : >> { %v1645_v11 = vadd.f32 %v1637_v28, %v1549_v40 }
 0x885   : >> { %v5717_v8 = vadd.f32 %v1646_v9, %v1644_v37 }
 0x886   : >> { %v5719_v17 = vadd.f32 %v1645_v11, %v1641_v46 }
 0x887   : >> { %v1657_v25 = vmul.f32 %v5717_v8, %v5717_v8 }
 0x888   : >> { %v1649_v31 = vadd.f32 %v5717_v8, %v5719_v17  ;;  %v1656_v19 = vmul.f32 %v5719_v17, %v5719_v17 }
 0x88a   : >> { %v1650_v40 = vrot.slane %v1649_v31, 4  ;;  %v1658_v5 = vadd.f32 %v1657_v25, %v1656_v19  ;;  %v6836_v25 = vld [vmem:[#allocation19_spill] sm:$0xff]  ;;  %v6838_v19 = vld [vmem:[#allocation16_spill] sm:$0xff] }
 0x88c   : >> { %v1651_v14 = vadd.f32 %v1650_v40, %v1649_v31  ;;  %v1659_v3 = vrot.slane %v1658_v5, 4  ;;  %v6837_v31 = vld [vmem:[#allocation17_spill] sm:$0xff]  ;;  %v6839_v40 = vld [vmem:[#allocation14_spill] sm:$0xff] }
 0x88e   : >> { %v1652_v10 = vrot.slane %v1651_v14, 2  ;;  %v1660_v28 = vadd.f32 %v1659_v3, %v1658_v5  ;;  %v6840_v5 = vld [vmem:[#allocation13_spill] sm:$0xff]  ;;  %v6842_v3 = vld [vmem:[#allocation10_spill] sm:$0xff] }
 0x890   : >> { %v1653_v39 = vadd.f32 %v1652_v10, %v1651_v14  ;;  %v1661_v18 = vrot.slane %v1660_v28, 2  ;;  %v6841_v14 = vld [vmem:[#allocation11_spill] sm:$0xff]  ;;  %v6843_v10 = vld [vmem:[#allocation8_spill] sm:$0xff] }
 0x892   : >> { %v1654_v9 = vrot.slane %v1653_v39, 1  ;;  %v1662_v11 = vadd.f32 %v1661_v18, %v1660_v28  ;;  %v6844_v28 = vld [vmem:[#allocation7_spill] sm:$0xff] }
 0x894   : >> { %v1663_v37 = vrot.slane %v1662_v11, 1  ;;  %v1655_v46 = vadd.f32 %v1654_v9, %v1653_v39 }
 0x896   : >> { %v1664_v15 = vadd.f32 %v1663_v37, %v1662_v11 }
 0x898   : >> { %v1665_v12 = vsel %vm386_vm3, %v1655_v46, %v1664_v15  ;;  %v6835_v15 = vld [vmem:[#allocation20_spill] sm:$0xff] }
 0x899   : >> { %3961 = vmatmul.mubr.f32.vlgmr.msra.gmra.mxu1 %v1665_v12  ;;  %v6834_v12 = vld [vmem:[#allocation22_spill] sm:$0xff] }
 0x89a   : >> { %1890 = vmatpush1.msra.mxu1 %v4750_v50  ;;  %1953 = vmatprep.mubr.f32.mxu1 %v6697_v34 }
 0x89b   : >> { %1891 = vmatprep.subr.mxu1 %v4740_v48 }
 0x89c   : >> { %1892 = vmatpush1.msra.mxu1 %v4735_v47 }
 0x89d   : >> { %1893 = vmatprep.subr.mxu1 %v4725_v45 }
 0x89e   : >> { %1894 = vmatpush1.msra.mxu1 %v4720_v44 }
 0x89f   : >> { %1895 = vmatprep.subr.mxu1 %v4710_v42 }
 0x8a0   : >> { %1896 = vmatpush1.msra.mxu1 %v6752_v16 }
 0x8a1   : >> { %1897 = vmatprep.subr.mxu1 %v6753_v4 }
 0x8a2   : >> { %1898 = vmatpush1.msra.mxu1 %v4690_v38 }
 0x8a3   : >> { %1899 = vmatprep.subr.mxu1 %v4680_v36 }
 0x8a4   : >> { %1900 = vmatpush1.msra.mxu1 %v4675_v35 }
 0x8a5   : >> { %1901 = vmatprep.subr.mxu1 %v4665_v33 }
 0x8a6   : >> { %1902 = vmatpush1.msra.mxu1 %v4660_v32 }
 0x8a7   : >> { %1903 = vmatprep.subr.mxu1 %v4650_v30 }
 0x8a8   : >> { %1904 = vmatpush1.msra.mxu1 %v4645_v29 }
 0x8a9   : >> { %1905 = vmatprep.subr.mxu1 %v6654_v27 }
 0x8aa   : >> { %1906 = vmatpush1.msra.mxu1 %v6655_v26 }
 0x8ab   : >> { %1907 = vmatprep.subr.mxu1 %v6656_v24 }
 0x8ac   : >> { %1908 = vmatpush1.msra.mxu1 %v6657_v23 }
 0x8ad   : >> { %1909 = vmatprep.subr.mxu1 %v6658_v21 }
 0x8ae   : >> { %1910 = vmatpush1.msra.mxu1 %v6834_v12 }
 0x8af   : >> { %1911 = vmatprep.subr.mxu1 %v6835_v15 }
 0x8b0   : >> { %1912 = vmatpush1.msra.mxu1 %v6836_v25 }
 0x8b1   : >> { %1913 = vmatprep.subr.mxu1 %v6837_v31  ;;  %v6845_v31 = vld [vmem:[#allocation98_spill] sm:$0xff] }
 0x8b2   : >> { %1914 = vmatpush1.msra.mxu1 %v6838_v19 }
 0x8b3   : >> { %1915 = vmatprep.subr.mxu1 %v6839_v40 }
 0x8b4   : >> { %1916 = vmatpush1.msra.mxu1 %v6840_v5 }
 0x8b5   : >> { %1917 = vmatprep.subr.mxu1 %v6841_v14 }
 0x8b6   : >> { %1918 = vmatpush1.msra.mxu1 %v6842_v3 }
 0x8b7   : >> { %1919 = vmatprep.subr.mxu1 %v6843_v10 }
 0x8b8   : >> { %1920 = vmatpush1.msra.mxu1 %v6844_v28 }
 0x8b9   : >> { %4033 = vmatprep.subr.mxu1 %v6697_v34 }
 0x959   : >> { %v1732_v39 = vpop.f32.mrf.mxu1 }
 0x95a   : >> { %v1736_v18 = vmul.f32 0.00390625, %v1732_v39 }
 0x95b   : >> { %v3962_v9 = vpop.f32.mrf.mxu1 }
 0x95c   : >> { %v1737_v11 = vmul.f32 %v1736_v18, %v1736_v18  ;;  %v6846_v9 = vld [vmem:[#allocation99_spill] sm:$0xff] }
 0x95e   : >> { %v1739_v37 = vrot.slane %v1737_v11, 7 }
 0x960   : >> { %v1741_v46 = vsub.f32 %v1736_v18, %v1739_v37 }
 0x962   : >> { %v1742_v19 = vmax.f32 %v1741_v46, 0.0 }
 0x964   : >> { %v1743_v40 = vadd.f32 1e-05, %v1742_v19 }
 0x966   : >> { %4370 = vrsqrt.f32 %v1743_v40 }
 0x973   : >> { %v4371_v5 = vpop.eup %4370 }
 0x974   : >> { %v1745_v14 = vmul.f32 %v4371_v5, %v6845_v31 }
 0x976   : >> { %v1747_v25 = vrot.slane %v1745_v14, 1  ;;  %v1757_v10 = vrot.slane %v1745_v14, %v5169_v41  ;;  %v6850_v14 = vld [vmem:[#allocation93_spill] sm:$0xff] }
 0x978   : >> { %v1749_v3 = vmul.f32 %v1747_v25, %v1736_v18  ;;  %v1758_v12 = vmul.f32 %v1757_v10, %v5719_v17  ;;  %v1759_v39 = vmul.f32 %v1757_v10, %v5717_v8  ;;  %v6849_v25 = vld [vmem:[#allocation94_spill] sm:$0xff] }
 0x97a   : >> { %v1751_v15 = vrot.slane %v1749_v3, 3 }
 0x97c   : >> { %v1753_v28 = vsub.f32 %v6693_v51, %v1751_v15 }
 0x97e   : >> { %v1763_v11 = vrot.slane %v1753_v28, %v6846_v9 }
 0x980   : >> { %v5767_v37 = vadd.f32 %v1763_v11, %v1758_v12  ;;  %v5769_v19 = vadd.f32 %v1763_v11, %v1759_v39 }
 0x982   : >> { %6847 = vst [vmem:[#allocation96_spill] sm:$0xff] %v5767_v37  ;;  %6848 = vst [vmem:[#allocation102_spill] sm:$0xff] %v5769_v19  ;;  %v1766_v40 = vmul.f32 0.25, %v5767_v37  ;;  %v1767_v5 = vmul.f32 0.25, %v5769_v19 }
 0x984   : >> { %v5774_v3 = vadd.f32 %v6849_v25, %v1766_v40  ;;  %v5777_v18 = vadd.f32 %v6850_v14, %v1767_v5 }
 0x986   : >> { %v1770_v17 = vadd.f32 %v5777_v18, %v5774_v3  ;;  %v1777_v8 = vmul.f32 %v5774_v3, %v5774_v3  ;;  %v1778_v12 = vmul.f32 %v5777_v18, %v5777_v18 }
 0x988   : >> { %v1771_v15 = vrot.slane %v1770_v17, 4  ;;  %v1779_v10 = vadd.f32 %v1778_v12, %v1777_v8  ;;  %v6852_v8 = vld [vmem:[#allocation37_spill] sm:$0xff]  ;;  %v6859_v12 = vld [vmem:[#allocation24_spill] sm:$0xff] }
 0x98a   : >> { %v1772_v28 = vadd.f32 %v1771_v15, %v1770_v17  ;;  %v1780_v46 = vrot.slane %v1779_v10, 4  ;;  %v6851_v17 = vld [vmem:[#allocation38_spill] sm:$0xff]  ;;  %v6860_v15 = vld [vmem:[#allocation21_spill] sm:$0xff] }
 0x98c   : >> { %v1773_v39 = vrot.slane %v1772_v28, 2  ;;  %v1781_v11 = vadd.f32 %v1780_v46, %v1779_v10  ;;  %v6861_v10 = vld [vmem:[#allocation18_spill] sm:$0xff]  ;;  %v6863_v46 = vld [vmem:[#allocation12_spill] sm:$0xff] }
 0x98e   : >> { %v1774_v40 = vadd.f32 %v1773_v39, %v1772_v28  ;;  %v1782_v25 = vrot.slane %v1781_v11, 2  ;;  %v6862_v28 = vld [vmem:[#allocation15_spill] sm:$0xff]  ;;  %v6864_v39 = vld [vmem:[#allocation9_spill] sm:$0xff] }
 0x990   : >> { %v1775_v9 = vrot.slane %v1774_v40, 1  ;;  %v1783_v5 = vadd.f32 %v1782_v25, %v1781_v11  ;;  %v6853_v25 = vld [vmem:[#allocation35_spill] sm:$0xff] }
 0x991   : >> { %v6865_v11 = vld [vmem:[#allocation87_spill] sm:$0xff] }
 0x992   : >> { %v1784_v14 = vrot.slane %v1783_v5, 1  ;;  %v1776_v19 = vadd.f32 %v1775_v9, %v1774_v40  ;;  %v6854_v9 = vld [vmem:[#allocation33_spill] sm:$0xff] }
 0x994   : >> { %v1785_v37 = vadd.f32 %v1784_v14, %v1783_v5  ;;  %v6858_v14 = vld [vmem:[#allocation27_spill] sm:$0xff] }
 0x996   : >> { %v1786_v31 = vsel %vm386_vm3, %v1776_v19, %v1785_v37  ;;  %v6856_v37 = vld [vmem:[#allocation31_spill] sm:$0xff]  ;;  %v6857_v19 = vld [vmem:[#allocation30_spill] sm:$0xff] }
 0x997   : >> { %3996 = vmatmul.mubr.f32.vlgmr.msra.gmra.mxu0 %v1786_v31  ;;  %v6855_v31 = vld [vmem:[#allocation32_spill] sm:$0xff] }
 0x998   : >> { %3999 = vmatpush3.msra.mxu0 %v4760_v52 }
 0x999   : >> { %4000 = vmatprep.subr.mxu0 %v6768_v20 }
 0x99a   : >> { %4001 = vmatpush3.msra.mxu0 %v6768_v20  ;;  %v6898_v20 = vld [vmem:[#allocation85_spill] sm:$0xff] }
 0x99b   : >> { %4002 = vmatprep.subr.mxu0 %v6851_v17 }
 0x99c   : >> { %4003 = vmatpush3.msra.mxu0 %v6851_v17 }
 0x99d   : >> { %4004 = vmatprep.subr.mxu0 %v6852_v8 }
 0x99e   : >> { %4005 = vmatpush3.msra.mxu0 %v6852_v8 }
 0x99f   : >> { %4006 = vmatprep.subr.mxu0 %v6853_v25 }
 0x9a0   : >> { %4007 = vmatpush3.msra.mxu0 %v6853_v25 }
 0x9a1   : >> { %4008 = vmatprep.subr.mxu0 %v6854_v9 }
 0x9a2   : >> { %4009 = vmatpush3.msra.mxu0 %v6854_v9 }
 0x9a3   : >> { %4010 = vmatprep.subr.mxu0 %v6855_v31 }
 0x9a4   : >> { %4011 = vmatpush3.msra.mxu0 %v6855_v31  ;;  %v6866_v31 = vld [vmem:[#allocation95_spill] sm:$0xff] }
 0x9a5   : >> { %4012 = vmatprep.subr.mxu0 %v6856_v37 }
 0x9a6   : >> { %4013 = vmatpush3.msra.mxu0 %v6856_v37 }
 0x9a7   : >> { %4014 = vmatprep.subr.mxu0 %v6857_v19 }
 0x9a8   : >> { %4015 = vmatpush3.msra.mxu0 %v6857_v19 }
 0x9a9   : >> { %4016 = vmatprep.subr.mxu0 %v6858_v14 }
 0x9aa   : >> { %4017 = vmatpush3.msra.mxu0 %v6858_v14 }
 0x9ab   : >> { %4018 = vmatprep.subr.mxu0 %v6859_v12 }
 0x9ac   : >> { %4019 = vmatpush3.msra.mxu0 %v6859_v12 }
 0x9ad   : >> { %4020 = vmatprep.subr.mxu0 %v6860_v15 }
 0x9ae   : >> { %4021 = vmatpush3.msra.mxu0 %v6860_v15 }
 0x9af   : >> { %4022 = vmatprep.subr.mxu0 %v6861_v10 }
 0x9b0   : >> { %4023 = vmatpush3.msra.mxu0 %v6861_v10 }
 0x9b1   : >> { %4024 = vmatprep.subr.mxu0 %v6862_v28 }
 0x9b2   : >> { %4025 = vmatpush3.msra.mxu0 %v6862_v28 }
 0x9b3   : >> { %4026 = vmatprep.subr.mxu0 %v6863_v46 }
 0x9b4   : >> { %4027 = vmatpush3.msra.mxu0 %v6863_v46 }
 0x9b5   : >> { %4028 = vmatprep.subr.mxu0 %v6864_v39 }
 0x9b6   : >> { %4029 = vmatpush3.msra.mxu0 %v6864_v39 }
 0x9b7   : >> { %2176 = vmatprep.subr.mxu0 %v6865_v11 }
 0xa57   : >> { %v1853_v40 = vpop.f32.mrf.mxu0 }
 0xa58   : >> { %v1857_v5 = vmul.f32 0.00390625, %v1853_v40  ;;  %v6876_v40 = vld [vmem:[#allocation72_spill] sm:$0xff] }
 0xa59   : >> { %v3997_v15 = vpop.f32.mrf.mxu0 }
 0xa5a   : >> { %v1858_v12 = vmul.f32 %v1857_v5, %v1857_v5 }
 0xa5c   : >> { %v1860_v14 = vrot.slane %v1858_v12, 7 }
 0xa5e   : >> { %v1862_v10 = vsub.f32 %v1857_v5, %v1860_v14 }
 0xa60   : >> { %v1863_v19 = vmax.f32 %v1862_v10, 0.0 }
 0xa62   : >> { %v1864_v37 = vadd.f32 1e-05, %v1863_v19 }
 0xa64   : >> { %4372 = vrsqrt.f32 %v1864_v37 }
 0xa71   : >> { %v4373_v28 = vpop.eup %4372 }
 0xa72   : >> { %v1866_v9 = vmul.f32 %v4373_v28, %v6866_v31  ;;  %v6872_v28 = vld [vmem:[#allocation78_spill] sm:$0xff] }
 0xa74   : >> { %v1868_v25 = vrot.slane %v1866_v9, 1  ;;  %v1878_v17 = vrot.slane %v1866_v9, %v5169_v41 }
 0xa76   : >> { %v1870_v46 = vmul.f32 %v1868_v25, %v1857_v5  ;;  %v1879_v15 = vmul.f32 %v1878_v17, %v5774_v3  ;;  %v1880_v12 = vmul.f32 %v1878_v17, %v5777_v18  ;;  %v6867_v25 = vld [vmem:[#allocation86_spill] sm:$0xff]  ;;  %v6869_v3 = vld [vmem:[#allocation83_spill] sm:$0xff]  ;;  %v6870_v18 = vld [vmem:[#allocation81_spill] sm:$0xff] }
 0xa77   : >> { %v6871_v17 = vld [vmem:[#allocation80_spill] sm:$0xff]  ;;  %v6877_v5 = vld [vmem:[#allocation71_spill] sm:$0xff] }
 0xa78   : >> { %v1872_v8 = vrot.slane %v1870_v46, 7  ;;  %v6873_v46 = vld [vmem:[#allocation77_spill] sm:$0xff] }
 0xa7a   : >> { %v1874_v39 = vsub.f32 %v6693_v51, %v1872_v8  ;;  %v6868_v8 = vld [vmem:[#allocation84_spill] sm:$0xff] }
 0xa7c   : >> { %v1884_v11 = vrot.slane %v1874_v39, %v5169_v41  ;;  %v6874_v39 = vld [vmem:[#allocation75_spill] sm:$0xff] }
 0xa7e   : >> { %v1885_v14 = vadd.f32 %v1884_v11, %v1879_v15  ;;  %v1886_v10 = vadd.f32 %v1884_v11, %v1880_v12  ;;  %v6875_v11 = vld [vmem:[#allocation74_spill] sm:$0xff]  ;;  %v6878_v15 = vld [vmem:[#allocation69_spill] sm:$0xff]  ;;  %v6879_v12 = vld [vmem:[#allocation68_spill] sm:$0xff] }
 0xa80   : >> { %v1887_v19 = vmax.f32 %v1885_v14, 0.0  ;;  %v1888_v37 = vmax.f32 %v1886_v10, 0.0  ;;  %v6880_v14 = vld [vmem:[#allocation66_spill] sm:$0xff]  ;;  %v6881_v10 = vld [vmem:[#allocation65_spill] sm:$0xff] }
 0xa82   : >> { %1954 = vmatmul.mubr.f32.vlgmr.msra.gmra.mxu1 %v1887_v19  ;;  %4030 = vmatprep.mubr.f32.mxu0 %v1887_v19  ;;  %v6882_v19 = vld [vmem:[#allocation63_spill] sm:$0xff] }
 0xa83   : >> { %4031 = vmatmul.mubr.f32.vlgmr.msra.gmra.mxu0 %v1888_v37  ;;  %1959 = vmatprep.mubr.f32.mxu1 %v6697_v34 }
 0xa84   : >> { %4034 = vmatpush3.msra.mxu1 %v6698_v13  ;;  %2177 = vmatpush1.msra.mxu0 %v6867_v25 }
 0xa85   : >> { %4035 = vmatprep.subr.mxu1 %v6697_v34  ;;  %2178 = vmatprep.subr.mxu0 %v6868_v8 }
 0xa86   : >> { %1960 = vmatmul.mubr.f32.gmra.mxu1 %v1888_v37  ;;  %2179 = vmatpush1.msra.mxu0 %v6869_v3  ;;  %v6883_v37 = vld [vmem:[#allocation62_spill] sm:$0xff]  ;;  %v6884_v3 = vld [vmem:[#allocation60_spill] sm:$0xff] }
 0xa87   : >> { %4036 = vmatpush3.msra.mxu1 %v5030_v7  ;;  %4065 = vmatprep.mubr.msk.f32.mxu1 %vm4450_vm2, %v6697_v34 }
 0xa88   : >> { %4037 = vmatprep.subr.mxu1 %v6697_v34  ;;  %2180 = vmatprep.subr.mxu0 %v6870_v18 }
 0xa89   : >> { %4038 = vmatpush3.msra.mxu1 %v5028_v60  ;;  %2181 = vmatpush1.msra.mxu0 %v6871_v17 }
 0xa8a   : >> { %4039 = vmatprep.subr.mxu1 %v6697_v34  ;;  %2182 = vmatprep.subr.mxu0 %v6872_v28 }
 0xa8b   : >> { %4040 = vmatpush3.msra.mxu1 %v6652_v1  ;;  %2183 = vmatpush1.msra.mxu0 %v6873_v46 }
 0xa8c   : >> { %4041 = vmatprep.subr.mxu1 %v6697_v34  ;;  %2184 = vmatprep.subr.mxu0 %v6874_v39 }
 0xa8d   : >> { %4042 = vmatpush3.msra.mxu1 %v5024_v59  ;;  %2185 = vmatpush1.msra.mxu0 %v6875_v11 }
 0xa8e   : >> { %4043 = vmatprep.subr.mxu1 %v6697_v34  ;;  %2186 = vmatprep.subr.mxu0 %v6876_v40 }
 0xa8f   : >> { %4044 = vmatpush3.msra.mxu1 %v5022_v58  ;;  %2187 = vmatpush1.msra.mxu0 %v6877_v5 }
 0xa90   : >> { %4045 = vmatprep.subr.mxu1 %v6697_v34  ;;  %2188 = vmatprep.subr.mxu0 %v6878_v15  ;;  %v6889_v15 = vld [vmem:[#allocation53_spill] sm:$0xff] }
 0xa91   : >> { %4046 = vmatpush3.msra.mxu1 %v5020_v57  ;;  %2189 = vmatpush1.msra.mxu0 %v6879_v12  ;;  %v6885_v12 = vld [vmem:[#allocation59_spill] sm:$0xff] }
 0xa92   : >> { %4047 = vmatprep.subr.mxu1 %v6697_v34  ;;  %2190 = vmatprep.subr.mxu0 %v6880_v14  ;;  %v6886_v14 = vld [vmem:[#allocation57_spill] sm:$0xff] }
 0xa93   : >> { %4048 = vmatpush3.msra.mxu1 %v5018_v56  ;;  %2191 = vmatpush1.msra.mxu0 %v6881_v10  ;;  %v6887_v10 = vld [vmem:[#allocation56_spill] sm:$0xff] }
 0xa94   : >> { %4049 = vmatprep.subr.mxu1 %v6697_v34  ;;  %2192 = vmatprep.subr.mxu0 %v6882_v19  ;;  %v6888_v19 = vld [vmem:[#allocation54_spill] sm:$0xff] }
 0xa95   : >> { %4050 = vmatpush3.msra.mxu1 %v5016_v54  ;;  %2193 = vmatpush1.msra.mxu0 %v6883_v37  ;;  %v6895_v37 = vld [vmem:[#allocation44_spill] sm:$0xff] }
 0xa96   : >> { %4051 = vmatprep.subr.mxu1 %v6697_v34  ;;  %2194 = vmatprep.subr.mxu0 %v6884_v3  ;;  %v6890_v3 = vld [vmem:[#allocation51_spill] sm:$0xff] }
 0xa97   : >> { %4052 = vmatpush3.msra.mxu1 %v5014_v53  ;;  %2195 = vmatpush1.msra.mxu0 %v6885_v12  ;;  %v6891_v12 = vld [vmem:[#allocation50_spill] sm:$0xff] }
 0xa98   : >> { %4053 = vmatprep.subr.mxu1 %v6697_v34  ;;  %2196 = vmatprep.subr.mxu0 %v6886_v14  ;;  %v6892_v14 = vld [vmem:[#allocation48_spill] sm:$0xff] }
 0xa99   : >> { %4054 = vmatpush3.msra.mxu1 %v5012_v2  ;;  %2197 = vmatpush1.msra.mxu0 %v6887_v10  ;;  %v6893_v10 = vld [vmem:[#allocation47_spill] sm:$0xff] }
 0xa9a   : >> { %4055 = vmatprep.subr.mxu1 %v6697_v34  ;;  %2198 = vmatprep.subr.mxu0 %v6888_v19  ;;  %v6894_v19 = vld [vmem:[#allocation45_spill] sm:$0xff] }
 0xa9b   : >> { %4056 = vmatpush3.msra.mxu1 %v5010_v61  ;;  %2199 = vmatpush1.msra.mxu0 %v6889_v15 }
 0xa9c   : >> { %4057 = vmatprep.subr.mxu1 %v6697_v34  ;;  %2200 = vmatprep.subr.mxu0 %v6890_v3  ;;  %v6896_v3 = vld [vmem:[#allocation42_spill] sm:$0xff] }
 0xa9d   : >> { %4058 = vmatpush3.msra.mxu1 %v5008_v55  ;;  %2201 = vmatpush1.msra.mxu0 %v6891_v12  ;;  %v6897_v12 = vld [vmem:[#allocation41_spill] sm:$0xff] }
 0xa9e   : >> { %4059 = vmatprep.subr.mxu1 %v6697_v34  ;;  %2202 = vmatprep.subr.mxu0 %v6892_v14 }
 0xa9f   : >> { %4060 = vmatpush3.msra.mxu1 %v5006_v63  ;;  %2203 = vmatpush1.msra.mxu0 %v6893_v10 }
 0xaa0   : >> { %4061 = vmatprep.subr.mxu1 %v6697_v34  ;;  %2204 = vmatprep.subr.mxu0 %v6894_v19 }
 0xaa1   : >> { %4062 = vmatpush3.msra.mxu1 %v6653_v0  ;;  %2205 = vmatpush1.msra.mxu0 %v6895_v37 }
 0xaa2   : >> { %4063 = vmatprep.subr.mxu1 %v6697_v34  ;;  %2206 = vmatprep.subr.mxu0 %v6896_v3 }
 0xaa3   : >> { %4064 = vmatpush3.msra.mxu1 %v5002_v62  ;;  %2207 = vmatpush1.msra.mxu0 %v6897_v12 }
 0xaa4   : >> { %4068 = vmatprep.subr.mxu1 %v6730_v22  ;;  %2240 = vmatprep.mubr.f32.mxu0 %v6697_v34 }
 0xaa5   : >> { %4103 = vmatprep.subr.mxu0 %v6697_v34 }
 0xb42   : >> { %v1955_v10 = vpop.f32.mrf.mxu1 }
 0xb43   : >> { %v4032_v19 = vpop.f32.mrf.mxu0  ;;  %v2041_v39 = vrot.slane %v1955_v10, 7 }
 0xb44   : >> { %v1957_v14 = vpop.f32.mrf.mxu1  ;;  %v2048_v40 = vrot.slane %v4032_v19, 1 }
 0xb45   : >> { %v2032_v5 = vpop.f32.mrf.mxu0 }
 0xb46   : >> { %v2047_v37 = vrot.slane %v2032_v5, 1  ;;  %v1961_v11 = vpop.f32.mrf.mxu1 }
 0xb47   : >> { %v2042_v15 = vrot.slane %v1961_v11, 7 }
 0xb48   : >> { %v1963_v3 = vpop.f32.mrf.mxu1  ;;  %v2050_v46 = vsel %vm654_vm4, %v2048_v40, %v2047_v37  ;;  %v2049_v11 = vsel %vm654_vm4, %v2047_v37, %v2048_v40 }
 0xb49   : >> { %v2044_v12 = vsel %vm647_vm5, %v2042_v15, %v2041_v39  ;;  %v2043_v28 = vsel %vm647_vm5, %v2041_v39, %v2042_v15  ;;  %v2052_v5 = vsel %vm361_vm1, %v2050_v46, 0.0 }
 0xb4a   : >> { %v2045_v17 = vsel %vm358_vm0, %v2044_v12, 0.0  ;;  %v2054_v18 = vadd.f32 %v2043_v28, %v1963_v3 }
 0xb4b   : >> { %v2053_v9 = vadd.f32 %v2045_v17, %v1957_v14 }
 0xb4c   : >> { %v5904_v10 = vadd.f32 %v2054_v18, %v2052_v5 }
 0xb4d   : >> { %v5906_v19 = vadd.f32 %v2053_v9, %v2049_v11 }
 0xb4e   : >> { %v2065_v8 = vmul.f32 %v5904_v10, %v5904_v10 }
 0xb4f   : >> { %v2057_v39 = vadd.f32 %v5904_v10, %v5906_v19  ;;  %v2064_v28 = vmul.f32 %v5906_v19, %v5906_v19 }
 0xb51   : >> { %v2058_v17 = vrot.slane %v2057_v39, 4  ;;  %v2066_v15 = vadd.f32 %v2065_v8, %v2064_v28  ;;  %v6899_v8 = vld [vmem:[#allocation82_spill] sm:$0xff]  ;;  %v6901_v28 = vld [vmem:[#allocation76_spill] sm:$0xff] }
 0xb53   : >> { %v2059_v12 = vadd.f32 %v2058_v17, %v2057_v39  ;;  %v2067_v46 = vrot.slane %v2066_v15, 4  ;;  %v6900_v39 = vld [vmem:[#allocation79_spill] sm:$0xff] }
 0xb54   : >> { %v6904_v17 = vld [vmem:[#allocation67_spill] sm:$0xff] }
 0xb55   : >> { %v2060_v14 = vrot.slane %v2059_v12, 2  ;;  %v2068_v3 = vadd.f32 %v2067_v46, %v2066_v15  ;;  %v6905_v15 = vld [vmem:[#allocation64_spill] sm:$0xff]  ;;  %v6907_v46 = vld [vmem:[#allocation58_spill] sm:$0xff] }
 0xb57   : >> { %v2061_v40 = vadd.f32 %v2060_v14, %v2059_v12  ;;  %v2069_v18 = vrot.slane %v2068_v3, 2  ;;  %v6906_v12 = vld [vmem:[#allocation61_spill] sm:$0xff]  ;;  %v6908_v14 = vld [vmem:[#allocation55_spill] sm:$0xff] }
 0xb59   : >> { %v2062_v37 = vrot.slane %v2061_v40, 1  ;;  %v2070_v9 = vadd.f32 %v2069_v18, %v2068_v3  ;;  %v6909_v3 = vld [vmem:[#allocation52_spill] sm:$0xff]  ;;  %v6911_v18 = vld [vmem:[#allocation49_spill] sm:$0xff] }
 0xb5b   : >> { %v2071_v5 = vrot.slane %v2070_v9, 1  ;;  %v2063_v11 = vadd.f32 %v2062_v37, %v2061_v40  ;;  %v6910_v40 = vmov %v6909_v3  ;;  %v6912_v37 = vld [vmem:[#allocation46_spill] sm:$0xff] }
 0xb5d   : >> { %v2072_v25 = vadd.f32 %v2071_v5, %v2070_v9  ;;  %v6913_v9 = vld [vmem:[#allocation43_spill] sm:$0xff] }
 0xb5f   : >> { %v2073_v31 = vsel %vm386_vm3, %v2063_v11, %v2072_v25  ;;  %v6902_v25 = vld [vmem:[#allocation73_spill] sm:$0xff] }
 0xb60   : >> { %4066 = vmatmul.mubr.f32.vlgmr.msra.gmra.mxu1 %v2073_v31  ;;  %v6903_v31 = vld [vmem:[#allocation70_spill] sm:$0xff] }
 0xb61   : >> { %4069 = vmatpush3.msra.mxu1 %v6730_v22 }
 0xb62   : >> { %4070 = vmatprep.subr.mxu1 %v6898_v20 }
 0xb63   : >> { %4071 = vmatpush3.msra.mxu1 %v6898_v20 }
 0xb64   : >> { %4072 = vmatprep.subr.mxu1 %v6899_v8 }
 0xb65   : >> { %4073 = vmatpush3.msra.mxu1 %v6899_v8 }
 0xb66   : >> { %4074 = vmatprep.subr.mxu1 %v6900_v39 }
 0xb67   : >> { %4075 = vmatpush3.msra.mxu1 %v6900_v39  ;;  %v6914_v39 = vld [vmem:[#allocation97_spill] sm:$0xff] }
 0xb68   : >> { %4076 = vmatprep.subr.mxu1 %v6901_v28 }
 0xb69   : >> { %4077 = vmatpush3.msra.mxu1 %v6901_v28 }
 0xb6a   : >> { %4078 = vmatprep.subr.mxu1 %v6902_v25 }
 0xb6b   : >> { %4079 = vmatpush3.msra.mxu1 %v6902_v25 }
 0xb6c   : >> { %4080 = vmatprep.subr.mxu1 %v6903_v31 }
 0xb6d   : >> { %4081 = vmatpush3.msra.mxu1 %v6903_v31 }
 0xb6e   : >> { %4082 = vmatprep.subr.mxu1 %v6904_v17 }
 0xb6f   : >> { %4083 = vmatpush3.msra.mxu1 %v6904_v17 }
 0xb70   : >> { %4084 = vmatprep.subr.mxu1 %v6905_v15 }
 0xb71   : >> { %4085 = vmatpush3.msra.mxu1 %v6905_v15 }
 0xb72   : >> { %4086 = vmatprep.subr.mxu1 %v6906_v12 }
 0xb73   : >> { %4087 = vmatpush3.msra.mxu1 %v6906_v12 }
 0xb74   : >> { %4088 = vmatprep.subr.mxu1 %v6907_v46 }
 0xb75   : >> { %4089 = vmatpush3.msra.mxu1 %v6907_v46 }
 0xb76   : >> { %4090 = vmatprep.subr.mxu1 %v6908_v14 }
 0xb77   : >> { %4091 = vmatpush3.msra.mxu1 %v6908_v14 }
 0xb78   : >> { %4092 = vmatprep.subr.mxu1 %v6909_v3 }
 0xb79   : >> { %4093 = vmatpush3.msra.mxu1 %v6910_v40 }
 0xb7a   : >> { %4094 = vmatprep.subr.mxu1 %v6911_v18 }
 0xb7b   : >> { %4095 = vmatpush3.msra.mxu1 %v6911_v18 }
 0xb7c   : >> { %4096 = vmatprep.subr.mxu1 %v6912_v37 }
 0xb7d   : >> { %4097 = vmatpush3.msra.mxu1 %v6912_v37 }
 0xb7e   : >> { %4098 = vmatprep.subr.mxu1 %v6913_v9 }
 0xb7f   : >> { %4099 = vmatpush3.msra.mxu1 %v6913_v9 }
 0xb80   : >> { %4138 = vmatprep.subr.mxu1 %v6697_v34 }
 0xc20   : >> { %v2140_v5 = vpop.f32.mrf.mxu1 }
 0xc21   : >> { %v2144_v11 = vmul.f32 0.00390625, %v2140_v5 }
 0xc22   : >> { %v4067_v14 = vpop.f32.mrf.mxu1 }
 0xc23   : >> { %v2145_v3 = vmul.f32 %v2144_v11, %v2144_v11 }
 0xc25   : >> { %v2147_v46 = vrot.slane %v2145_v3, 7 }
 0xc27   : >> { %v2149_v40 = vsub.f32 %v2144_v11, %v2147_v46 }
 0xc29   : >> { %v2150_v12 = vmax.f32 %v2149_v40, 0.0 }
 0xc2b   : >> { %v2151_v15 = vadd.f32 1e-05, %v2150_v12 }
 0xc2d   : >> { %4374 = vrsqrt.f32 %v2151_v15 }
 0xc3a   : >> { %v4375_v18 = vpop.eup %4374 }
 0xc3b   : >> { %v2153_v17 = vmul.f32 %v4375_v18, %v6831_v49 }
 0xc3d   : >> { %v2155_v31 = vrot.slane %v2153_v17, 1  ;;  %v2165_v28 = vrot.slane %v2153_v17, %v5169_v41 }
 0xc3f   : >> { %v2157_v37 = vmul.f32 %v2155_v31, %v2144_v11  ;;  %v2166_v14 = vmul.f32 %v2165_v28, %v5906_v19  ;;  %v2167_v5 = vmul.f32 %v2165_v28, %v5904_v10  ;;  %v6915_v10 = vld [vmem:[#allocation40_spill] sm:$0xff] }
 0xc41   : >> { %v2159_v25 = vrot.slane %v2157_v37, 5 }
 0xc43   : >> { %v2161_v9 = vsub.f32 %v6693_v51, %v2159_v25 }
 0xc45   : >> { %v2171_v8 = vrot.slane %v2161_v9, %v6914_v39 }
 0xc47   : >> { %v2172_v46 = vadd.f32 %v2171_v8, %v2166_v14  ;;  %v2173_v40 = vadd.f32 %v2171_v8, %v2167_v5 }
 0xc49   : >> { %v2174_v12 = vmax.f32 %v2172_v46, 0.0  ;;  %v2175_v15 = vmax.f32 %v2173_v40, 0.0 }
 0xc4b   : >> { %2241 = vmatmul.mubr.f32.vlgmr.msra.gmra.mxu0 %v2174_v12  ;;  %4100 = vmatprep.mubr.f32.mxu1 %v2174_v12 }
 0xc4c   : >> { %4101 = vmatmul.mubr.f32.vlgmr.msra.gmra.mxu1 %v2175_v15  ;;  %2246 = vmatprep.mubr.f32.mxu0 %v6697_v34 }
 0xc4d   : >> { %4104 = vmatpush3.msra.mxu0 %v6698_v13  ;;  %4139 = vmatpush3.msra.mxu1 %v6698_v13 }
 0xc4e   : >> { %4105 = vmatprep.subr.mxu0 %v6697_v34  ;;  %4140 = vmatprep.subr.mxu1 %v6697_v34 }
 0xc4f   : >> { %2247 = vmatmul.mubr.f32.gmra.mxu0 %v2175_v15  ;;  %4141 = vmatpush3.msra.mxu1 %v5030_v7 }
 0xc50   : >> { %4106 = vmatpush3.msra.mxu0 %v5030_v7  ;;  %4135 = vmatprep.mubr.msk.f32.mxu0 %vm4450_vm2, %v6697_v34 }
 0xc51   : >> { %4107 = vmatprep.subr.mxu0 %v6697_v34  ;;  %4142 = vmatprep.subr.mxu1 %v6697_v34 }
 0xc52   : >> { %4108 = vmatpush3.msra.mxu0 %v5028_v60  ;;  %4143 = vmatpush3.msra.mxu1 %v5028_v60 }
 0xc53   : >> { %4109 = vmatprep.subr.mxu0 %v6697_v34  ;;  %4144 = vmatprep.subr.mxu1 %v6697_v34 }
 0xc54   : >> { %4110 = vmatpush3.msra.mxu0 %v6652_v1  ;;  %4145 = vmatpush3.msra.mxu1 %v6652_v1 }
 0xc55   : >> { %4111 = vmatprep.subr.mxu0 %v6697_v34  ;;  %4146 = vmatprep.subr.mxu1 %v6697_v34 }
 0xc56   : >> { %4112 = vmatpush3.msra.mxu0 %v5024_v59  ;;  %4147 = vmatpush3.msra.mxu1 %v5024_v59 }
 0xc57   : >> { %4113 = vmatprep.subr.mxu0 %v6697_v34  ;;  %4148 = vmatprep.subr.mxu1 %v6697_v34 }
 0xc58   : >> { %4114 = vmatpush3.msra.mxu0 %v5022_v58  ;;  %4149 = vmatpush3.msra.mxu1 %v5022_v58 }
 0xc59   : >> { %4115 = vmatprep.subr.mxu0 %v6697_v34  ;;  %4150 = vmatprep.subr.mxu1 %v6697_v34 }
 0xc5a   : >> { %4116 = vmatpush3.msra.mxu0 %v5020_v57  ;;  %4151 = vmatpush3.msra.mxu1 %v5020_v57 }
 0xc5b   : >> { %4117 = vmatprep.subr.mxu0 %v6697_v34  ;;  %4152 = vmatprep.subr.mxu1 %v6697_v34 }
 0xc5c   : >> { %4118 = vmatpush3.msra.mxu0 %v5018_v56  ;;  %4153 = vmatpush3.msra.mxu1 %v5018_v56 }
 0xc5d   : >> { %4119 = vmatprep.subr.mxu0 %v6697_v34  ;;  %4154 = vmatprep.subr.mxu1 %v6697_v34 }
 0xc5e   : >> { %4120 = vmatpush3.msra.mxu0 %v5016_v54  ;;  %4155 = vmatpush3.msra.mxu1 %v5016_v54 }
 0xc5f   : >> { %4121 = vmatprep.subr.mxu0 %v6697_v34  ;;  %4156 = vmatprep.subr.mxu1 %v6697_v34 }
 0xc60   : >> { %4122 = vmatpush3.msra.mxu0 %v5014_v53  ;;  %4157 = vmatpush3.msra.mxu1 %v5014_v53 }
 0xc61   : >> { %4123 = vmatprep.subr.mxu0 %v6697_v34  ;;  %4158 = vmatprep.subr.mxu1 %v6697_v34 }
 0xc62   : >> { %4124 = vmatpush3.msra.mxu0 %v5012_v2  ;;  %4159 = vmatpush3.msra.mxu1 %v5012_v2 }
 0xc63   : >> { %4125 = vmatprep.subr.mxu0 %v6697_v34  ;;  %4160 = vmatprep.subr.mxu1 %v6697_v34 }
 0xc64   : >> { %4126 = vmatpush3.msra.mxu0 %v5010_v61  ;;  %4161 = vmatpush3.msra.mxu1 %v5010_v61 }
 0xc65   : >> { %4127 = vmatprep.subr.mxu0 %v6697_v34  ;;  %4162 = vmatprep.subr.mxu1 %v6697_v34 }
 0xc66   : >> { %4128 = vmatpush3.msra.mxu0 %v5008_v55  ;;  %4163 = vmatpush3.msra.mxu1 %v5008_v55 }
 0xc67   : >> { %4129 = vmatprep.subr.mxu0 %v6697_v34  ;;  %4164 = vmatprep.subr.mxu1 %v6697_v34 }
 0xc68   : >> { %4130 = vmatpush3.msra.mxu0 %v5006_v63  ;;  %4165 = vmatpush3.msra.mxu1 %v5006_v63 }
 0xc69   : >> { %4131 = vmatprep.subr.mxu0 %v6697_v34  ;;  %4166 = vmatprep.subr.mxu1 %v6697_v34 }
 0xc6a   : >> { %4132 = vmatpush3.msra.mxu0 %v6653_v0  ;;  %4167 = vmatpush3.msra.mxu1 %v6653_v0 }
 0xc6b   : >> { %4133 = vmatprep.subr.mxu0 %v6697_v34  ;;  %4168 = vmatprep.subr.mxu1 %v6697_v34 }
 0xc6c   : >> { %4134 = vmatpush3.msra.mxu0 %v5002_v62  ;;  %4169 = vmatpush3.msra.mxu1 %v5002_v62 }
 0xc6d   : >> { %4170 = vmatprep.mubr.msk.f32.mxu1 %vm4450_vm2, %v6697_v34  ;;  %2584 = vmatprep.subr.mxu0 %v6915_v10 }
 0xc6e   : >> { %4173 = vmatprep.subr.mxu1 %v4760_v52 }
 0xd0b   : >> { %v2242_v19 = vpop.f32.mrf.mxu0 }
 0xd0c   : >> { %v4102_v8 = vpop.f32.mrf.mxu1  ;;  %v2328_v37 = vrot.slane %v2242_v19, 7 }
 0xd0d   : >> { %v2244_v28 = vpop.f32.mrf.mxu0  ;;  %v2335_v31 = vrot.slane %v4102_v8, 1 }
 0xd0e   : >> { %v2319_v25 = vpop.f32.mrf.mxu1 }
 0xd0f   : >> { %v2334_v17 = vrot.slane %v2319_v25, 1  ;;  %v2248_v18 = vpop.f32.mrf.mxu0 }
 0xd10   : >> { %v2329_v9 = vrot.slane %v2248_v18, 7 }
 0xd11   : >> { %v2250_v11 = vpop.f32.mrf.mxu0  ;;  %v2337_v3 = vsel %vm654_vm4, %v2335_v31, %v2334_v17  ;;  %v2336_v10 = vsel %vm654_vm4, %v2334_v17, %v2335_v31 }
 0xd12   : >> { %v2331_v14 = vsel %vm647_vm5, %v2329_v9, %v2328_v37  ;;  %v2330_v5 = vsel %vm647_vm5, %v2328_v37, %v2329_v9  ;;  %v2339_v15 = vsel %vm361_vm1, %v2337_v3, 0.0 }
 0xd13   : >> { %v2332_v46 = vsel %vm358_vm0, %v2331_v14, 0.0  ;;  %v2341_v40 = vadd.f32 %v2330_v5, %v2250_v11 }
 0xd14   : >> { %v2340_v12 = vadd.f32 %v2332_v46, %v2244_v28 }
 0xd15   : >> { %v6034_v19 = vadd.f32 %v2341_v40, %v2339_v15 }
 0xd16   : >> { %v6036_v8 = vadd.f32 %v2340_v12, %v2336_v10 }
 0xd17   : >> { %v2352_v25 = vmul.f32 %v6034_v19, %v6034_v19 }
 0xd18   : >> { %v2344_v18 = vadd.f32 %v6034_v19, %v6036_v8  ;;  %v2351_v37 = vmul.f32 %v6036_v8, %v6036_v8 }
 0xd1a   : >> { %v2345_v28 = vrot.slane %v2344_v18, 4  ;;  %v2353_v9 = vadd.f32 %v2352_v25, %v2351_v37  ;;  %v6919_v25 = vld [vmem:[#allocation17_spill] sm:$0xff]  ;;  %v6921_v37 = vld [vmem:[#allocation14_spill] sm:$0xff] }
 0xd1c   : >> { %v2346_v11 = vadd.f32 %v2345_v28, %v2344_v18  ;;  %v2354_v3 = vrot.slane %v2353_v9, 4  ;;  %v6920_v18 = vld [vmem:[#allocation16_spill] sm:$0xff]  ;;  %v6922_v28 = vld [vmem:[#allocation13_spill] sm:$0xff] }
 0xd1e   : >> { %v2347_v14 = vrot.slane %v2346_v11, 2  ;;  %v2355_v5 = vadd.f32 %v2354_v3, %v2353_v9  ;;  %v6923_v9 = vld [vmem:[#allocation11_spill] sm:$0xff]  ;;  %v6925_v3 = vld [vmem:[#allocation8_spill] sm:$0xff] }
 0xd20   : >> { %v2348_v31 = vadd.f32 %v2347_v14, %v2346_v11  ;;  %v2356_v17 = vrot.slane %v2355_v5, 2  ;;  %v6924_v11 = vld [vmem:[#allocation10_spill] sm:$0xff]  ;;  %v6926_v14 = vld [vmem:[#allocation7_spill] sm:$0xff] }
 0xd22   : >> { %v2349_v46 = vrot.slane %v2348_v31, 1  ;;  %v2357_v40 = vadd.f32 %v2356_v17, %v2355_v5 }
 0xd24   : >> { %v2358_v12 = vrot.slane %v2357_v40, 1  ;;  %v2350_v15 = vadd.f32 %v2349_v46, %v2348_v31 }
 0xd26   : >> { %v2359_v10 = vadd.f32 %v2358_v12, %v2357_v40 }
 0xd28   : >> { %v2360_v39 = vsel %vm386_vm3, %v2350_v15, %v2359_v10 }
 0xd29   : >> { %4136 = vmatmul.mubr.f32.vlgmr.msra.gmra.mxu0 %v2360_v39  ;;  %v6918_v39 = vld [vmem:[#allocation19_spill] sm:$0xff] }
 0xd2a   : >> { %2585 = vmatpush1.msra.mxu0 %v4750_v50  ;;  %2648 = vmatprep.mubr.f32.mxu0 %v6697_v34 }
 0xd2b   : >> { %2586 = vmatprep.subr.mxu0 %v4740_v48 }
 0xd2c   : >> { %2587 = vmatpush1.msra.mxu0 %v4735_v47 }
 0xd2d   : >> { %2588 = vmatprep.subr.mxu0 %v4725_v45 }
 0xd2e   : >> { %2589 = vmatpush1.msra.mxu0 %v4720_v44 }
 0xd2f   : >> { %2590 = vmatprep.subr.mxu0 %v4710_v42 }
 0xd30   : >> { %2591 = vmatpush1.msra.mxu0 %v6752_v16  ;;  %v6916_v16 = vld [vmem:[#allocation22_spill] sm:$0xff] }
 0xd31   : >> { %2592 = vmatprep.subr.mxu0 %v6753_v4  ;;  %v6917_v4 = vld [vmem:[#allocation20_spill] sm:$0xff] }
 0xd32   : >> { %2593 = vmatpush1.msra.mxu0 %v4690_v38 }
 0xd33   : >> { %2594 = vmatprep.subr.mxu0 %v4680_v36 }
 0xd34   : >> { %2595 = vmatpush1.msra.mxu0 %v4675_v35 }
 0xd35   : >> { %2596 = vmatprep.subr.mxu0 %v4665_v33 }
 0xd36   : >> { %2597 = vmatpush1.msra.mxu0 %v4660_v32 }
 0xd37   : >> { %2598 = vmatprep.subr.mxu0 %v4650_v30 }
 0xd38   : >> { %2599 = vmatpush1.msra.mxu0 %v4645_v29 }
 0xd39   : >> { %2600 = vmatprep.subr.mxu0 %v6654_v27  ;;  %v6935_v27 = vld [vmem:[#allocation39_spill] sm:$0xff] }
 0xd3a   : >> { %2601 = vmatpush1.msra.mxu0 %v6655_v26 }
 0xd3b   : >> { %2602 = vmatprep.subr.mxu0 %v6656_v24  ;;  %v6933_v24 = vld [vmem:[#allocation94_spill] sm:$0xff] }
 0xd3c   : >> { %2603 = vmatpush1.msra.mxu0 %v6657_v23 }
 0xd3d   : >> { %2604 = vmatprep.subr.mxu0 %v6658_v21 }
 0xd3e   : >> { %2605 = vmatpush1.msra.mxu0 %v6916_v16 }
 0xd3f   : >> { %2606 = vmatprep.subr.mxu0 %v6917_v4  ;;  %v6927_v4 = vld [vmem:[#allocation98_spill] sm:$0xff] }
 0xd40   : >> { %2607 = vmatpush1.msra.mxu0 %v6918_v39 }
 0xd41   : >> { %2608 = vmatprep.subr.mxu0 %v6919_v25 }
 0xd42   : >> { %2609 = vmatpush1.msra.mxu0 %v6920_v18 }
 0xd43   : >> { %2610 = vmatprep.subr.mxu0 %v6921_v37 }
 0xd44   : >> { %2611 = vmatpush1.msra.mxu0 %v6922_v28 }
 0xd45   : >> { %2612 = vmatprep.subr.mxu0 %v6923_v9 }
 0xd46   : >> { %2613 = vmatpush1.msra.mxu0 %v6924_v11  ;;  %v6928_v11 = vld [vmem:[#allocation96_spill] sm:$0xff] }
 0xd47   : >> { %2614 = vmatprep.subr.mxu0 %v6925_v3  ;;  %v3156_v3 = vmul.f32 2.0, %v6928_v11 }
 0xd48   : >> { %2615 = vmatpush1.msra.mxu0 %v6926_v14  ;;  %v6929_v14 = vld [vmem:[#allocation102_spill] sm:$0xff] }
 0xd49   : >> { %4208 = vmatprep.subr.mxu0 %v6697_v34 }
 0xde9   : >> { %v2427_v5 = vpop.f32.mrf.mxu0 }
 0xdea   : >> { %v2431_v31 = vmul.f32 0.00390625, %v2427_v5  ;;  %v3157_v5 = vmul.f32 2.0, %v6929_v14  ;;  %v6934_v14 = vld [vmem:[#allocation93_spill] sm:$0xff] }
 0xdeb   : >> { %v4137_v17 = vpop.f32.mrf.mxu0 }
 0xdec   : >> { %v2432_v46 = vmul.f32 %v2431_v31, %v2431_v31 }
 0xdee   : >> { %v2434_v40 = vrot.slane %v2432_v46, 7 }
 0xdf0   : >> { %v2436_v12 = vsub.f32 %v2431_v31, %v2434_v40  ;;  %v6930_v40 = vld [vmem:[#allocation99_spill] sm:$0xff] }
 0xdf2   : >> { %v2437_v15 = vmax.f32 %v2436_v12, 0.0 }
 0xdf4   : >> { %v2438_v10 = vadd.f32 1e-05, %v2437_v15 }
 0xdf6   : >> { %4376 = vrsqrt.f32 %v2438_v10 }
 0xe03   : >> { %v4377_v16 = vpop.eup %4376 }
 0xe04   : >> { %v2440_v39 = vmul.f32 %v4377_v16, %v6927_v4  ;;  %v6931_v16 = vld [vmem:[#allocation100_spill] sm:$0xff] }
 0xe05   : >> { %v3158_v21 = vadd.f32 %v3156_v3, %v6931_v16 }
 0xe06   : >> { %v2442_v25 = vrot.slane %v2440_v39, 1  ;;  %v2452_v28 = vrot.slane %v2440_v39, %v5169_v41 }
 0xe08   : >> { %v2444_v18 = vmul.f32 %v2442_v25, %v2431_v31  ;;  %v2453_v17 = vmul.f32 %v2452_v28, %v6036_v8  ;;  %v2454_v46 = vmul.f32 %v2452_v28, %v6034_v19  ;;  %v6932_v31 = vld [vmem:[#allocation101_spill] sm:$0xff] }
 0xe09   : >> { %v3159_v25 = vadd.f32 %v3157_v5, %v6932_v31 }
 0xe0a   : >> { %v2446_v37 = vrot.slane %v2444_v18, 3 }
 0xe0c   : >> { %v2448_v9 = vsub.f32 %v6693_v51, %v2446_v37 }
 0xe0e   : >> { %v2458_v12 = vrot.slane %v2448_v9, %v6930_v40 }
 0xe10   : >> { %v2459_v15 = vadd.f32 %v2458_v12, %v2453_v17  ;;  %v2460_v10 = vadd.f32 %v2458_v12, %v2454_v46 }
 0xe12   : >> { %v2461_v18 = vmul.f32 0.5, %v2459_v15  ;;  %v2462_v39 = vmul.f32 0.5, %v2460_v10  ;;  %v3160_v23 = vmul.f32 2.0, %v2459_v15  ;;  %v3161_v37 = vmul.f32 2.0, %v2460_v10 }
 0xe14   : >> { %v6089_v11 = vadd.f32 %v6933_v24, %v2461_v18  ;;  %v6092_v26 = vadd.f32 %v6934_v14, %v2462_v39  ;;  %v6094_v8 = vadd.f32 %v3160_v23, %v3158_v21  ;;  %v6096_v19 = vadd.f32 %v3161_v37, %v3159_v25 }
 0xe16   : >> { %v2465_v28 = vadd.f32 %v6092_v26, %v6089_v11  ;;  %v2472_v9 = vmul.f32 %v6089_v11, %v6089_v11  ;;  %v2473_v3 = vmul.f32 %v6092_v26, %v6092_v26 }
 0xe18   : >> { %v2466_v5 = vrot.slane %v2465_v28, 4  ;;  %v2474_v17 = vadd.f32 %v2473_v3, %v2472_v9  ;;  %v6937_v9 = vld [vmem:[#allocation37_spill] sm:$0xff]  ;;  %v6938_v3 = vld [vmem:[#allocation35_spill] sm:$0xff] }
 0xe1a   : >> { %v2467_v46 = vadd.f32 %v2466_v5, %v2465_v28  ;;  %v2475_v12 = vrot.slane %v2474_v17, 4  ;;  %v6936_v28 = vld [vmem:[#allocation38_spill] sm:$0xff]  ;;  %v6939_v5 = vld [vmem:[#allocation33_spill] sm:$0xff] }
 0xe1c   : >> { %v2468_v15 = vrot.slane %v2467_v46, 2  ;;  %v2476_v10 = vadd.f32 %v2475_v12, %v2474_v17  ;;  %v6940_v17 = vld [vmem:[#allocation32_spill] sm:$0xff]  ;;  %v6943_v12 = vld [vmem:[#allocation27_spill] sm:$0xff] }
 0xe1e   : >> { %v2469_v16 = vadd.f32 %v2468_v15, %v2467_v46  ;;  %v2477_v21 = vrot.slane %v2476_v10, 2  ;;  %v6942_v46 = vld [vmem:[#allocation30_spill] sm:$0xff]  ;;  %v6944_v15 = vld [vmem:[#allocation24_spill] sm:$0xff] }
 0xe20   : >> { %v2470_v23 = vrot.slane %v2469_v16, 1  ;;  %v2478_v31 = vadd.f32 %v2477_v21, %v2476_v10  ;;  %v6945_v10 = vld [vmem:[#allocation21_spill] sm:$0xff]  ;;  %v6947_v21 = vld [vmem:[#allocation15_spill] sm:$0xff] }
 0xe22   : >> { %v2479_v25 = vrot.slane %v2478_v31, 1  ;;  %v2471_v18 = vadd.f32 %v2470_v23, %v2469_v16  ;;  %v6946_v16 = vld [vmem:[#allocation18_spill] sm:$0xff]  ;;  %v6948_v23 = vld [vmem:[#allocation12_spill] sm:$0xff] }
 0xe24   : >> { %v2480_v39 = vadd.f32 %v2479_v25, %v2478_v31  ;;  %v6949_v31 = vld [vmem:[#allocation9_spill] sm:$0xff]  ;;  %v6950_v25 = vld [vmem:[#allocation87_spill] sm:$0xff] }
 0xe26   : >> { %v2481_v37 = vsel %vm386_vm3, %v2471_v18, %v2480_v39 }
 0xe27   : >> { %4171 = vmatmul.mubr.f32.vlgmr.msra.gmra.mxu1 %v2481_v37 }
 0xe28   : >> { %4174 = vmatpush3.msra.mxu1 %v4760_v52 }
 0xe29   : >> { %4175 = vmatprep.subr.mxu1 %v6935_v27 }
 0xe2a   : >> { %4176 = vmatpush3.msra.mxu1 %v6935_v27  ;;  %v6941_v27 = vld [vmem:[#allocation31_spill] sm:$0xff] }
 0xe2b   : >> { %4177 = vmatprep.subr.mxu1 %v6936_v28 }
 0xe2c   : >> { %4178 = vmatpush3.msra.mxu1 %v6936_v28 }
 0xe2d   : >> { %4179 = vmatprep.subr.mxu1 %v6937_v9 }
 0xe2e   : >> { %4180 = vmatpush3.msra.mxu1 %v6937_v9 }
 0xe2f   : >> { %4181 = vmatprep.subr.mxu1 %v6938_v3 }
 0xe30   : >> { %4182 = vmatpush3.msra.mxu1 %v6938_v3 }
 0xe31   : >> { %4183 = vmatprep.subr.mxu1 %v6939_v5 }
 0xe32   : >> { %4184 = vmatpush3.msra.mxu1 %v6939_v5 }
 0xe33   : >> { %4185 = vmatprep.subr.mxu1 %v6940_v17 }
 0xe34   : >> { %4186 = vmatpush3.msra.mxu1 %v6940_v17 }
 0xe35   : >> { %4187 = vmatprep.subr.mxu1 %v6941_v27 }
 0xe36   : >> { %4188 = vmatpush3.msra.mxu1 %v6941_v27 }
 0xe37   : >> { %4189 = vmatprep.subr.mxu1 %v6942_v46 }
 0xe38   : >> { %4190 = vmatpush3.msra.mxu1 %v6942_v46  ;;  %v6951_v46 = vld [vmem:[#allocation95_spill] sm:$0xff] }
 0xe39   : >> { %4191 = vmatprep.subr.mxu1 %v6943_v12 }
 0xe3a   : >> { %4192 = vmatpush3.msra.mxu1 %v6943_v12 }
 0xe3b   : >> { %4193 = vmatprep.subr.mxu1 %v6944_v15 }
 0xe3c   : >> { %4194 = vmatpush3.msra.mxu1 %v6944_v15 }
 0xe3d   : >> { %4195 = vmatprep.subr.mxu1 %v6945_v10 }
 0xe3e   : >> { %4196 = vmatpush3.msra.mxu1 %v6945_v10 }
 0xe3f   : >> { %4197 = vmatprep.subr.mxu1 %v6946_v16 }
 0xe40   : >> { %4198 = vmatpush3.msra.mxu1 %v6946_v16 }
 0xe41   : >> { %4199 = vmatprep.subr.mxu1 %v6947_v21 }
 0xe42   : >> { %4200 = vmatpush3.msra.mxu1 %v6947_v21 }
 0xe43   : >> { %4201 = vmatprep.subr.mxu1 %v6948_v23 }
 0xe44   : >> { %4202 = vmatpush3.msra.mxu1 %v6948_v23 }
 0xe45   : >> { %4203 = vmatprep.subr.mxu1 %v6949_v31 }
 0xe46   : >> { %4204 = vmatpush3.msra.mxu1 %v6949_v31 }
 0xe47   : >> { %2871 = vmatprep.subr.mxu1 %v6950_v25 }
 0xee7   : >> { %v2548_v18 = vpop.f32.mrf.mxu1 }
 0xee8   : >> { %v2552_v39 = vmul.f32 0.00390625, %v2548_v18 }
 0xee9   : >> { %v4172_v37 = vpop.f32.mrf.mxu1 }
 0xeea   : >> { %v2553_v28 = vmul.f32 %v2552_v39, %v2552_v39 }
 0xeec   : >> { %v2555_v9 = vrot.slane %v2553_v28, 7 }
 0xeee   : >> { %v2557_v3 = vsub.f32 %v2552_v39, %v2555_v9 }
 0xef0   : >> { %v2558_v5 = vmax.f32 %v2557_v3, 0.0 }
 0xef2   : >> { %v2559_v17 = vadd.f32 1e-05, %v2558_v5 }
 0xef4   : >> { %4378 = vrsqrt.f32 %v2559_v17  ;;  %v6960_v17 = vld [vmem:[#allocation74_spill] sm:$0xff] }
 0xf01   : >> { %v4379_v27 = vpop.eup %4378 }
 0xf02   : >> { %v2561_v12 = vmul.f32 %v4379_v27, %v6951_v46  ;;  %v6961_v27 = vld [vmem:[#allocation72_spill] sm:$0xff]  ;;  %v6962_v46 = vld [vmem:[#allocation71_spill] sm:$0xff] }
 0xf04   : >> { %v2563_v10 = vrot.slane %v2561_v12, 1  ;;  %v2573_v21 = vrot.slane %v2561_v12, %v5169_v41  ;;  %v6963_v12 = vld [vmem:[#allocation69_spill] sm:$0xff] }
 0xf06   : >> { %v2565_v15 = vmul.f32 %v2563_v10, %v2552_v39  ;;  %v2574_v18 = vmul.f32 %v2573_v21, %v6089_v11  ;;  %v2575_v37 = vmul.f32 %v2573_v21, %v6092_v26  ;;  %v6953_v10 = vld [vmem:[#allocation84_spill] sm:$0xff]  ;;  %v6954_v11 = vld [vmem:[#allocation83_spill] sm:$0xff]  ;;  %v6955_v26 = vld [vmem:[#allocation81_spill] sm:$0xff] }
 0xf07   : >> { %v6957_v21 = vld [vmem:[#allocation78_spill] sm:$0xff]  ;;  %v6959_v39 = vld [vmem:[#allocation75_spill] sm:$0xff] }
 0xf08   : >> { %v2567_v16 = vrot.slane %v2565_v15, 7  ;;  %v6952_v15 = vld [vmem:[#allocation86_spill] sm:$0xff] }
 0xf0a   : >> { %v2569_v23 = vsub.f32 %v6693_v51, %v2567_v16  ;;  %v6956_v16 = vld [vmem:[#allocation80_spill] sm:$0xff] }
 0xf0c   : >> { %v2579_v25 = vrot.slane %v2569_v23, %v5169_v41  ;;  %v6958_v23 = vld [vmem:[#allocation77_spill] sm:$0xff] }
 0xf0e   : >> { %v2580_v28 = vadd.f32 %v2579_v25, %v2574_v18  ;;  %v2581_v9 = vadd.f32 %v2579_v25, %v2575_v37  ;;  %v6964_v25 = vld [vmem:[#allocation68_spill] sm:$0xff]  ;;  %v6965_v18 = vld [vmem:[#allocation66_spill] sm:$0xff]  ;;  %v6966_v37 = vld [vmem:[#allocation65_spill] sm:$0xff] }
 0xf10   : >> { %v2582_v3 = vmax.f32 %v2580_v28, 0.0  ;;  %v2583_v5 = vmax.f32 %v2581_v9, 0.0  ;;  %v6967_v28 = vld [vmem:[#allocation63_spill] sm:$0xff]  ;;  %v6968_v9 = vld [vmem:[#allocation62_spill] sm:$0xff] }
 0xf12   : >> { %2649 = vmatmul.mubr.f32.vlgmr.msra.gmra.mxu0 %v2582_v3  ;;  %4205 = vmatprep.mubr.f32.mxu1 %v2582_v3  ;;  %v6969_v3 = vld [vmem:[#allocation60_spill] sm:$0xff] }
 0xf13   : >> { %4206 = vmatmul.mubr.f32.vlgmr.msra.gmra.mxu1 %v2583_v5  ;;  %2654 = vmatprep.mubr.f32.mxu0 %v6697_v34 }
 0xf14   : >> { %4209 = vmatpush3.msra.mxu0 %v6698_v13  ;;  %2872 = vmatpush1.msra.mxu1 %v6952_v15  ;;  %v6971_v15 = vld [vmem:[#allocation57_spill] sm:$0xff] }
 0xf15   : >> { %4210 = vmatprep.subr.mxu0 %v6697_v34  ;;  %2873 = vmatprep.subr.mxu1 %v6953_v10  ;;  %v6972_v10 = vld [vmem:[#allocation56_spill] sm:$0xff] }
 0xf16   : >> { %2655 = vmatmul.mubr.f32.gmra.mxu0 %v2583_v5  ;;  %2874 = vmatpush1.msra.mxu1 %v6954_v11  ;;  %v6970_v5 = vld [vmem:[#allocation59_spill] sm:$0xff]  ;;  %v6973_v11 = vld [vmem:[#allocation54_spill] sm:$0xff] }
 0xf17   : >> { %4211 = vmatpush3.msra.mxu0 %v5030_v7  ;;  %4240 = vmatprep.mubr.msk.f32.mxu0 %vm4450_vm2, %v6697_v34 }
 0xf18   : >> { %4212 = vmatprep.subr.mxu0 %v6697_v34  ;;  %2875 = vmatprep.subr.mxu1 %v6955_v26  ;;  %v6974_v26 = vld [vmem:[#allocation53_spill] sm:$0xff] }
 0xf19   : >> { %4213 = vmatpush3.msra.mxu0 %v5028_v60  ;;  %2876 = vmatpush1.msra.mxu1 %v6956_v16  ;;  %v6975_v16 = vld [vmem:[#allocation51_spill] sm:$0xff] }
 0xf1a   : >> { %4214 = vmatprep.subr.mxu0 %v6697_v34  ;;  %2877 = vmatprep.subr.mxu1 %v6957_v21  ;;  %v6976_v21 = vld [vmem:[#allocation50_spill] sm:$0xff] }
 0xf1b   : >> { %4215 = vmatpush3.msra.mxu0 %v6652_v1  ;;  %2878 = vmatpush1.msra.mxu1 %v6958_v23  ;;  %v6977_v23 = vld [vmem:[#allocation48_spill] sm:$0xff] }
 0xf1c   : >> { %4216 = vmatprep.subr.mxu0 %v6697_v34  ;;  %2879 = vmatprep.subr.mxu1 %v6959_v39  ;;  %v6978_v39 = vld [vmem:[#allocation47_spill] sm:$0xff] }
 0xf1d   : >> { %4217 = vmatpush3.msra.mxu0 %v5024_v59  ;;  %2880 = vmatpush1.msra.mxu1 %v6960_v17  ;;  %v6979_v17 = vld [vmem:[#allocation45_spill] sm:$0xff] }
 0xf1e   : >> { %4218 = vmatprep.subr.mxu0 %v6697_v34  ;;  %2881 = vmatprep.subr.mxu1 %v6961_v27  ;;  %v6980_v27 = vld [vmem:[#allocation44_spill] sm:$0xff] }
 0xf1f   : >> { %4219 = vmatpush3.msra.mxu0 %v5022_v58  ;;  %2882 = vmatpush1.msra.mxu1 %v6962_v46  ;;  %v6981_v46 = vld [vmem:[#allocation42_spill] sm:$0xff] }
 0xf20   : >> { %4220 = vmatprep.subr.mxu0 %v6697_v34  ;;  %2883 = vmatprep.subr.mxu1 %v6963_v12  ;;  %v6982_v12 = vld [vmem:[#allocation41_spill] sm:$0xff] }
 0xf21   : >> { %4221 = vmatpush3.msra.mxu0 %v5020_v57  ;;  %2884 = vmatpush1.msra.mxu1 %v6964_v25 }
 0xf22   : >> { %4222 = vmatprep.subr.mxu0 %v6697_v34  ;;  %2885 = vmatprep.subr.mxu1 %v6965_v18 }
 0xf23   : >> { %4223 = vmatpush3.msra.mxu0 %v5018_v56  ;;  %2886 = vmatpush1.msra.mxu1 %v6966_v37 }
 0xf24   : >> { %4224 = vmatprep.subr.mxu0 %v6697_v34  ;;  %2887 = vmatprep.subr.mxu1 %v6967_v28 }
 0xf25   : >> { %4225 = vmatpush3.msra.mxu0 %v5016_v54  ;;  %2888 = vmatpush1.msra.mxu1 %v6968_v9 }
 0xf26   : >> { %4226 = vmatprep.subr.mxu0 %v6697_v34  ;;  %2889 = vmatprep.subr.mxu1 %v6969_v3 }
 0xf27   : >> { %4227 = vmatpush3.msra.mxu0 %v5014_v53  ;;  %2890 = vmatpush1.msra.mxu1 %v6970_v5 }
 0xf28   : >> { %4228 = vmatprep.subr.mxu0 %v6697_v34  ;;  %2891 = vmatprep.subr.mxu1 %v6971_v15 }
 0xf29   : >> { %4229 = vmatpush3.msra.mxu0 %v5012_v2  ;;  %2892 = vmatpush1.msra.mxu1 %v6972_v10 }
 0xf2a   : >> { %4230 = vmatprep.subr.mxu0 %v6697_v34  ;;  %2893 = vmatprep.subr.mxu1 %v6973_v11 }
 0xf2b   : >> { %4231 = vmatpush3.msra.mxu0 %v5010_v61  ;;  %2894 = vmatpush1.msra.mxu1 %v6974_v26 }
 0xf2c   : >> { %4232 = vmatprep.subr.mxu0 %v6697_v34  ;;  %2895 = vmatprep.subr.mxu1 %v6975_v16 }
 0xf2d   : >> { %4233 = vmatpush3.msra.mxu0 %v5008_v55  ;;  %2896 = vmatpush1.msra.mxu1 %v6976_v21 }
 0xf2e   : >> { %4234 = vmatprep.subr.mxu0 %v6697_v34  ;;  %2897 = vmatprep.subr.mxu1 %v6977_v23 }
 0xf2f   : >> { %4235 = vmatpush3.msra.mxu0 %v5006_v63  ;;  %2898 = vmatpush1.msra.mxu1 %v6978_v39 }
 0xf30   : >> { %4236 = vmatprep.subr.mxu0 %v6697_v34  ;;  %2899 = vmatprep.subr.mxu1 %v6979_v17 }
 0xf31   : >> { %4237 = vmatpush3.msra.mxu0 %v6653_v0  ;;  %2900 = vmatpush1.msra.mxu1 %v6980_v27 }
 0xf32   : >> { %4238 = vmatprep.subr.mxu0 %v6697_v34  ;;  %2901 = vmatprep.subr.mxu1 %v6981_v46 }
 0xf33   : >> { %4239 = vmatpush3.msra.mxu0 %v5002_v62  ;;  %2902 = vmatpush1.msra.mxu1 %v6982_v12 }
 0xf34   : >> { %4243 = vmatprep.subr.mxu0 %v6730_v22  ;;  %2935 = vmatprep.mubr.f32.mxu1 %v6697_v34 }
 0xf35   : >> { %4278 = vmatprep.subr.mxu1 %v6697_v34 }
 0xfd2   : >> { %v2650_v25 = vpop.f32.mrf.mxu0 }
 0xfd3   : >> { %v4207_v18 = vpop.f32.mrf.mxu1  ;;  %v2736_v15 = vrot.slane %v2650_v25, 7 }
 0xfd4   : >> { %v2652_v37 = vpop.f32.mrf.mxu0  ;;  %v2743_v9 = vrot.slane %v4207_v18, 1 }
 0xfd5   : >> { %v2727_v28 = vpop.f32.mrf.mxu1 }
 0xfd6   : >> { %v2742_v3 = vrot.slane %v2727_v28, 1  ;;  %v2656_v5 = vpop.f32.mrf.mxu0 }
 0xfd7   : >> { %v2737_v10 = vrot.slane %v2656_v5, 7 }
 0xfd8   : >> { %v2658_v11 = vpop.f32.mrf.mxu0  ;;  %v2745_v26 = vsel %vm654_vm4, %v2743_v9, %v2742_v3  ;;  %v2744_v46 = vsel %vm654_vm4, %v2742_v3, %v2743_v9 }
 0xfd9   : >> { %v2739_v16 = vsel %vm647_vm5, %v2737_v10, %v2736_v15  ;;  %v2738_v21 = vsel %vm647_vm5, %v2736_v15, %v2737_v10  ;;  %v2747_v27 = vsel %vm361_vm1, %v2745_v26, 0.0 }
 0xfda   : >> { %v2740_v23 = vsel %vm358_vm0, %v2739_v16, 0.0  ;;  %v2749_v39 = vadd.f32 %v2738_v21, %v2658_v11 }
 0xfdb   : >> { %v2748_v17 = vadd.f32 %v2740_v23, %v2652_v37 }
 0xfdc   : >> { %v6223_v12 = vadd.f32 %v2749_v39, %v2747_v27 }
 0xfdd   : >> { %v6225_v25 = vadd.f32 %v2748_v17, %v2744_v46 }
 0xfde   : >> { %v2760_v18 = vmul.f32 %v6223_v12, %v6223_v12 }
 0xfdf   : >> { %v2752_v28 = vadd.f32 %v6223_v12, %v6225_v25  ;;  %v2759_v5 = vmul.f32 %v6225_v25, %v6225_v25 }
 0xfe1   : >> { %v2753_v37 = vrot.slane %v2752_v28, 4  ;;  %v2761_v15 = vadd.f32 %v2760_v18, %v2759_v5  ;;  %v6983_v18 = vld [vmem:[#allocation82_spill] sm:$0xff]  ;;  %v6985_v5 = vld [vmem:[#allocation76_spill] sm:$0xff] }
 0xfe3   : >> { %v2754_v10 = vadd.f32 %v2753_v37, %v2752_v28  ;;  %v2762_v11 = vrot.slane %v2761_v15, 4  ;;  %v6984_v28 = vld [vmem:[#allocation79_spill] sm:$0xff]  ;;  %v6986_v37 = vld [vmem:[#allocation73_spill] sm:$0xff] }
 0xfe5   : >> { %v2755_v26 = vrot.slane %v2754_v10, 2  ;;  %v2763_v16 = vadd.f32 %v2762_v11, %v2761_v15  ;;  %v6987_v15 = vld [vmem:[#allocation70_spill] sm:$0xff]  ;;  %v6989_v11 = vld [vmem:[#allocation64_spill] sm:$0xff] }
 0xfe7   : >> { %v2756_v9 = vadd.f32 %v2755_v26, %v2754_v10  ;;  %v2764_v3 = vrot.slane %v2763_v16, 2  ;;  %v6988_v10 = vld [vmem:[#allocation67_spill] sm:$0xff]  ;;  %v6990_v26 = vld [vmem:[#allocation61_spill] sm:$0xff] }
 0xfe9   : >> { %v2757_v21 = vrot.slane %v2756_v9, 1  ;;  %v2765_v23 = vadd.f32 %v2764_v3, %v2763_v16  ;;  %v6991_v16 = vld [vmem:[#allocation58_spill] sm:$0xff]  ;;  %v6993_v3 = vld [vmem:[#allocation52_spill] sm:$0xff] }
 0xfeb   : >> { %v2766_v39 = vrot.slane %v2765_v23, 1  ;;  %v2758_v17 = vadd.f32 %v2757_v21, %v2756_v9  ;;  %v6992_v9 = vld [vmem:[#allocation55_spill] sm:$0xff]  ;;  %v6994_v21 = vmov %v6993_v3 }
 0xfed   : >> { %v2767_v27 = vadd.f32 %v2766_v39, %v2765_v23  ;;  %v6995_v23 = vld [vmem:[#allocation49_spill] sm:$0xff]  ;;  %v6996_v39 = vld [vmem:[#allocation46_spill] sm:$0xff] }
 0xfef   : >> { %v2768_v46 = vsel %vm386_vm3, %v2758_v17, %v2767_v27  ;;  %v6997_v17 = vld [vmem:[#allocation43_spill] sm:$0xff] }
 0xff0   : >> { %4241 = vmatmul.mubr.f32.vlgmr.msra.gmra.mxu0 %v2768_v46 }
 0xff1   : >> { %4244 = vmatpush3.msra.mxu0 %v6730_v22 }
 0xff2   : >> { %4245 = vmatprep.subr.mxu0 %v6898_v20 }
 0xff3   : >> { %4246 = vmatpush3.msra.mxu0 %v6898_v20 }
 0xff4   : >> { %4247 = vmatprep.subr.mxu0 %v6983_v18 }
 0xff5   : >> { %4248 = vmatpush3.msra.mxu0 %v6983_v18 }
 0xff6   : >> { %4249 = vmatprep.subr.mxu0 %v6984_v28 }
 0xff7   : >> { %4250 = vmatpush3.msra.mxu0 %v6984_v28 }
 0xff8   : >> { %4251 = vmatprep.subr.mxu0 %v6985_v5 }
 0xff9   : >> { %4252 = vmatpush3.msra.mxu0 %v6985_v5 }
 0xffa   : >> { %4253 = vmatprep.subr.mxu0 %v6986_v37 }
 0xffb   : >> { %4254 = vmatpush3.msra.mxu0 %v6986_v37 }
 0xffc   : >> { %4255 = vmatprep.subr.mxu0 %v6987_v15 }
 0xffd   : >> { %4256 = vmatpush3.msra.mxu0 %v6987_v15 }
 0xffe   : >> { %4257 = vmatprep.subr.mxu0 %v6988_v10 }
 0xfff   : >> { %4258 = vmatpush3.msra.mxu0 %v6988_v10 }
0x1000   : >> { %4259 = vmatprep.subr.mxu0 %v6989_v11 }
0x1001   : >> { %4260 = vmatpush3.msra.mxu0 %v6989_v11 }
0x1002   : >> { %4261 = vmatprep.subr.mxu0 %v6990_v26 }
0x1003   : >> { %4262 = vmatpush3.msra.mxu0 %v6990_v26 }
0x1004   : >> { %4263 = vmatprep.subr.mxu0 %v6991_v16 }
0x1005   : >> { %4264 = vmatpush3.msra.mxu0 %v6991_v16 }
0x1006   : >> { %4265 = vmatprep.subr.mxu0 %v6992_v9 }
0x1007   : >> { %4266 = vmatpush3.msra.mxu0 %v6992_v9 }
0x1008   : >> { %4267 = vmatprep.subr.mxu0 %v6993_v3 }
0x1009   : >> { %4268 = vmatpush3.msra.mxu0 %v6994_v21 }
0x100a   : >> { %4269 = vmatprep.subr.mxu0 %v6995_v23 }
0x100b   : >> { %4270 = vmatpush3.msra.mxu0 %v6995_v23 }
0x100c   : >> { %4271 = vmatprep.subr.mxu0 %v6996_v39 }
0x100d   : >> { %4272 = vmatpush3.msra.mxu0 %v6996_v39 }
0x100e   : >> { %4273 = vmatprep.subr.mxu0 %v6997_v17 }
0x100f   : >> { %4274 = vmatpush3.msra.mxu0 %v6997_v17  ;;  %v6998_v17 = vld [vmem:[#allocation97_spill] sm:$0xff] }
0x10b0   : >> { %v2835_v27 = vpop.f32.mrf.mxu0 }
0x10b1   : >> { %v2839_v46 = vmul.f32 0.00390625, %v2835_v27 }
0x10b2   : >> { %v4242_v5 = vpop.f32.mrf.mxu0 }
0x10b3   : >> { %v2840_v9 = vmul.f32 %v2839_v46, %v2839_v46 }
0x10b5   : >> { %v2842_v10 = vrot.slane %v2840_v9, 7 }
0x10b7   : >> { %v2844_v3 = vsub.f32 %v2839_v46, %v2842_v10 }
0x10b9   : >> { %v2845_v11 = vmax.f32 %v2844_v3, 0.0 }
0x10bb   : >> { %v2846_v15 = vadd.f32 1e-05, %v2845_v11 }
0x10bd   : >> { %4380 = vrsqrt.f32 %v2846_v15 }
0x10ca   : >> { %v4381_v16 = vpop.eup %4380 }
0x10cb   : >> { %v2848_v18 = vmul.f32 %v4381_v16, %v6831_v49 }
0x10cd   : >> { %v2850_v20 = vrot.slane %v2848_v18, 1  ;;  %v2860_v23 = vrot.slane %v2848_v18, %v5169_v41 }
0x10cf   : >> { %v2852_v21 = vmul.f32 %v2850_v20, %v2839_v46  ;;  %v2861_v5 = vmul.f32 %v2860_v23, %v6225_v25  ;;  %v2862_v9 = vmul.f32 %v2860_v23, %v6223_v12 }
0x10d1   : >> { %v2854_v22 = vrot.slane %v2852_v21, 5 }
0x10d3   : >> { %v2856_v26 = vsub.f32 %v6693_v51, %v2854_v22 }
0x10d5   : >> { %v2866_v28 = vrot.slane %v2856_v26, %v6998_v17 }
0x10d7   : >> { %v2867_v10 = vadd.f32 %v2866_v28, %v2861_v5  ;;  %v2868_v27 = vadd.f32 %v2866_v28, %v2862_v9 }
0x10d9   : >> { %v2869_v11 = vmax.f32 %v2867_v10, 0.0  ;;  %v2870_v15 = vmax.f32 %v2868_v27, 0.0 }
0x10db   : >> { %2936 = vmatmul.mubr.f32.vlgmr.msra.gmra.mxu1 %v2869_v11  ;;  %4275 = vmatprep.mubr.f32.mxu0 %v2869_v11 }
0x10dc   : >> { %4276 = vmatmul.mubr.f32.vlgmr.msra.gmra.mxu0 %v2870_v15  ;;  %2941 = vmatprep.mubr.f32.mxu1 %v6697_v34 }
0x10dd   : >> { %4279 = vmatpush3.msra.mxu1 %v6698_v13 }
0x10de   : >> { %4280 = vmatprep.subr.mxu1 %v6697_v34 }
0x10df   : >> { %2942 = vmatmul.mubr.f32.gmra.mxu1 %v2870_v15 }
0x10e0   : >> { %4281 = vmatpush3.msra.mxu1 %v5030_v7  ;;  %4310 = vmatprep.mubr.msk.f32.mxu1 %vm4450_vm2, %v6697_v34 }
0x10e1   : >> { %4282 = vmatprep.subr.mxu1 %v6697_v34 }
0x10e2   : >> { %4283 = vmatpush3.msra.mxu1 %v5028_v60 }
0x10e3   : >> { %4284 = vmatprep.subr.mxu1 %v6697_v34 }
0x10e4   : >> { %4285 = vmatpush3.msra.mxu1 %v6652_v1 }
0x10e5   : >> { %4286 = vmatprep.subr.mxu1 %v6697_v34 }
0x10e6   : >> { %4287 = vmatpush3.msra.mxu1 %v5024_v59 }
0x10e7   : >> { %4288 = vmatprep.subr.mxu1 %v6697_v34 }
0x10e8   : >> { %4289 = vmatpush3.msra.mxu1 %v5022_v58 }
0x10e9   : >> { %4290 = vmatprep.subr.mxu1 %v6697_v34 }
0x10ea   : >> { %4291 = vmatpush3.msra.mxu1 %v5020_v57 }
0x10eb   : >> { %4292 = vmatprep.subr.mxu1 %v6697_v34 }
0x10ec   : >> { %4293 = vmatpush3.msra.mxu1 %v5018_v56 }
0x10ed   : >> { %4294 = vmatprep.subr.mxu1 %v6697_v34 }
0x10ee   : >> { %4295 = vmatpush3.msra.mxu1 %v5016_v54 }
0x10ef   : >> { %4296 = vmatprep.subr.mxu1 %v6697_v34 }
0x10f0   : >> { %4297 = vmatpush3.msra.mxu1 %v5014_v53 }
0x10f1   : >> { %4298 = vmatprep.subr.mxu1 %v6697_v34 }
0x10f2   : >> { %4299 = vmatpush3.msra.mxu1 %v5012_v2 }
0x10f3   : >> { %4300 = vmatprep.subr.mxu1 %v6697_v34 }
0x10f4   : >> { %4301 = vmatpush3.msra.mxu1 %v5010_v61 }
0x10f5   : >> { %4302 = vmatprep.subr.mxu1 %v6697_v34 }
0x10f6   : >> { %4303 = vmatpush3.msra.mxu1 %v5008_v55 }
0x10f7   : >> { %4304 = vmatprep.subr.mxu1 %v6697_v34 }
0x10f8   : >> { %4305 = vmatpush3.msra.mxu1 %v5006_v63 }
0x10f9   : >> { %4306 = vmatprep.subr.mxu1 %v6697_v34 }
0x10fa   : >> { %4307 = vmatpush3.msra.mxu1 %v6653_v0 }
0x10fb   : >> { %4308 = vmatprep.subr.mxu1 %v6697_v34 }
0x10fc   : >> { %4309 = vmatpush3.msra.mxu1 %v5002_v62 }
0x119b   : >> { %v2937_v20 = vpop.f32.mrf.mxu1 }
0x119c   : >> { %v4277_v13 = vpop.f32.mrf.mxu0  ;;  %v3023_v28 = vrot.slane %v2937_v20, 7 }
0x119d   : >> { %v2939_v22 = vpop.f32.mrf.mxu1  ;;  %v3030_v12 = vrot.slane %v4277_v13, 1 }
0x119e   : >> { %v3014_v49 = vpop.f32.mrf.mxu0 }
0x119f   : >> { %v3029_v25 = vrot.slane %v3014_v49, 1  ;;  %v2943_v18 = vpop.f32.mrf.mxu1 }
0x11a0   : >> { %v3024_v26 = vrot.slane %v2943_v18, 7 }
0x11a1   : >> { %v2945_v16 = vpop.f32.mrf.mxu1  ;;  %v3032_v21 = vsel %vm654_vm4, %v3030_v12, %v3029_v25  ;;  %v3031_v9 = vsel %vm654_vm4, %v3029_v25, %v3030_v12 }
0x11a2   : >> { %v3026_v23 = vsel %vm647_vm5, %v3024_v26, %v3023_v28  ;;  %v3025_v34 = vsel %vm647_vm5, %v3023_v28, %v3024_v26  ;;  %v3034_v5 = vsel %vm361_vm1, %v3032_v21, 0.0 }
0x11a3   : >> { %v3027_v17 = vsel %vm358_vm0, %v3026_v23, 0.0  ;;  %v3036_v46 = vadd.f32 %v3025_v34, %v2945_v16 }
0x11a4   : >> { %v3035_v3 = vadd.f32 %v3027_v17, %v2939_v22 }
0x11a5   : >> { %v3038_v10 = vadd.f32 %v3036_v46, %v3034_v5 }
0x11a6   : >> { %v3037_v27 = vadd.f32 %v3035_v3, %v3031_v9 }
0x11a7   : >> { %v3047_v11 = vmul.f32 %v3038_v10, %v3038_v10 }
0x11a8   : >> { %v3039_v15 = vadd.f32 %v3038_v10, %v3037_v27  ;;  %v3046_v20 = vmul.f32 %v3037_v27, %v3037_v27 }
0x11aa   : >> { %v3040_v13 = vrot.slane %v3039_v15, 4  ;;  %v3048_v49 = vadd.f32 %v3047_v11, %v3046_v20 }
0x11ac   : >> { %v3041_v18 = vadd.f32 %v3040_v13, %v3039_v15  ;;  %v3049_v28 = vrot.slane %v3048_v49, 4 }
0x11ae   : >> { %v3042_v26 = vrot.slane %v3041_v18, 2  ;;  %v3050_v0 = vadd.f32 %v3049_v28, %v3048_v49 }
0x11b0   : >> { %v3043_v23 = vadd.f32 %v3042_v26, %v3041_v18  ;;  %v3051_v16 = vrot.slane %v3050_v0, 2 }
0x11b2   : >> { %v3044_v22 = vrot.slane %v3043_v23, 1  ;;  %v3052_v34 = vadd.f32 %v3051_v16, %v3050_v0 }
0x11b4   : >> { %v3053_v17 = vrot.slane %v3052_v34, 1  ;;  %v3045_v21 = vadd.f32 %v3044_v22, %v3043_v23 }
0x11b6   : >> { %v3054_v1 = vadd.f32 %v3053_v17, %v3052_v34 }
0x11b8   : >> { %v3055_v12 = vsel %vm386_vm3, %v3045_v21, %v3054_v1 }
0x11b9   : >> { %4311 = vmatmul.mubr.f32.vlgmr.msra.gmra.mxu1 %v3055_v12 }
0x1279   : >> { %v3122_v25 = vpop.f32.mrf.mxu1 }
0x127a   : >> { %v3126_v46 = vmul.f32 0.00390625, %v3122_v25 }
0x127b   : >> { %v4312_v3 = vpop.f32.mrf.mxu1 }
0x127c   : >> { %v3127_v5 = vmul.f32 %v3126_v46, %v3126_v46 }
0x127e   : >> { %v3129_v9 = vrot.slane %v3127_v5, 7 }
0x1280   : >> { %v3131_v11 = vsub.f32 %v3126_v46, %v3129_v9 }
0x1282   : >> { %v3132_v15 = vmax.f32 %v3131_v11, 0.0 }
0x1284   : >> { %v3133_v20 = vadd.f32 1e-05, %v3132_v15 }
0x1286   : >> { %4382 = vrsqrt.f32 %v3133_v20 }
0x1293   : >> { %v4383_v13 = vpop.eup %4382 }
0x1294   : >> { %v3135_v49 = vmul.f32 %v4383_v13, %v6927_v4 }
0x1296   : >> { %v3137_v18 = vrot.slane %v3135_v49, 1  ;;  %v3147_v26 = vrot.slane %v3135_v49, %v5169_v41 }
0x1298   : >> { %v3139_v0 = vmul.f32 %v3137_v18, %v3126_v46  ;;  %v3148_v23 = vmul.f32 %v3147_v26, %v3037_v27  ;;  %v3149_v16 = vmul.f32 %v3147_v26, %v3038_v10 }
0x129a   : >> { %v3141_v28 = vrot.slane %v3139_v0, 3 }
0x129c   : >> { %v3143_v1 = vsub.f32 %v6693_v51, %v3141_v28 }
0x129e   : >> { %v3153_v22 = vrot.slane %v3143_v1, %v6930_v40 }
0x12a0   : >> { %v3154_v34 = vadd.f32 %v3153_v22, %v3148_v23  ;;  %v3155_v17 = vadd.f32 %v3153_v22, %v3149_v16 }
0x12a2   : >> { %v3164_v21 = vadd.f32 %v6094_v8, %v3154_v34  ;;  %v3165_v12 = vadd.f32 %v6096_v19, %v3155_v17 }
0x12a4   : >> { %v3166_v25 = vmul.f32 0.083333336, %v3164_v21  ;;  %v3167_v3 = vmul.f32 0.083333336, %v3165_v12  ;;  %366 = sbr.rel (!%p364_p1) target bundleno = 80 (0x50), region = 82 }
0x12a6   : >> { %v3168_v5 = vadd.f32 %v6933_v24, %v3166_v25   ;;  %v3169_v46 = vadd.f32 %v6934_v14, %v3167_v3  }
0x12a8   : >> { %v6999_v4 = vmov %v3169_v46  ;;  %v7000_v3 = vmov %v3168_v5  ;;  %3170 = vst [vmem:[%s4515_s9] sm:$0xff] (%p364_p1), %v3168_v5  ;;  %3171 = vst [vmem:[%s4515_s9 + $0x8] sm:$0xff] (%p364_p1), %v3169_v46 }
0x12a9 PF: > { %s16_s18 = sadd.s32 1, %s4432_s18  }
0x12aa   : > { %p13_p2 = scmp.ge.s32.totalorder %s16_s18, 4  }
0x12ac   :  { %15 = sbr.rel (!%p13_p2) target bundleno = 1 (0x1), region = 93 }
0x12b1   :  { %3193 = vsyncpa [#allocation3], 1 }
0x12b2   :  { %3195 = vsyncpa [#allocation3 + $0x1], 1 }

</bundles_post_ra>
